<compile_context>
chip_gen: v5e
topology: v5e:2x2
jax: 0.10.0
libtpu: 0.0.40
codegen_flags: <defaults>
</compile_context>

<pallas_src>
import math

import jax
import jax.numpy as jnp
from jax.experimental import pallas as pl
from jax.experimental.pallas import tpu as pltpu

d_k = d_v = 64
d_model = 512
n_heads = 8

# Softmax elementwise-chain dtype: bf16 doubles VPU/EUP throughput on v6e/v7x.
# Set to jnp.float32 on v5e (no bf16 VPU/EUP). Row statistics are always f32.
_SOFTMAX_DTYPE = jnp.bfloat16


# ----------------------------------------------------------------------------
# Fused kernel. One grid step == (one batch element, one query tile).
# ----------------------------------------------------------------------------
def _mha_kernel(xq_ref, xk_ref, xv_ref, mask_ref,
                wq_ref, wk_ref, wv_ref, wfc_ref, g_ref, b_ref,
                out_ref, attn_ref):
    tq = xq_ref.shape[1]
    lk = xk_ref.shape[1]

    # ---- fused Q/K/V projections (bf16 MXU inputs, f32 accumulation) -------
    xq_f32 = xq_ref[0]                                   # [TQ, d_model] f32 (residual)
    xq = xq_f32.astype(jnp.bfloat16)
    xk = xk_ref[0].astype(jnp.bfloat16)
    xv = xv_ref[0].astype(jnp.bfloat16)

    # Full 512-deep contractions: the only full-utilization MXU work.
    # 1/sqrt(d_k) is already folded into wq_ref by the wrapper.
    q = jnp.dot(xq, wq_ref[...], preferred_element_type=jnp.float32)
    k = jnp.dot(xk, wk_ref[...], preferred_element_type=jnp.float32)
    v = jnp.dot(xv, wv_ref[...], preferred_element_type=jnp.float32)

    # One relayout per tensor into head-major [H, L, 64] (replaces 3*H
    # half-vreg lane slices + an H-way concat).
    q_hm = jnp.transpose(q.reshape(tq, n_heads, d_k), (1, 0, 2)).astype(jnp.bfloat16)
    k_hm = jnp.transpose(k.reshape(lk, n_heads, d_k), (1, 0, 2)).astype(jnp.bfloat16)
    v_hm = jnp.transpose(v.reshape(lk, n_heads, d_v), (1, 0, 2)).astype(jnp.bfloat16)

    masked = mask_ref[0] != 0                            # [TQ, Lk] bool, no i8->f32

    # ---- all heads at once: batched QK^T, softmax, attn @ V ----------------
    scores = jax.lax.dot_general(                        # [H, TQ, Lk] f32
        q_hm, k_hm, (((2,), (2,)), ((0,), (0,))),
        preferred_element_type=jnp.float32)
    scores = jnp.where(masked[None, :, :], jnp.float32(-1e9), scores)

    s_max = jnp.max(scores, axis=-1, keepdims=True)      # f32 row statistics
    p = jnp.exp((scores - s_max).astype(_SOFTMAX_DTYPE))
    denom = jnp.sum(p.astype(jnp.float32), axis=-1, keepdims=True)
    inv = pl.reciprocal(denom, approx=True).astype(_SOFTMAX_DTYPE)  # EUP slot
    attn = p * inv                                       # [H, TQ, Lk]

    # Single lane-dense bf16 store of all heads (vs 8 separate f32 stores).
    attn_ref[0] = attn.astype(attn_ref.dtype)

    ctx_hm = jax.lax.dot_general(                        # [H, TQ, d_v] f32
        attn.astype(jnp.bfloat16), v_hm, (((2,), (1,)), ((0,), (0,))),
        preferred_element_type=jnp.float32)
    ctx = jnp.transpose(ctx_hm, (1, 0, 2)).reshape(tq, n_heads * d_v)

    # ---- fc (full 512-deep) + residual + LayerNorm (f32 statistics) --------
    y = jnp.dot(ctx.astype(jnp.bfloat16), wfc_ref[...],
                preferred_element_type=jnp.float32) + xq_f32
    mean = jnp.mean(y, axis=-1, keepdims=True)
    var = jnp.mean((y - mean) ** 2, axis=-1, keepdims=True)
    y_hat = (y - mean) * jax.lax.rsqrt(var + 1e-5)
    out_ref[0] = (y_hat * g_ref[...] + b_ref[...]).astype(out_ref.dtype)


# ----------------------------------------------------------------------------
# Tiling / VMEM sizing helpers
# ----------------------------------------------------------------------------
def _pick_tq(lq):
    # TQ=256 keeps the MXU M dimension full on v6e/v7x (use 128 on v5e).
    for t in (256, 128, 64, 32, 16, 8):
        if lq % t == 0:
            return t
    return lq  # ragged short sequences: one full-height block


def _vmem_limit_bytes(tq, lk):
    f32, bf16, i8 = 4, 2, 1
    dbl = 2  # BlockSpec double-buffering
    blocks = (
        dbl * tq * d_model * f32                  # input_Q block
        + dbl * 2 * lk * d_model * f32            # input_K, input_V blocks
        + dbl * tq * lk * i8                      # mask block
        + dbl * 4 * d_model * d_model * bf16      # W_Q/W_K/W_V/W_fc (bf16)
        + dbl * 2 * d_model * f32                 # gamma, beta
        + dbl * tq * d_model * f32                # out block
        + dbl * n_heads * tq * lk * bf16          # attn block (bf16)
    )
    # In-kernel intermediates: f32 scores, bf16 p/attn, head-major q/k/v,
    # f32 ctx, plus slack for relayout copies.
    interm = (
        n_heads * tq * lk * (f32 + 2 * bf16)
        + (tq + 2 * lk) * d_model * (f32 + bf16)
        + 2 * tq * d_model * f32
    )
    est = int(1.5 * (blocks + interm))
    # Floor at ~default scoped limit; stay below physical VMEM (64 MiB on v7x
    # needs smaller TQ/Lk anyway if est is that large).
    return max(32 * 1024 * 1024, min(est, 96 * 1024 * 1024))


# ----------------------------------------------------------------------------
# Python wrapper reproducing MultiHeadAttention.forward
# ----------------------------------------------------------------------------
def multi_head_attention(input_Q, input_K, input_V, attn_mask, params):
    """
    input_Q: [B, Lq, d_model], input_K/input_V: [B, Lk, d_model]
    attn_mask: [B, Lq, Lk] bool (True = mask out)
    returns (normed_output [B, Lq, d_model] f32, attn [B, n_heads, Lq, Lk] bf16)
    """
    w_q, w_k, w_v, w_fc, gamma, beta = params
    B, Lq, _ = input_Q.shape
    Lk = input_K.shape[1]

    TQ = _pick_tq(Lq)
    n_q_tiles = Lq // TQ

    # bf16 weights for the MXU; fold 1/sqrt(d_k) into W_Q (tiny one-off op).
    wq_bf = (w_q * (1.0 / math.sqrt(d_k))).astype(jnp.bfloat16)
    wk_bf = w_k.astype(jnp.bfloat16)
    wv_bf = w_v.astype(jnp.bfloat16)
    wfc_bf = w_fc.astype(jnp.bfloat16)
    mask_i8 = attn_mask.astype(jnp.int8)  # 4x less mask DMA than f32

    out, attn = pl.pallas_call(
        _mha_kernel,
        out_shape=(
            jax.ShapeDtypeStruct((B, Lq, d_model), jnp.float32),
            # bf16 attention weights: halves the dominant HBM writeback and the
            # attn VMEM double-buffer (critical for v7x's 64 MiB VMEM).
            jax.ShapeDtypeStruct((B, n_heads, Lq, Lk), jnp.bfloat16),
        ),
        grid=(B, n_q_tiles),
        in_specs=[
            pl.BlockSpec((1, TQ, Lk and d_model), lambda b, qi: (b, qi, 0))
            if False else
            pl.BlockSpec((1, TQ, d_model), lambda b, qi: (b, qi, 0)),       # input_Q
            pl.BlockSpec((1, Lk, d_model), lambda b, qi: (b, 0, 0)),        # input_K (qi-invariant)
            pl.BlockSpec((1, Lk, d_model), lambda b, qi: (b, 0, 0)),        # input_V (qi-invariant)
            pl.BlockSpec((1, TQ, Lk), lambda b, qi: (b, qi, 0)),            # mask (int8)
            # TODO(synk): single-buffer the grid-invariant weights via
            # pipeline_mode=pl.Buffered(1) for extra VMEM headroom on v7x.
            pl.BlockSpec((d_model, n_heads * d_k), lambda b, qi: (0, 0)),   # W_Q
            pl.BlockSpec((d_model, n_heads * d_k), lambda b, qi: (0, 0)),   # W_K
            pl.BlockSpec((d_model, n_heads * d_v), lambda b, qi: (0, 0)),   # W_V
            pl.BlockSpec((n_heads * d_v, d_model), lambda b, qi: (0, 0)),   # fc
            pl.BlockSpec((1, d_model), lambda b, qi: (0, 0)),               # gamma
            pl.BlockSpec((1, d_model), lambda b, qi: (0, 0)),               # beta
        ],
        out_specs=(
            pl.BlockSpec((1, TQ, d_model), lambda b, qi: (b, qi, 0)),
            pl.BlockSpec((1, n_heads, TQ, Lk), lambda b, qi: (b, 0, qi, 0)),
        ),
        compiler_params=pltpu.CompilerParams(
            dimension_semantics=("parallel", "parallel"),
            vmem_limit_bytes=_vmem_limit_bytes(TQ, Lk),
        ),
    )(input_Q, input_K, input_V, mask_i8,
      wq_bf, wk_bf, wv_bf, wfc_bf, gamma, beta)

    return out, attn


# ----------------------------------------------------------------------------
# Pure-JAX f32 reference (for correctness check only).
# ----------------------------------------------------------------------------
def reference(input_Q, input_K, input_V, attn_mask, params):
    w_q, w_k, w_v, w_fc, gamma, beta = params
    B, Lq, _ = input_Q.shape
    Lk = input_K.shape[1]
    Q = (input_Q @ w_q).reshape(B, Lq, n_heads, d_k).transpose(0, 2, 1, 3)
    K = (input_K @ w_k).reshape(B, Lk, n_heads, d_k).transpose(0, 2, 1, 3)
    V = (input_V @ w_v).reshape(B, Lk, n_heads, d_v).transpose(0, 2, 1, 3)
    scores = jnp.einsum("bhqd,bhkd->bhqk", Q, K) / math.sqrt(d_k)
    scores = jnp.where(attn_mask[:, None, :, :], -1e9, scores)
    attn = jax.nn.softmax(scores, axis=-1)
    ctx = jnp.einsum("bhqk,bhkd->bhqd", attn, V)
    ctx = ctx.transpose(0, 2, 1, 3).reshape(B, Lq, n_heads * d_v)
    y = ctx @ w_fc + input_Q
    mean = jnp.mean(y, axis=-1, keepdims=True)
    var = jnp.mean((y - mean) ** 2, axis=-1, keepdims=True)
    y = (y - mean) * jax.lax.rsqrt(var + 1e-5) * gamma[0] + beta[0]
    return y, attn


if __name__ == "__main__":
    B, L = 2, 8

    key = jax.random.PRNGKey(0)
    k_q, k_k, k_v, k_wq, k_wk, k_wv, k_fc = jax.random.split(key, 7)

    input_Q = jax.random.normal(k_q, (B, L, d_model), dtype=jnp.float32)
    input_K = jax.random.normal(k_k, (B, L, d_model), dtype=jnp.float32)
    input_V = jax.random.normal(k_v, (B, L, d_model), dtype=jnp.float32)
    # Causal mask (True = positions to mask out), broadcast over batch.
    attn_mask = jnp.broadcast_to(
        jnp.triu(jnp.ones((L, L), dtype=bool), k=1), (B, L, L)
    )

    scale = 0.02
    params = (
        scale * jax.random.normal(k_wq, (d_model, n_heads * d_k), jnp.float32),
        scale * jax.random.normal(k_wk, (d_model, n_heads * d_k), jnp.float32),
        scale * jax.random.normal(k_wv, (d_model, n_heads * d_v), jnp.float32),
        scale * jax.random.normal(k_fc, (n_heads * d_v, d_model), jnp.float32),
        jnp.ones((1, d_model), jnp.float32),   # LayerNorm gamma
        jnp.zeros((1, d_model), jnp.float32),  # LayerNorm beta
    )

    out, attn = multi_head_attention(input_Q, input_K, input_V, attn_mask, params)
    out = jax.block_until_ready(out)
    attn = jax.block_until_ready(attn)

    ref_out, ref_attn = reference(input_Q, input_K, input_V, attn_mask, params)
    assert out.shape == (B, L, d_model)
    assert attn.shape == (B, n_heads, L, L)
    # Tolerances account for bf16 MXU inputs, bf16 softmax elementwise chain,
    # and bf16 attention-weights storage (statistics / LayerNorm stay f32).
    assert jnp.allclose(out, ref_out, atol=2e-2, rtol=2e-2)
    assert jnp.allclose(attn.astype(jnp.float32), ref_attn, atol=1.5e-2, rtol=3e-2)

    print("KERNEL_OK")
</pallas_src>

<mosaic_0001>
module attributes {stable_mosaic.version = 11 : i64} {
  func.func @_mha_kernel(%arg0: i32, %arg1: i32, %arg2: memref<1x8x512xf32, #tpu.memory_space<vmem>>, %arg3: memref<1x8x512xf32, #tpu.memory_space<vmem>>, %arg4: memref<1x8x512xf32, #tpu.memory_space<vmem>>, %arg5: memref<1x8x8xi8, #tpu.memory_space<vmem>>, %arg6: memref<512x512xbf16, #tpu.memory_space<vmem>>, %arg7: memref<512x512xbf16, #tpu.memory_space<vmem>>, %arg8: memref<512x512xbf16, #tpu.memory_space<vmem>>, %arg9: memref<512x512xbf16, #tpu.memory_space<vmem>>, %arg10: memref<1x512xf32, #tpu.memory_space<vmem>>, %arg11: memref<1x512xf32, #tpu.memory_space<vmem>>, %arg12: memref<1x8x512xf32, #tpu.memory_space<vmem>>, %arg13: memref<1x8x8x8xbf16, #tpu.memory_space<vmem>>) attributes {dimension_semantics = [#tpu.dimension_semantics<parallel>, #tpu.dimension_semantics<parallel>], iteration_bounds = array<i64: 2, 1>, scalar_prefetch = 0 : i64, scratch_operands = 0 : i64, tpu.core_type = #tpu.core_type<tc>, window_params = [{transform_indices = @transform_0, window_bounds = array<i64: 1, 8, 512>}, {transform_indices = @transform_1, window_bounds = array<i64: 1, 8, 512>}, {transform_indices = @transform_2, window_bounds = array<i64: 1, 8, 512>}, {transform_indices = @transform_3, window_bounds = array<i64: 1, 8, 8>}, {pipeline_mode = #tpu.pipeline_mode<synchronous>, transform_indices = @transform_4, window_bounds = array<i64: 512, 512>}, {pipeline_mode = #tpu.pipeline_mode<synchronous>, transform_indices = @transform_5, window_bounds = array<i64: 512, 512>}, {pipeline_mode = #tpu.pipeline_mode<synchronous>, transform_indices = @transform_6, window_bounds = array<i64: 512, 512>}, {pipeline_mode = #tpu.pipeline_mode<synchronous>, transform_indices = @transform_7, window_bounds = array<i64: 512, 512>}, {pipeline_mode = #tpu.pipeline_mode<synchronous>, transform_indices = @transform_8, window_bounds = array<i64: 1, 512>}, {pipeline_mode = #tpu.pipeline_mode<synchronous>, transform_indices = @transform_9, window_bounds = array<i64: 1, 512>}, {transform_indices = @transform_10, window_bounds = array<i64: 1, 8, 512>}, {transform_indices = @transform_11, window_bounds = array<i64: 1, 8, 8, 8>}]} {
    %c0 = arith.constant 0 : index
    %c0_0 = arith.constant 0 : index
    %c0_1 = arith.constant 0 : index
    %0 = vector.load %arg2[%c0, %c0_0, %c0_1] : memref<1x8x512xf32, #tpu.memory_space<vmem>>, vector<1x8x512xf32>
    %1 = vector.shape_cast %0 : vector<1x8x512xf32> to vector<8x512xf32>
    %2 = arith.truncf %1 : vector<8x512xf32> to vector<8x512xbf16>
    %c0_2 = arith.constant 0 : index
    %c0_3 = arith.constant 0 : index
    %c0_4 = arith.constant 0 : index
    %3 = vector.load %arg3[%c0_2, %c0_3, %c0_4] : memref<1x8x512xf32, #tpu.memory_space<vmem>>, vector<1x8x512xf32>
    %4 = vector.shape_cast %3 : vector<1x8x512xf32> to vector<8x512xf32>
    %5 = arith.truncf %4 : vector<8x512xf32> to vector<8x512xbf16>
    %c0_5 = arith.constant 0 : index
    %c0_6 = arith.constant 0 : index
    %c0_7 = arith.constant 0 : index
    %6 = vector.load %arg4[%c0_5, %c0_6, %c0_7] : memref<1x8x512xf32, #tpu.memory_space<vmem>>, vector<1x8x512xf32>
    %7 = vector.shape_cast %6 : vector<1x8x512xf32> to vector<8x512xf32>
    %8 = arith.truncf %7 : vector<8x512xf32> to vector<8x512xbf16>
    %c0_8 = arith.constant 0 : index
    %c0_9 = arith.constant 0 : index
    %9 = vector.load %arg6[%c0_8, %c0_9] : memref<512x512xbf16, #tpu.memory_space<vmem>>, vector<512x512xbf16>
    %cst = arith.constant dense<0.000000e+00> : vector<8x512xf32>
    %10 = tpu.matmul %2, %9, %cst {dimension_numbers = #tpu.dot_dimension_numbers<[1], [0], [0], [1], [0, 0, 1, 1], [], []>} : vector<8x512xbf16>, vector<512x512xbf16>, vector<8x512xf32> -> vector<8x512xf32>
    %c0_10 = arith.constant 0 : index
    %c0_11 = arith.constant 0 : index
    %11 = vector.load %arg7[%c0_10, %c0_11] : memref<512x512xbf16, #tpu.memory_space<vmem>>, vector<512x512xbf16>
    %cst_12 = arith.constant dense<0.000000e+00> : vector<8x512xf32>
    %12 = tpu.matmul %5, %11, %cst_12 {dimension_numbers = #tpu.dot_dimension_numbers<[1], [0], [0], [1], [0, 0, 1, 1], [], []>} : vector<8x512xbf16>, vector<512x512xbf16>, vector<8x512xf32> -> vector<8x512xf32>
    %c0_13 = arith.constant 0 : index
    %c0_14 = arith.constant 0 : index
    %13 = vector.load %arg8[%c0_13, %c0_14] : memref<512x512xbf16, #tpu.memory_space<vmem>>, vector<512x512xbf16>
    %cst_15 = arith.constant dense<0.000000e+00> : vector<8x512xf32>
    %14 = tpu.matmul %8, %13, %cst_15 {dimension_numbers = #tpu.dot_dimension_numbers<[1], [0], [0], [1], [0, 0, 1, 1], [], []>} : vector<8x512xbf16>, vector<512x512xbf16>, vector<8x512xf32> -> vector<8x512xf32>
    %15 = vector.shape_cast %10 : vector<8x512xf32> to vector<8x8x64xf32>
    %16 = tpu.transpose %15, [1, 0, 2] : vector<8x8x64xf32> -> vector<8x8x64xf32>
    %17 = arith.truncf %16 : vector<8x8x64xf32> to vector<8x8x64xbf16>
    %18 = vector.shape_cast %12 : vector<8x512xf32> to vector<8x8x64xf32>
    %19 = tpu.transpose %18, [1, 0, 2] : vector<8x8x64xf32> -> vector<8x8x64xf32>
    %20 = arith.truncf %19 : vector<8x8x64xf32> to vector<8x8x64xbf16>
    %21 = vector.shape_cast %14 : vector<8x512xf32> to vector<8x8x64xf32>
    %22 = tpu.transpose %21, [1, 0, 2] : vector<8x8x64xf32> -> vector<8x8x64xf32>
    %23 = arith.truncf %22 : vector<8x8x64xf32> to vector<8x8x64xbf16>
    %c0_16 = arith.constant 0 : index
    %c0_17 = arith.constant 0 : index
    %c0_18 = arith.constant 0 : index
    %24 = vector.load %arg5[%c0_16, %c0_17, %c0_18] : memref<1x8x8xi8, #tpu.memory_space<vmem>>, vector<1x8x8xi8>
    %25 = vector.shape_cast %24 : vector<1x8x8xi8> to vector<8x8xi8>
    %c0_i8 = arith.constant 0 : i8
    %26 = vector.broadcast %c0_i8 : i8 to vector<8x8xi8>
    %27 = arith.cmpi ne, %25, %26 : vector<8x8xi8>
    %cst_19 = arith.constant dense<0.000000e+00> : vector<8x8x8xf32>
    %28 = tpu.matmul %17, %20, %cst_19 {dimension_numbers = #tpu.dot_dimension_numbers<[2], [2], [1], [1], [0, 0, 0, 1, 1, 1], [0], [0]>} : vector<8x8x64xbf16>, vector<8x8x64xbf16>, vector<8x8x8xf32> -> vector<8x8x8xf32>
    %29 = vector.shape_cast %27 : vector<8x8xi1> to vector<1x8x8xi1>
    %cst_20 = arith.constant -1.000000e+09 : f32
    %30 = vector.shape_cast %29 : vector<1x8x8xi1> to vector<1x8x8xi1>
    %31 = vector.broadcast %30 : vector<1x8x8xi1> to vector<8x8x8xi1>
    %32 = vector.broadcast %cst_20 : f32 to vector<8x8x8xf32>
    %33 = arith.select %31, %32, %28 : vector<8x8x8xi1>, vector<8x8x8xf32>
    %cst_21 = arith.constant dense<0xFF800000> : vector<8x8xf32>
    %34 = vector.multi_reduction <maximumf>, %33, %cst_21 [2] : vector<8x8x8xf32> to vector<8x8xf32>
    %35 = vector.shape_cast %34 : vector<8x8xf32> to vector<8x8x1xf32>
    %36 = vector.broadcast %35 : vector<8x8x1xf32> to vector<8x8x8xf32>
    %37 = arith.subf %33, %36 : vector<8x8x8xf32>
    %38 = arith.truncf %37 : vector<8x8x8xf32> to vector<8x8x8xbf16>
    %39 = math.exp %38 : vector<8x8x8xbf16>
    %40 = arith.extf %39 : vector<8x8x8xbf16> to vector<8x8x8xf32>
    %cst_22 = arith.constant dense<0.000000e+00> : vector<8x8xf32>
    %41 = vector.multi_reduction <add>, %40, %cst_22 [2] : vector<8x8x8xf32> to vector<8x8xf32>
    %42 = vector.shape_cast %41 : vector<8x8xf32> to vector<8x8x1xf32>
    %43 = tpu.reciprocal %42 {approx = true} : vector<8x8x1xf32> -> vector<8x8x1xf32>
    %44 = arith.truncf %43 : vector<8x8x1xf32> to vector<8x8x1xbf16>
    %45 = vector.broadcast %44 : vector<8x8x1xbf16> to vector<8x8x8xbf16>
    %46 = arith.mulf %39, %45 : vector<8x8x8xbf16>
    %c0_23 = arith.constant 0 : index
    %c0_24 = arith.constant 0 : index
    %c0_25 = arith.constant 0 : index
    %c0_26 = arith.constant 0 : index
    %47 = vector.load %arg13[%c0_23, %c0_24, %c0_25, %c0_26] : memref<1x8x8x8xbf16, #tpu.memory_space<vmem>>, vector<1x8x8x8xbf16>
    %48 = vector.shape_cast %47 : vector<1x8x8x8xbf16> to vector<8x8x8xbf16>
    %49 = vector.shape_cast %46 : vector<8x8x8xbf16> to vector<1x8x8x8xbf16>
    tpu.vector_store %arg13[%c0_23, %c0_24, %c0_25, %c0_26], %49 {strides = array<i32>} : memref<1x8x8x8xbf16, #tpu.memory_space<vmem>>, vector<1x8x8x8xbf16>,
    %cst_27 = arith.constant dense<0.000000e+00> : vector<8x8x64xf32>
    %50 = tpu.matmul %46, %23, %cst_27 {dimension_numbers = #tpu.dot_dimension_numbers<[2], [1], [1], [2], [0, 0, 0, 1, 1, 2], [0], [0]>} : vector<8x8x8xbf16>, vector<8x8x64xbf16>, vector<8x8x64xf32> -> vector<8x8x64xf32>
    %51 = tpu.transpose %50, [1, 0, 2] : vector<8x8x64xf32> -> vector<8x8x64xf32>
    %52 = vector.shape_cast %51 : vector<8x8x64xf32> to vector<8x512xf32>
    %53 = arith.truncf %52 : vector<8x512xf32> to vector<8x512xbf16>
    %c0_28 = arith.constant 0 : index
    %c0_29 = arith.constant 0 : index
    %54 = vector.load %arg9[%c0_28, %c0_29] : memref<512x512xbf16, #tpu.memory_space<vmem>>, vector<512x512xbf16>
    %cst_30 = arith.constant dense<0.000000e+00> : vector<8x512xf32>
    %55 = tpu.matmul %53, %54, %cst_30 {dimension_numbers = #tpu.dot_dimension_numbers<[1], [0], [0], [1], [0, 0, 1, 1], [], []>} : vector<8x512xbf16>, vector<512x512xbf16>, vector<8x512xf32> -> vector<8x512xf32>
    %56 = arith.addf %55, %1 : vector<8x512xf32>
    %cst_31 = arith.constant dense<0.000000e+00> : vector<8xf32>
    %57 = vector.multi_reduction <add>, %56, %cst_31 [1] : vector<8x512xf32> to vector<8xf32>
    %58 = vector.shape_cast %57 : vector<8xf32> to vector<8x1xf32>
    %cst_32 = arith.constant 5.120000e+02 : f32
    %59 = vector.broadcast %cst_32 : f32 to vector<8x1xf32>
    %60 = arith.divf %58, %59 : vector<8x1xf32>
    %61 = vector.broadcast %60 : vector<8x1xf32> to vector<8x512xf32>
    %62 = arith.subf %56, %61 : vector<8x512xf32>
    %63 = arith.mulf %62, %62 : vector<8x512xf32>
    %cst_33 = arith.constant dense<0.000000e+00> : vector<8xf32>
    %64 = vector.multi_reduction <add>, %63, %cst_33 [1] : vector<8x512xf32> to vector<8xf32>
    %65 = vector.shape_cast %64 : vector<8xf32> to vector<8x1xf32>
    %cst_34 = arith.constant 5.120000e+02 : f32
    %66 = vector.broadcast %cst_34 : f32 to vector<8x1xf32>
    %67 = arith.divf %65, %66 : vector<8x1xf32>
    %68 = vector.broadcast %60 : vector<8x1xf32> to vector<8x512xf32>
    %69 = arith.subf %56, %68 : vector<8x512xf32>
    %cst_35 = arith.constant 9.99999974E-6 : f32
    %70 = vector.broadcast %cst_35 : f32 to vector<8x1xf32>
    %71 = arith.addf %67, %70 : vector<8x1xf32>
    %72 = math.rsqrt %71 : vector<8x1xf32>
    %73 = vector.broadcast %72 : vector<8x1xf32> to vector<8x512xf32>
    %74 = arith.mulf %69, %73 : vector<8x512xf32>
    %c0_36 = arith.constant 0 : index
    %c0_37 = arith.constant 0 : index
    %75 = vector.load %arg10[%c0_36, %c0_37] : memref<1x512xf32, #tpu.memory_space<vmem>>, vector<1x512xf32>
    %76 = vector.broadcast %75 : vector<1x512xf32> to vector<8x512xf32>
    %77 = arith.mulf %74, %76 : vector<8x512xf32>
    %c0_38 = arith.constant 0 : index
    %c0_39 = arith.constant 0 : index
    %78 = vector.load %arg11[%c0_38, %c0_39] : memref<1x512xf32, #tpu.memory_space<vmem>>, vector<1x512xf32>
    %79 = vector.broadcast %78 : vector<1x512xf32> to vector<8x512xf32>
    %80 = arith.addf %77, %79 : vector<8x512xf32>
    %c0_40 = arith.constant 0 : index
    %c0_41 = arith.constant 0 : index
    %c0_42 = arith.constant 0 : index
    %81 = vector.load %arg12[%c0_40, %c0_41, %c0_42] : memref<1x8x512xf32, #tpu.memory_space<vmem>>, vector<1x8x512xf32>
    %82 = vector.shape_cast %81 : vector<1x8x512xf32> to vector<8x512xf32>
    %83 = vector.shape_cast %80 : vector<8x512xf32> to vector<1x8x512xf32>
    tpu.vector_store %arg12[%c0_40, %c0_41, %c0_42], %83 {strides = array<i32>} : memref<1x8x512xf32, #tpu.memory_space<vmem>>, vector<1x8x512xf32>,
    return
  }
  func.func @transform_0(%arg0: i32, %arg1: i32) -> (i32, i32, i32) {
    %c0_i32 = arith.constant 0 : i32
    %c0_i32_0 = arith.constant 0 : i32
    return %arg0, %arg1, %c0_i32 : i32, i32, i32
  }
  func.func @transform_1(%arg0: i32, %arg1: i32) -> (i32, i32, i32) {
    %c0_i32 = arith.constant 0 : i32
    %c0_i32_0 = arith.constant 0 : i32
    %c0_i32_1 = arith.constant 0 : i32
    return %arg0, %c0_i32, %c0_i32_0 : i32, i32, i32
  }
  func.func @transform_2(%arg0: i32, %arg1: i32) -> (i32, i32, i32) {
    %c0_i32 = arith.constant 0 : i32
    %c0_i32_0 = arith.constant 0 : i32
    %c0_i32_1 = arith.constant 0 : i32
    return %arg0, %c0_i32, %c0_i32_0 : i32, i32, i32
  }
  func.func @transform_3(%arg0: i32, %arg1: i32) -> (i32, i32, i32) {
    %c0_i32 = arith.constant 0 : i32
    %c0_i32_0 = arith.constant 0 : i32
    return %arg0, %arg1, %c0_i32 : i32, i32, i32
  }
  func.func @transform_4(%arg0: i32, %arg1: i32) -> (i32, i32) {
    %c0_i32 = arith.constant 0 : i32
    %c0_i32_0 = arith.constant 0 : i32
    %c0_i32_1 = arith.constant 0 : i32
    return %c0_i32, %c0_i32_0 : i32, i32
  }
  func.func @transform_5(%arg0: i32, %arg1: i32) -> (i32, i32) {
    %c0_i32 = arith.constant 0 : i32
    %c0_i32_0 = arith.constant 0 : i32
    %c0_i32_1 = arith.constant 0 : i32
    return %c0_i32, %c0_i32_0 : i32, i32
  }
  func.func @transform_6(%arg0: i32, %arg1: i32) -> (i32, i32) {
    %c0_i32 = arith.constant 0 : i32
    %c0_i32_0 = arith.constant 0 : i32
    %c0_i32_1 = arith.constant 0 : i32
    return %c0_i32, %c0_i32_0 : i32, i32
  }
  func.func @transform_7(%arg0: i32, %arg1: i32) -> (i32, i32) {
    %c0_i32 = arith.constant 0 : i32
    %c0_i32_0 = arith.constant 0 : i32
    %c0_i32_1 = arith.constant 0 : i32
    return %c0_i32, %c0_i32_0 : i32, i32
  }
  func.func @transform_8(%arg0: i32, %arg1: i32) -> (i32, i32) {
    %c0_i32 = arith.constant 0 : i32
    %c0_i32_0 = arith.constant 0 : i32
    %c0_i32_1 = arith.constant 0 : i32
    return %c0_i32, %c0_i32_0 : i32, i32
  }
  func.func @transform_9(%arg0: i32, %arg1: i32) -> (i32, i32) {
    %c0_i32 = arith.constant 0 : i32
    %c0_i32_0 = arith.constant 0 : i32
    %c0_i32_1 = arith.constant 0 : i32
    return %c0_i32, %c0_i32_0 : i32, i32
  }
  func.func @transform_10(%arg0: i32, %arg1: i32) -> (i32, i32, i32) {
    %c0_i32 = arith.constant 0 : i32
    %c0_i32_0 = arith.constant 0 : i32
    return %arg0, %arg1, %c0_i32 : i32, i32, i32
  }
  func.func @transform_11(%arg0: i32, %arg1: i32) -> (i32, i32, i32, i32) {
    %c0_i32 = arith.constant 0 : i32
    %c0_i32_0 = arith.constant 0 : i32
    %c0_i32_1 = arith.constant 0 : i32
    return %arg0, %c0_i32, %arg1, %c0_i32_0 : i32, i32, i32, i32
  }
}

</mosaic_0001>

<bundles_post_ra>
// kernel: tpu_custom_call.1
= control target key start
LH: loop header
LB: loop body
LE: loop exit
PB: predicated region body
PF: predicated region fallthrough
CT: control target
= control target key end

     0   :  { %s10787_s0 = inlined_call_operand.hbm [shape: f32[2,8,512], index: 0, kind: input, shape index: {}]   ;;  %s10788_s1 = inlined_call_operand.hbm [shape: f32[2,8,512], index: 1, kind: input, shape index: {}]   ;;  %s10789_s2 = inlined_call_operand.hbm [shape: f32[2,8,512], index: 2, kind: input, shape index: {}]   ;;  %s10790_s3 = inlined_call_operand.hbm [shape: s8[2,8,8], index: 3, kind: input, shape index: {}]   ;;  %s10791_s4 = inlined_call_operand.hbm [shape: bf16[512,512], index: 4, kind: input, shape index: {}]   ;;  %s10792_s5 = inlined_call_operand.hbm [shape: bf16[512,512], index: 5, kind: input, shape index: {}]   ;;  %s10793_s6 = inlined_call_operand.hbm [shape: bf16[512,512], index: 6, kind: input, shape index: {}]   ;;  %s10794_s7 = inlined_call_operand.hbm [shape: bf16[512,512], index: 7, kind: input, shape index: {}]   ;;  %s10795_s8 = inlined_call_operand.vmem [shape: f32[1,512], index: 8, kind: input, shape index: {}]   ;;  %s10796_s9 = inlined_call_operand.vmem [shape: f32[1,512], index: 9, kind: input, shape index: {}]   ;;  %s10797_s10 = inlined_call_operand.hbm [shape: f32[2,8,512], index: 10, kind: output, shape index: {0}]   ;;  %s10798_s11 = inlined_call_operand.hbm [shape: bf16[2,8,8,8], index: 11, kind: output, shape index: {1}]  }
   0x1   :  { %10810 = sst [smem:[#allocation32_spill]] %s10787_s0 }
   0x2   :  { %10811 = sst [smem:[#allocation33_spill]] %s10788_s1 }
   0x3   :  { %10812 = sst [smem:[#allocation34_spill]] %s10791_s4 }
   0x4   :  { %10813 = sst [smem:[#allocation35_spill]] %s10792_s5 }
   0x5   :  { %10814 = sst [smem:[#allocation36_spill]] %s10795_s8 }
   0x6   :  { %10815 = sst [smem:[#allocation37_spill]] %s10796_s9 }
   0x7   :  { %10816 = sst [smem:[#allocation38_spill]] %s10797_s10 }
   0x8   :  { %10817 = sst [smem:[#allocation39_spill]] %s10798_s11 }
   0x9   :  { %17 = vsyncpa [#allocation3], 0 }
   0xa   :  { %19 = vsyncpa [#allocation3 + $0x1], 0 }
   0xb   :  { %20 = vsyncpa [#allocation6], 0 }
   0xc   :  { %22 = vsyncpa [#allocation6 + $0x1], 0 }
   0xd   :  { %23 = vsyncpa [#allocation9], 0 }
   0xe   :  { %25 = vsyncpa [#allocation9 + $0x1], 0 }
   0xf   :  { %26 = vsyncpa [#allocation12], 0 }
  0x10   :  { %27 = vsyncpa [#allocation15], 0 }
  0x11   :  { %28 = vsyncpa [#allocation4], 0 }
  0x12   :  { %30 = vsyncpa [#allocation4 + $0x1], 0 }
  0x13   :  { %31 = vsyncpa [#allocation18], 0 }
  0x14   :  { %33 = vsyncpa [#allocation18 + $0x1], 0  ;;  %s9638_s17 = smov 0   ;;  %s9640_s18 = smov 0  }
  0x15   :  { %s9642_s19 = smov 0   ;;  %s9644_s20 = smov 0  }
  0x16   :  { %s9646_s21 = smov 0   ;;  %s9648_s22 = smov 0  }
  0x17 LB: > { %10818 = sst [smem:[#allocation27_spill]] %s9544_s17  ;;  %s9669_s23 = sadd.s32 4294967295, %s9564_s22   ;;  %s9564_s22 = sphi %s9648_s22, %s39_s22   ;;  %s9560_s21 = sphi %s9646_s21, %s10851_s21   ;;  %s9556_s20 = sphi %s9644_s20, %s10850_s20   ;;  %s9552_s19 = sphi %s9642_s19, %s10846_s19   ;;  %s9548_s18 = sphi %s9640_s18, %s10849_s18   ;;  %s9544_s17 = sphi %s9638_s17, %s10848_s17  }
  0x18   : > { %10819 = sst [smem:[#allocation28_spill]] %s9552_s19  ;;  %s6361_s24 = sadd.s32 4294967294, %s9564_s22  }
  0x19   : > { %p73_p0 = scmp.ne.s32.totalorder %s9548_s18, %s9544_s17  ;;  %p74_p1 = scmp.eq.s32.totalorder %s9669_s23, 0 }
  0x1a   : > { %p305_p2 = scmp.eq.s32.totalorder %s9669_s23, 1  ;;  %p311_p3 = scmp.eq.s32.totalorder %s6361_s24, 1 }
  0x1b   : > { %p9678_p4 = por %p74_p1, %p73_p0  ;;  %p6362_p5 = scmp.ge.s32.totalorder %s9564_s22, 1 }
  0x1c   : > { %p9683_p6 = por %p311_p3, %p73_p0  ;;  %p346_p7 = scmp.lt.s32.totalorder %s9564_s22, 3 }
  0x1d   : > { %s10823_s4 = sld [smem:[#allocation34_spill]]  ;;  %s9566_s12 = smov [#allocation10]  }
  0x1e   : > { %s10821_s26 = scalar_select %p9683_p6, 1, 0 }
  0x1f   : > { %p9691_p8 = pnand %p6362_p5, %p346_p7  ;;  %s359_s13 = sshll.u32 %s9566_s12, 4  ;;  %s360_s13 = int_to_ptr.vmem [resolvable:$true] %s359_s13 }
  0x20   : > { %10822 = sst [smem:[#allocation29_spill]] %s10821_s26  ;;  %p6367_p11 = scmp.ge.s32.totalorder %s9564_s22, 2 }
  0x21   : > { %p9007_p9 = pneg %p9691_p8  ;;  %s10826_s5 = sld [smem:[#allocation35_spill]] }
  0x22   : > { %s10799_s27 = smov 256   ;;  %s10801_s28 = smov 16  }
  0x23   : > { %s357_s29 = sshll.u32 %s10823_s4, 4  ;;  %p9699_p10 = pnand %p9007_p9, %p74_p1  ;;  %s358_s29 = int_to_ptr.hbm [resolvable:$true] %s357_s29 }
  0x24   : > { %s9569_s12 = smov [#allocation11]   ;;  %s51_s15 = sadd.s32 1, %s9560_s21 }
  0x25   : > { %9010 = dma.hbm_to_vmem [thread:$0]  (!%p9699_p10), %s358_s29, 16384, %s360_s13, [#allocation9], %s10799_s27, %s10799_s27, %s10801_s28  }
  0x26   : > { %s373_s4 = sshll.u32 %s9569_s12, 4  ;;  %s60_s16 = sadd.s32 1, %s9552_s19  ;;  %s374_s4 = int_to_ptr.vmem [resolvable:$true] %s373_s4 }
  0x27   : > { %s371_s24 = sshll.u32 %s10826_s5, 4  ;;  %p53_p12 = scmp.ge.s32.totalorder %s51_s15, 2  ;;  %s372_s24 = int_to_ptr.hbm [resolvable:$true] %s371_s24 }
  0x28   : > { %9013 = dma.hbm_to_vmem [thread:$0]  (!%p9699_p10), %s372_s24, 16384, %s374_s4, [#allocation12], %s10799_s27, %s10799_s27, %s10801_s28  }
  0x29   : > { %p67_p13 = scmp.ne.s32.totalorder %s9552_s19, %s9548_s18  ;;  %p68_p0 = scmp.eq.s32.totalorder %s9564_s22, 0 }
  0x2a   : > { %p9044_p3 = scmp.lt.s32.totalorder %s9564_s22, 2  ;;  %s10853_s15 = smov (%p53_p12, %s51_s15), 0 }
  0x2b   : > { %10827 = sst [smem:[#allocation30_spill]] %s10853_s15  ;;  %p69_p5 = por %p68_p0, %p67_p13 }
  0x2c   : > { %p9727_p7 = por %p305_p2, %p67_p13  ;;  %s55_s13 = ssub.s32 %s9560_s21, %s10853_s15 }
  0x2d   : > { %s9734_s4 = sand.u32 1, %s9552_s19   ;;  %p58_p9 = scmp.eq.s32.totalorder %s55_s13, 0 }
  0x2e   : > { %s9737_s24 = sshll.u32 %s9734_s4, 5  ;;  %s9740_s12 = sshll.u32 %s9560_s21, 5 }
  0x2f   : > { %p9742_p12 = pnand %p9044_p3, %p69_p5  ;;  %s10808_s5 = sand.u32 1, %s9564_s22  }
  0x30   : > { %s9747_s28 = scalar_select %p58_p9, %s9552_s19, %s60_s16  }
  0x31   : > { %s10831_s1 = sld [smem:[#allocation33_spill]]  ;;  %s447_s13 = scalar_lea.vmem [#allocation5], %s9737_s24 }
  0x32   : > { %10830 = sst [smem:[#allocation31_spill]] %s9747_s28  ;;  %s456_s10 = sshll.u32 %s447_s13, 4  ;;  %s457_s10 = int_to_ptr.vmem [resolvable:$true] %s456_s10 }
  0x33   : > { %s9757_s8 = scalar_lea.sflag [#allocation6], %s10808_s5  ;;  %s385_s19 = sshll.u32 %s10793_s6, 4  ;;  %s386_s19 = int_to_ptr.hbm [resolvable:$true] %s385_s19 }
  0x34   : > { %s9570_s26 = smov [#allocation13]   ;;  %s10832_s5 = smov 16  }
  0x35   : > { %s387_s15 = sshll.u32 %s9570_s26, 4  ;;  %s10833_s11 = smov 256   ;;  %s388_s15 = int_to_ptr.vmem [resolvable:$true] %s387_s15 }
  0x36   : > { %9016 = dma.hbm_to_vmem [thread:$0]  (!%p9699_p10), %s386_s19, 16384, %s388_s15, [#allocation12], %s10833_s11, %s10833_s11, %s10832_s5  }
  0x37   : > { %s452_s17 = scalar_lea.hbm %s10831_s1, %s9740_s12  ;;  %s399_s1 = sshll.u32 %s10794_s7, 4  ;;  %s400_s1 = int_to_ptr.hbm [resolvable:$true] %s399_s1 }
  0x38   : > { %s454_s9 = sshll.u32 %s452_s17, 4  ;;  %s10834_s0 = sld [smem:[#allocation32_spill]]  ;;  %s455_s9 = int_to_ptr.hbm [resolvable:$true] %s454_s9 }
  0x39   : > { %9026 = dma.hbm_to_vmem [thread:$0]  (!%p9742_p12), %s455_s9, 512, %s457_s10, %s9757_s8  }
  0x3a   : > { %s9571_s9 = smov [#allocation14]   ;;  %s425_s17 = scalar_lea.vmem [#allocation2], %s9737_s24 }
  0x3b   : > { %s401_s10 = sshll.u32 %s9571_s9, 4  ;;  %s436_s13 = sshll.u32 %s425_s17, 4  ;;  %s402_s10 = int_to_ptr.vmem [resolvable:$true] %s401_s10  ;;  %s437_s13 = int_to_ptr.vmem [resolvable:$true] %s436_s13 }
  0x3c   : > { %9019 = dma.hbm_to_vmem [thread:$0]  (!%p9699_p10), %s400_s1, 16384, %s402_s10, [#allocation15], %s10833_s11, %s10833_s11, %s10832_s5  }
  0x3d   : > { %s422_s15 = scalar_lea.sflag [#allocation3], %s9734_s4  ;;  %s472_s1 = scalar_lea.hbm %s10789_s2, %s9740_s12 }
  0x3e   : > { %s432_s26 = scalar_lea.hbm %s10834_s0, %s9740_s12  ;;  %s467_s5 = scalar_lea.vmem [#allocation7], %s9737_s24 }
  0x3f   : > { %s434_s19 = sshll.u32 %s432_s26, 4  ;;  %s476_s11 = sshll.u32 %s467_s5, 4  ;;  %s435_s19 = int_to_ptr.hbm [resolvable:$true] %s434_s19  ;;  %s477_s11 = int_to_ptr.vmem [resolvable:$true] %s476_s11 }
  0x40   : > { %9023 = dma.hbm_to_vmem [thread:$0]  (!%p9742_p12), %s435_s19, 512, %s437_s13, %s422_s15  }
  0x41   : > { %s474_s10 = sshll.u32 %s472_s1, 4  ;;  %s6377_s28 = sshll.u32 %s9734_s4, 1  ;;  %s475_s10 = int_to_ptr.hbm [resolvable:$true] %s474_s10 }
  0x42   : > { %9029 = dma.hbm_to_vmem [thread:$0]  (!%p9742_p12), %s475_s10, 512, %s477_s11, %s9757_s8  }
  0x43   : > { %s6378_s16 = sshll.u32 %s9560_s21, 1  ;;  %s487_s13 = scalar_lea.vmem [#allocation8], %s6377_s28 }
  0x44   : > { %s492_s0 = scalar_lea.hbm %s10790_s3, %s6378_s16  ;;  %s496_s19 = sshll.u32 %s487_s13, 4  ;;  %s497_s19 = int_to_ptr.vmem [resolvable:$true] %s496_s19 }
  0x45   : > { %s494_s15 = sshll.u32 %s492_s0, 4  ;;  %s10835_s12 = sand.u32 1, %s9564_s22   ;;  %s495_s15 = int_to_ptr.hbm [resolvable:$true] %s494_s15 }
  0x46   : > { %s484_s14 = scalar_lea.sflag [#allocation9], %s10835_s12  ;;  %505 = sbr.rel (%p9691_p8) target bundleno = 1854 (0x73e), region = 60 }
  0x47   : > { %9032 = dma.hbm_to_vmem [thread:$0]  (!%p9742_p12), %s495_s15, 32, %s497_s19, %s484_s14  }
  0x48   : > { %s9806_s8 = sand.u32 (!%p9691_p8), 1, %s9548_s18  }
  0x49   : > { %s9809_s4 = sshll.u32 (!%p9691_p8), %s9806_s8, 5  ;;  %s508_s24 = scalar_lea.sflag (!%p9691_p8), [#allocation3], %s9806_s8 }
  0x4a   : > { %s9813_s0 = scalar_lea.vmem (!%p9691_p8), [#allocation2], %s9809_s4 }
  0x4b   : > { %9511 = dma.done.wait (%p9678_p4), %s508_s24, 512  }
  0x4c   : > { %9513 = vsyncadd (%p9678_p4), %s508_s24, 4294966784  ;;  %s517_s30 = sand.u32 1, %s9669_s23   ;;  %s9821_s9 = scalar_lea.vmem [#allocation5], %s9809_s4 }
  0x4d   : > { %s518_s27 = scalar_lea.sflag [#allocation6], %s517_s30 }
  0x4e   : > { %9515 = dma.done.wait (%p9678_p4), %s518_s27, 1024  }
  0x4f   : > { %9517 = vsyncadd (%p9678_p4), %s518_s27, 4294966272  ;;  %s6383_s1 = sshll.u32 %s9806_s8, 1  ;;  %s9829_s5 = scalar_lea.vmem [#allocation7], %s9809_s4 }
  0x50   : > { %s538_s11 = scalar_lea.sflag [#allocation9], %s517_s30  ;;  %s9831_s10 = scalar_lea.vmem [#allocation8], %s6383_s1 }
  0x51   : > { %9519 = dma.done.wait (%p9678_p4), %s538_s11, 32  }
  0x52   : > { %9521 = vsyncadd (%p9678_p4), %s538_s11, 4294967264 }
  0x53   : > { %9523 = dma.done.wait (%p74_p1), [#allocation9], 16384  }
  0x54   : > { %9525 = vsyncadd (%p74_p1), [#allocation9], 4294950912 }
  0x55   : > { %9527 = dma.done.wait (%p74_p1), [#allocation12], 32768  }
  0x56   : > { %9529 = vsyncadd (%p74_p1), [#allocation12], 4294934528 }
  0x57   : > { %9531 = dma.done.wait (%p74_p1), [#allocation15], 16384  }
  0x58   : > { %9533 = vsyncadd (%p74_p1), [#allocation15], 4294950912  ;;  %v6504_v0 = vld [vmem:[#allocation10 + $0xe0] sm:$0xf]  ;;  %v8495_v1 = vld [vmem:[#allocation10 + $0xec] sm:$0xf0] }
  0x59   : > { %v6632_v2 = vld [vmem:[#allocation10 + $0x1e0] sm:$0xf]  ;;  %v6505_v3 = vor.u32 %v8495_v1, %v6504_v0  ;;  %v8527_v4 = vld [vmem:[#allocation10 + $0x1ec] sm:$0xf0]  ;;  %vm3593_vm0 = vcmask 1047556   ;;  %s9572_s23 = smov 64  }
  0x5a   : > { %v6760_v5 = vld [vmem:[#allocation10 + $0x2e0] sm:$0xf]  ;;  %v8559_v6 = vld [vmem:[#allocation10 + $0x2ec] sm:$0xf0]  ;;  %v6633_v7 = vor.u32 %v8527_v4, %v6632_v2  ;;  %vm4323_vm1 = vcmask 523264   ;;  %vm4489_vm4 = vcmask 64512  }
  0x5b   : > { %v6761_v8 = vor.u32 %v8559_v6, %v6760_v5  ;;  %v6888_v9 = vld [vmem:[#allocation10 + $0x3e0] sm:$0xf]  ;;  %v8591_v10 = vld [vmem:[#allocation10 + $0x3ec] sm:$0xf0]  ;;  %1416 = vmatpush.bf16.msra.mxu0 %v6505_v3  ;;  %vm4646_vm5 = vcmask 1043456   ;;  %vm4634_vm6 = vcmask 60416  }
  0x5c   : > { %v6488_v11 = vld [vmem:[#allocation10 + $0xc0] sm:$0xf]  ;;  %v6889_v12 = vor.u32 %v8591_v10, %v6888_v9  ;;  %v8491_v13 = vld [vmem:[#allocation10 + $0xcc] sm:$0xf0]  ;;  %1429 = vmatpush.bf16.msra.mxu1 %v6633_v7  ;;  %s10485_s25 = scalar_lea.vmem [#allocation17], %s9809_s4  ;;  %s8977_s28 = sshll.u32 %s9556_s20, 5 }
  0x5d   : > { %v6616_v14 = vld [vmem:[#allocation10 + $0x1c0] sm:$0xf]  ;;  %v8523_v15 = vld [vmem:[#allocation10 + $0x1cc] sm:$0xf0]  ;;  %1442 = vmatpush.bf16.msra.mxu2 %v6761_v8  ;;  %v6489_v16 = vor.u32 %v8491_v13, %v6488_v11  ;;  %s10838_s17 = sld [smem:[#allocation39_spill]]  ;;  %s6130_s12 = sshll.u32 %s10485_s25, 4  ;;  %s6131_s12 = int_to_ptr.vmem [resolvable:$true] %s6130_s12 }
  0x5e   : > { %v6617_v17 = vor.u32 %v8523_v15, %v6616_v14  ;;  %v6744_v18 = vld [vmem:[#allocation10 + $0x2c0] sm:$0xf]  ;;  %v8555_v19 = vld [vmem:[#allocation10 + $0x2cc] sm:$0xf0]  ;;  %1455 = vmatpush.bf16.msra.mxu3 %v6889_v12  ;;  %s6100_s14 = scalar_lea.sflag [#allocation18], %s9806_s8 }
  0x5f   : > { %v6872_v20 = vld [vmem:[#allocation10 + $0x3c0] sm:$0xf]  ;;  %v6745_v21 = vor.u32 %v8555_v19, %v6744_v18  ;;  %v8587_v22 = vld [vmem:[#allocation10 + $0x3cc] sm:$0xf0]  ;;  %1417 = vmatpush.bf16.msra.mxu0 %v6489_v16 }
  0x60   : > { %v6472_v23 = vld [vmem:[#allocation10 + $0xa0] sm:$0xf]  ;;  %v8487_v24 = vld [vmem:[#allocation10 + $0xac] sm:$0xf0]  ;;  %v6873_v25 = vor.u32 %v8587_v22, %v6872_v20  ;;  %1430 = vmatpush.bf16.msra.mxu1 %v6617_v17 }
  0x61   : > { %v6600_v26 = vld [vmem:[#allocation10 + $0x1a0] sm:$0xf]  ;;  %v8519_v27 = vld [vmem:[#allocation10 + $0x1ac] sm:$0xf0]  ;;  %v6473_v29 = vor.u32 %v8487_v24, %v6472_v23  ;;  %1443 = vmatpush.bf16.msra.mxu2 %v6745_v21 }
  0x62   : > { %v6728_v28 = vld [vmem:[#allocation10 + $0x2a0] sm:$0xf]  ;;  %v8551_v30 = vld [vmem:[#allocation10 + $0x2ac] sm:$0xf0]  ;;  %v6601_v33 = vor.u32 %v8519_v27, %v6600_v26  ;;  %1456 = vmatpush.bf16.msra.mxu3 %v6873_v25 }
  0x63   : > { %v6856_v31 = vld [vmem:[#allocation10 + $0x3a0] sm:$0xf]  ;;  %v8583_v32 = vld [vmem:[#allocation10 + $0x3ac] sm:$0xf0]  ;;  %v6729_v34 = vor.u32 %v8551_v30, %v6728_v28  ;;  %1418 = vmatpush.bf16.msra.mxu0 %v6473_v29  ;;  %v8493_v28 = vld [vmem:[#allocation10 + $0xe4] sm:$0xf]  ;;  %s10839_s13 = smov %s10838_s17  ;;  %s6129_s19 = scalar_lea.hbm %s10838_s17, %s8977_s28 }
  0x64   : > { %v6456_v35 = vld [vmem:[#allocation10 + $0x80] sm:$0xf]  ;;  %v8483_v36 = vld [vmem:[#allocation10 + $0x8c] sm:$0xf0]  ;;  %v6857_v38 = vor.u32 %v8583_v32, %v6856_v31  ;;  %1431 = vmatpush.bf16.msra.mxu1 %v6601_v33  ;;  %v6506_v29 = vld [vmem:[#allocation10 + $0xf0] sm:$0xf0] }
  0x65   : > { %v6584_v37 = vld [vmem:[#allocation10 + $0x180] sm:$0xf]  ;;  %v8515_v39 = vld [vmem:[#allocation10 + $0x18c] sm:$0xf0]  ;;  %v6457_v44 = vor.u32 %v8483_v36, %v6456_v35  ;;  %1444 = vmatpush.bf16.msra.mxu2 %v6729_v34  ;;  %v8525_v30 = vld [vmem:[#allocation10 + $0x1e4] sm:$0xf] }
  0x66   : > { %v6712_v40 = vld [vmem:[#allocation10 + $0x280] sm:$0xf]  ;;  %v8547_v41 = vld [vmem:[#allocation10 + $0x28c] sm:$0xf0]  ;;  %v6585_v45 = vor.u32 %v8515_v39, %v6584_v37  ;;  %1457 = vmatpush.bf16.msra.mxu3 %v6857_v38  ;;  %v6634_v32 = vld [vmem:[#allocation10 + $0x1f0] sm:$0xf0] }
  0x67   : > { %v6840_v42 = vld [vmem:[#allocation10 + $0x380] sm:$0xf]  ;;  %v8579_v43 = vld [vmem:[#allocation10 + $0x38c] sm:$0xf0]  ;;  %v6713_v46 = vor.u32 %v8547_v41, %v6712_v40  ;;  %1419 = vmatpush.bf16.msra.mxu0 %v6457_v44  ;;  %v8557_v33 = vld [vmem:[#allocation10 + $0x2e4] sm:$0xf]  ;;  %v6509_v40 = vor.u32 %v8493_v28, %v6506_v29  ;;  %v6637_v41 = vor.u32 %v8525_v30, %v6634_v32 }
  0x68   : > { %v6440_v47 = vld [vmem:[#allocation10 + $0x60] sm:$0xf]  ;;  %v8479_v48 = vld [vmem:[#allocation10 + $0x6c] sm:$0xf0]  ;;  %v6841_v50 = vor.u32 %v8579_v43, %v6840_v42  ;;  %1432 = vmatpush.bf16.msra.mxu1 %v6585_v45  ;;  %v6762_v34 = vld [vmem:[#allocation10 + $0x2f0] sm:$0xf0] }
  0x69   : > { %v6568_v49 = vld [vmem:[#allocation10 + $0x160] sm:$0xf]  ;;  %v8511_v51 = vld [vmem:[#allocation10 + $0x16c] sm:$0xf0]  ;;  %v6441_v56 = vor.u32 %v8479_v48, %v6440_v47  ;;  %1445 = vmatpush.bf16.msra.mxu2 %v6713_v46  ;;  %v8589_v37 = vld [vmem:[#allocation10 + $0x3e4] sm:$0xf]  ;;  %v6765_v42 = vor.u32 %v8557_v33, %v6762_v34 }
  0x6a   : > { %v6696_v52 = vld [vmem:[#allocation10 + $0x260] sm:$0xf]  ;;  %v8543_v53 = vld [vmem:[#allocation10 + $0x26c] sm:$0xf0]  ;;  %v6569_v57 = vor.u32 %v8511_v51, %v6568_v49  ;;  %1458 = vmatpush.bf16.msra.mxu3 %v6841_v50  ;;  %v6890_v38 = vld [vmem:[#allocation10 + $0x3f0] sm:$0xf0] }
  0x6b   : > { %v6824_v54 = vld [vmem:[#allocation10 + $0x360] sm:$0xf]  ;;  %v8575_v55 = vld [vmem:[#allocation10 + $0x36c] sm:$0xf0]  ;;  %v6697_v58 = vor.u32 %v8543_v53, %v6696_v52  ;;  %1420 = vmatpush.bf16.msra.mxu0 %v6441_v56  ;;  %v8489_v43 = vld [vmem:[#allocation10 + $0xc4] sm:$0xf]  ;;  %v6893_v46 = vor.u32 %v8589_v37, %v6890_v38 }
  0x6c   : > { %v6424_v59 = vld [vmem:[#allocation10 + $0x40] sm:$0xf]  ;;  %v8475_v60 = vld [vmem:[#allocation10 + $0x4c] sm:$0xf0]  ;;  %v6825_v62 = vor.u32 %v8575_v55, %v6824_v54  ;;  %1433 = vmatpush.bf16.msra.mxu1 %v6569_v57  ;;  %v6490_v44 = vld [vmem:[#allocation10 + $0xd0] sm:$0xf0] }
  0x6d   : > { %v6552_v61 = vld [vmem:[#allocation10 + $0x140] sm:$0xf]  ;;  %v8507_v63 = vld [vmem:[#allocation10 + $0x14c] sm:$0xf0]  ;;  %v6425_v4 = vor.u32 %v8475_v60, %v6424_v59  ;;  %1446 = vmatpush.bf16.msra.mxu2 %v6697_v58  ;;  %v8521_v45 = vld [vmem:[#allocation10 + $0x1c4] sm:$0xf]  ;;  %v6493_v53 = vor.u32 %v8489_v43, %v6490_v44 }
  0x6e   : > { %v6680_v0 = vld [vmem:[#allocation10 + $0x240] sm:$0xf]  ;;  %v8539_v1 = vld [vmem:[#allocation10 + $0x24c] sm:$0xf0]  ;;  %v6553_v5 = vor.u32 %v8507_v63, %v6552_v61  ;;  %1459 = vmatpush.bf16.msra.mxu3 %v6825_v62  ;;  %v6618_v47 = vld [vmem:[#allocation10 + $0x1d0] sm:$0xf0] }
  0x6f   : > { %v6808_v2 = vld [vmem:[#allocation10 + $0x340] sm:$0xf]  ;;  %v8571_v3 = vld [vmem:[#allocation10 + $0x34c] sm:$0xf0]  ;;  %v6681_v6 = vor.u32 %v8539_v1, %v6680_v0  ;;  %1421 = vmatpush.bf16.msra.mxu0 %v6425_v4  ;;  %v8553_v48 = vld [vmem:[#allocation10 + $0x2c4] sm:$0xf]  ;;  %v6621_v58 = vor.u32 %v8521_v45, %v6618_v47 }
  0x70   : > { %v6408_v7 = vld [vmem:[#allocation10 + $0x20] sm:$0xf]  ;;  %v8471_v8 = vld [vmem:[#allocation10 + $0x2c] sm:$0xf0]  ;;  %v6809_v10 = vor.u32 %v8571_v3, %v6808_v2  ;;  %1434 = vmatpush.bf16.msra.mxu1 %v6553_v5  ;;  %v6746_v49 = vld [vmem:[#allocation10 + $0x2d0] sm:$0xf0] }
  0x71   : > { %v6536_v9 = vld [vmem:[#allocation10 + $0x120] sm:$0xf]  ;;  %v8503_v11 = vld [vmem:[#allocation10 + $0x12c] sm:$0xf0]  ;;  %v6409_v16 = vor.u32 %v8471_v8, %v6408_v7  ;;  %1447 = vmatpush.bf16.msra.mxu2 %v6681_v6  ;;  %v8585_v50 = vld [vmem:[#allocation10 + $0x3c4] sm:$0xf]  ;;  %v6749_v59 = vor.u32 %v8553_v48, %v6746_v49 }
  0x72   : > { %v6664_v12 = vld [vmem:[#allocation10 + $0x220] sm:$0xf]  ;;  %v8535_v13 = vld [vmem:[#allocation10 + $0x22c] sm:$0xf0]  ;;  %v6537_v19 = vor.u32 %v8503_v11, %v6536_v9  ;;  %1460 = vmatpush.bf16.msra.mxu3 %v6809_v10  ;;  %v6874_v51 = vld [vmem:[#allocation10 + $0x3d0] sm:$0xf0] }
  0x73   : > { %v6792_v14 = vld [vmem:[#allocation10 + $0x320] sm:$0xf]  ;;  %v8567_v15 = vld [vmem:[#allocation10 + $0x32c] sm:$0xf0]  ;;  %v6665_v20 = vor.u32 %v8535_v13, %v6664_v12  ;;  %1422 = vmatpush.bf16.msra.mxu0 %v6409_v16  ;;  %v8485_v54 = vld [vmem:[#allocation10 + $0xa4] sm:$0xf]  ;;  %v6877_v63 = vor.u32 %v8585_v50, %v6874_v51 }
  0x74   : > { %v6392_v17 = vld [vmem:[#allocation10] sm:$0xf]  ;;  %v8467_v18 = vld [vmem:[#allocation10 + $0xc] sm:$0xf0]  ;;  %v6793_v24 = vor.u32 %v8567_v15, %v6792_v14  ;;  %1435 = vmatpush.bf16.msra.mxu1 %v6537_v19  ;;  %v6474_v55 = vld [vmem:[#allocation10 + $0xb0] sm:$0xf0] }
  0x75   : > { %v6520_v21 = vld [vmem:[#allocation10 + $0x100] sm:$0xf]  ;;  %v8499_v22 = vld [vmem:[#allocation10 + $0x10c] sm:$0xf0]  ;;  %v6393_v31 = vor.u32 %v8467_v18, %v6392_v17  ;;  %1448 = vmatpush.bf16.msra.mxu2 %v6665_v20  ;;  %v8517_v56 = vld [vmem:[#allocation10 + $0x1a4] sm:$0xf]  ;;  %v6477_v8 = vor.u32 %v8485_v54, %v6474_v55 }
  0x76   : > { %v6648_v23 = vld [vmem:[#allocation10 + $0x200] sm:$0xf]  ;;  %v8531_v25 = vld [vmem:[#allocation10 + $0x20c] sm:$0xf0]  ;;  %v6521_v35 = vor.u32 %v8499_v22, %v6520_v21  ;;  %1461 = vmatpush.bf16.msra.mxu3 %v6793_v24  ;;  %v6602_v60 = vld [vmem:[#allocation10 + $0x1b0] sm:$0xf0] }
  0x77   : > { %v6776_v26 = vld [vmem:[#allocation10 + $0x300] sm:$0xf]  ;;  %v8563_v27 = vld [vmem:[#allocation10 + $0x30c] sm:$0xf0]  ;;  %v6649_v36 = vor.u32 %v8531_v25, %v6648_v23  ;;  %1423 = vmatpush.bf16.msra.mxu0 %v6393_v31  ;;  %v8549_v61 = vld [vmem:[#allocation10 + $0x2a4] sm:$0xf]  ;;  %v6605_v9 = vor.u32 %v8517_v56, %v6602_v60 }
  0x78   : > { %v6777_v39 = vor.u32 %v8563_v27, %v6776_v26  ;;  %1436 = vmatpush.bf16.msra.mxu1 %v6521_v35  ;;  %v626_v52 = vld [vmem:[%s9813_s0 + $0x10] sm:$0xff]  ;;  %v6730_v62 = vld [vmem:[#allocation10 + $0x2b0] sm:$0xf0]  ;;  %v624_v1 = vld [vmem:[%s9813_s0] sm:$0xff]  ;;  %s6132_s15 = sshll.u32 %s6129_s19, 4  ;;  %s6133_s15 = int_to_ptr.hbm [resolvable:$true] %s6132_s15 }
  0x79   : > { %1449 = vmatpush.bf16.msra.mxu2 %v6649_v36  ;;  %v9850_v57 = vpack.c.bf16 %v626_v52, %v626_v52  ;;  %v627_v0 = vld [vmem:[%s9813_s0 + $0x18] sm:$0xff]  ;;  %v625_v2 = vld [vmem:[%s9813_s0 + $0x8] sm:$0xff]  ;;  %v9858_v6 = vpack.c.bf16 %v624_v1, %v624_v1  ;;  %v6733_v10 = vor.u32 %v8549_v61, %v6730_v62  ;;  %s9444_s24 = sshra.s32 %s6133_s15, 4  ;;  %s9445_s24 = int_to_ptr.hbm [resolvable:$true] %s9444_s24 }
  0x7a   : > { %1462 = vmatpush.bf16.msra.mxu3 %v6777_v39  ;;  %v8581_v3 = vld [vmem:[#allocation10 + $0x3a4] sm:$0xf]  ;;  %v6858_v4 = vld [vmem:[#allocation10 + $0x3b0] sm:$0xf0]  ;;  %v9856_v5 = vpack.c.bf16 %v627_v0, %v627_v0  ;;  %v9860_v7 = vpack.c.bf16 %v625_v2, %v625_v2  ;;  %p9451_p8 = scmp.lt.s32.totalorder %s9445_s24, %s10839_s13 }
  0x7b   : > { %1468 = vmatpush.bf16.msrb.mxu0 %v6509_v40  ;;  %v8481_v11 = vld [vmem:[#allocation10 + $0x84] sm:$0xf]  ;;  %v6458_v12 = vld [vmem:[#allocation10 + $0x90] sm:$0xf0]  ;;  %v6861_v14 = vor.u32 %v8581_v3, %v6858_v4 }
  0x7c   : > { %1481 = vmatpush.bf16.msrb.mxu1 %v6637_v41  ;;  %1450 = vmatmul.bf16.vlgmr.msra.gmra.mxu2 %v9850_v57  ;;  %v8513_v13 = vld [vmem:[#allocation10 + $0x184] sm:$0xf]  ;;  %v6586_v15 = vld [vmem:[#allocation10 + $0x190] sm:$0xf0]  ;;  %v6461_v20 = vor.u32 %v8481_v11, %v6458_v12  ;;  %v8528_v12 = vld [vmem:[#allocation10 + $0x1f4] sm:$0xf0] }
  0x7d   : > { %1494 = vmatpush.bf16.msrb.mxu2 %v6765_v42  ;;  %v8545_v16 = vld [vmem:[#allocation10 + $0x284] sm:$0xf]  ;;  %v6714_v17 = vld [vmem:[#allocation10 + $0x290] sm:$0xf0]  ;;  %1424 = vmatmul.bf16.vlgmr.msra.gmra.mxu0 %v9858_v6  ;;  %v6589_v21 = vor.u32 %v8513_v13, %v6586_v15  ;;  %v6768_v13 = vld [vmem:[#allocation10 + $0x2e8] sm:$0xf] }
  0x7e   : > { %1507 = vmatpush.bf16.msrb.mxu3 %v6893_v46  ;;  %v8577_v18 = vld [vmem:[#allocation10 + $0x384] sm:$0xf]  ;;  %v6842_v19 = vld [vmem:[#allocation10 + $0x390] sm:$0xf0]  ;;  %1437 = vmatmul.bf16.vlgmr.msra.gmra.mxu1 %v9860_v7  ;;  %v6717_v22 = vor.u32 %v8545_v16, %v6714_v17  ;;  %v6896_v17 = vld [vmem:[#allocation10 + $0x3e8] sm:$0xf] }
  0x7f   : > { %1469 = vmatpush.bf16.msrb.mxu0 %v6493_v53  ;;  %1463 = vmatmul.bf16.vlgmr.msra.gmra.mxu3 %v9856_v5  ;;  %v8477_v23 = vld [vmem:[#allocation10 + $0x64] sm:$0xf]  ;;  %v6442_v24 = vld [vmem:[#allocation10 + $0x70] sm:$0xf0]  ;;  %v6845_v26 = vor.u32 %v8577_v18, %v6842_v19  ;;  %v8592_v18 = vld [vmem:[#allocation10 + $0x3f4] sm:$0xf0] }
  0x80   : > { %1482 = vmatpush.bf16.msrb.mxu1 %v6621_v58  ;;  %v8509_v25 = vld [vmem:[#allocation10 + $0x164] sm:$0xf]  ;;  %v6570_v27 = vld [vmem:[#allocation10 + $0x170] sm:$0xf0]  ;;  %v6445_v32 = vor.u32 %v8477_v23, %v6442_v24  ;;  %v6496_v23 = vld [vmem:[#allocation10 + $0xc8] sm:$0xf] }
  0x81   : > { %1495 = vmatpush.bf16.msrb.mxu2 %v6749_v59  ;;  %v8541_v28 = vld [vmem:[#allocation10 + $0x264] sm:$0xf]  ;;  %v6698_v29 = vld [vmem:[#allocation10 + $0x270] sm:$0xf0]  ;;  %v6573_v33 = vor.u32 %v8509_v25, %v6570_v27  ;;  %v8492_v24 = vld [vmem:[#allocation10 + $0xd4] sm:$0xf0] }
  0x82   : > { %1508 = vmatpush.bf16.msrb.mxu3 %v6877_v63  ;;  %v8573_v30 = vld [vmem:[#allocation10 + $0x364] sm:$0xf]  ;;  %v6826_v31 = vld [vmem:[#allocation10 + $0x370] sm:$0xf0]  ;;  %v6701_v34 = vor.u32 %v8541_v28, %v6698_v29  ;;  %v6624_v25 = vld [vmem:[#allocation10 + $0x1c8] sm:$0xf] }
  0x83   : > { %1470 = vmatpush.bf16.msrb.mxu0 %v6477_v8  ;;  %v8473_v35 = vld [vmem:[#allocation10 + $0x44] sm:$0xf]  ;;  %v6426_v36 = vld [vmem:[#allocation10 + $0x50] sm:$0xf0]  ;;  %v6829_v38 = vor.u32 %v8573_v30, %v6826_v31  ;;  %v6512_v8 = vld [vmem:[#allocation10 + $0xe8] sm:$0xf] }
  0x84   : > { %1483 = vmatpush.bf16.msrb.mxu1 %v6605_v9  ;;  %v8505_v37 = vld [vmem:[#allocation10 + $0x144] sm:$0xf]  ;;  %v6554_v39 = vld [vmem:[#allocation10 + $0x150] sm:$0xf0]  ;;  %v6429_v44 = vor.u32 %v8473_v35, %v6426_v36  ;;  %v8496_v9 = vld [vmem:[#allocation10 + $0xf4] sm:$0xf0] }
  0x85   : > { %1496 = vmatpush.bf16.msrb.mxu2 %v6733_v10  ;;  %v8537_v40 = vld [vmem:[#allocation10 + $0x244] sm:$0xf]  ;;  %v6682_v41 = vld [vmem:[#allocation10 + $0x250] sm:$0xf0]  ;;  %v6557_v45 = vor.u32 %v8505_v37, %v6554_v39  ;;  %v6640_v10 = vld [vmem:[#allocation10 + $0x1e8] sm:$0xf] }
  0x86   : > { %1509 = vmatpush.bf16.msrb.mxu3 %v6861_v14  ;;  %v8569_v42 = vld [vmem:[#allocation10 + $0x344] sm:$0xf]  ;;  %v6810_v43 = vld [vmem:[#allocation10 + $0x350] sm:$0xf0]  ;;  %v6685_v46 = vor.u32 %v8537_v40, %v6682_v41  ;;  %v8560_v14 = vld [vmem:[#allocation10 + $0x2f4] sm:$0xf0] }
  0x87   : > { %1471 = vmatpush.bf16.msrb.mxu0 %v6461_v20  ;;  %v8469_v47 = vld [vmem:[#allocation10 + $0x24] sm:$0xf]  ;;  %v6410_v48 = vld [vmem:[#allocation10 + $0x30] sm:$0xf0]  ;;  %v6813_v50 = vor.u32 %v8569_v42, %v6810_v43  ;;  %v6513_v20 = vor.u32 %v8496_v9, %v6512_v8  ;;  %v8524_v27 = vld [vmem:[#allocation10 + $0x1d4] sm:$0xf0] }
  0x88   : > { %1484 = vmatpush.bf16.msrb.mxu1 %v6589_v21  ;;  %v8501_v49 = vld [vmem:[#allocation10 + $0x124] sm:$0xf]  ;;  %v6538_v51 = vld [vmem:[#allocation10 + $0x130] sm:$0xf0]  ;;  %v6413_v56 = vor.u32 %v8469_v47, %v6410_v48  ;;  %v6641_v21 = vor.u32 %v8528_v12, %v6640_v10  ;;  %v6752_v28 = vld [vmem:[#allocation10 + $0x2c8] sm:$0xf] }
  0x89   : > { %1497 = vmatpush.bf16.msrb.mxu2 %v6717_v22  ;;  %v8533_v52 = vld [vmem:[#allocation10 + $0x224] sm:$0xf]  ;;  %v6666_v53 = vld [vmem:[#allocation10 + $0x230] sm:$0xf0]  ;;  %v6541_v60 = vor.u32 %v8501_v49, %v6538_v51  ;;  %v6769_v22 = vor.u32 %v8560_v14, %v6768_v13  ;;  %v8556_v29 = vld [vmem:[#allocation10 + $0x2d4] sm:$0xf0] }
  0x8a   : > { %1510 = vmatpush.bf16.msrb.mxu3 %v6845_v26  ;;  %v8565_v54 = vld [vmem:[#allocation10 + $0x324] sm:$0xf]  ;;  %v6794_v55 = vld [vmem:[#allocation10 + $0x330] sm:$0xf0]  ;;  %v6669_v61 = vor.u32 %v8533_v52, %v6666_v53  ;;  %v6897_v26 = vor.u32 %v8592_v18, %v6896_v17  ;;  %v6880_v30 = vld [vmem:[#allocation10 + $0x3c8] sm:$0xf] }
  0x8b   : > { %1472 = vmatpush.bf16.msrb.mxu0 %v6445_v32  ;;  %v8465_v58 = vld [vmem:[#allocation10 + $0x4] sm:$0xf]  ;;  %v6394_v59 = vld [vmem:[#allocation10 + $0x10] sm:$0xf0]  ;;  %v6797_v1 = vor.u32 %v8565_v54, %v6794_v55  ;;  %v8588_v31 = vld [vmem:[#allocation10 + $0x3d4] sm:$0xf0]  ;;  %v6497_v32 = vor.u32 %v8492_v24, %v6496_v23 }
  0x8c   : > { %1485 = vmatpush.bf16.msrb.mxu1 %v6573_v33  ;;  %v8497_v62 = vld [vmem:[#allocation10 + $0x104] sm:$0xf]  ;;  %v6522_v63 = vld [vmem:[#allocation10 + $0x110] sm:$0xf0]  ;;  %v6397_v11 = vor.u32 %v8465_v58, %v6394_v59  ;;  %v6625_v33 = vor.u32 %v8524_v27, %v6624_v25  ;;  %v6480_v35 = vld [vmem:[#allocation10 + $0xa8] sm:$0xf] }
  0x8d   : > { %1498 = vmatpush.bf16.msrb.mxu2 %v6701_v34  ;;  %v8529_v0 = vld [vmem:[#allocation10 + $0x204] sm:$0xf]  ;;  %v6650_v2 = vld [vmem:[#allocation10 + $0x210] sm:$0xf0]  ;;  %v6525_v15 = vor.u32 %v8497_v62, %v6522_v63  ;;  %v6753_v34 = vor.u32 %v8556_v29, %v6752_v28  ;;  %v8488_v36 = vld [vmem:[#allocation10 + $0xb4] sm:$0xf0] }
  0x8e   : > { %1511 = vmatpush.bf16.msrb.mxu3 %v6829_v38  ;;  %v8561_v3 = vld [vmem:[#allocation10 + $0x304] sm:$0xf]  ;;  %v6778_v4 = vld [vmem:[#allocation10 + $0x310] sm:$0xf0]  ;;  %v6653_v16 = vor.u32 %v8529_v0, %v6650_v2  ;;  %v6608_v37 = vld [vmem:[#allocation10 + $0x1a8] sm:$0xf]  ;;  %v6881_v38 = vor.u32 %v8588_v31, %v6880_v30 }
  0x8f   : > { %1473 = vmatpush.bf16.msrb.mxu0 %v6429_v44  ;;  %v6781_v19 = vor.u32 %v8561_v3, %v6778_v4  ;;  %v8520_v39 = vld [vmem:[#allocation10 + $0x1b4] sm:$0xf0]  ;;  %v6736_v40 = vld [vmem:[#allocation10 + $0x2a8] sm:$0xf]  ;;  %v6481_v44 = vor.u32 %v8488_v36, %v6480_v35 }
  0x90   : > { %1486 = vmatpush.bf16.msrb.mxu1 %v6557_v45  ;;  %v8552_v41 = vld [vmem:[#allocation10 + $0x2b4] sm:$0xf0]  ;;  %v6864_v42 = vld [vmem:[#allocation10 + $0x3a8] sm:$0xf]  ;;  %v6609_v45 = vor.u32 %v8520_v39, %v6608_v37 }
  0x91   : > { %1499 = vmatpush.bf16.msrb.mxu2 %v6685_v46  ;;  %v8584_v43 = vld [vmem:[#allocation10 + $0x3b4] sm:$0xf0]  ;;  %v6737_v46 = vor.u32 %v8552_v41, %v6736_v40  ;;  %v6464_v47 = vld [vmem:[#allocation10 + $0x88] sm:$0xf] }
  0x92   : > { %1512 = vmatpush.bf16.msrb.mxu3 %v6813_v50  ;;  %v8484_v48 = vld [vmem:[#allocation10 + $0x94] sm:$0xf0]  ;;  %v6592_v49 = vld [vmem:[#allocation10 + $0x188] sm:$0xf]  ;;  %v6865_v50 = vor.u32 %v8584_v43, %v6864_v42 }
  0x93   : > { %1474 = vmatpush.bf16.msrb.mxu0 %v6413_v56  ;;  %v8516_v51 = vld [vmem:[#allocation10 + $0x194] sm:$0xf0]  ;;  %v6720_v52 = vld [vmem:[#allocation10 + $0x288] sm:$0xf]  ;;  %v6465_v56 = vor.u32 %v8484_v48, %v6464_v47  ;;  %v6642_v48 = vld [vmem:[#allocation10 + $0x1f8] sm:$0xf0] }
  0x94   : > { %1487 = vmatpush.bf16.msrb.mxu1 %v6541_v60  ;;  %v8548_v53 = vld [vmem:[#allocation10 + $0x294] sm:$0xf0]  ;;  %v6848_v54 = vld [vmem:[#allocation10 + $0x388] sm:$0xf]  ;;  %v6593_v58 = vor.u32 %v8516_v51, %v6592_v49  ;;  %v8558_v49 = vld [vmem:[#allocation10 + $0x2ec] sm:$0xf] }
  0x95   : > { %1500 = vmatpush.bf16.msrb.mxu2 %v6669_v61  ;;  %v8580_v55 = vld [vmem:[#allocation10 + $0x394] sm:$0xf0]  ;;  %v6721_v59 = vor.u32 %v8548_v53, %v6720_v52  ;;  %v6448_v60 = vld [vmem:[#allocation10 + $0x68] sm:$0xf]  ;;  %v8590_v53 = vld [vmem:[#allocation10 + $0x3ec] sm:$0xf] }
  0x96   : > { %1513 = vmatpush.bf16.msrb.mxu3 %v6797_v1  ;;  %v8480_v61 = vld [vmem:[#allocation10 + $0x74] sm:$0xf0]  ;;  %v6576_v62 = vld [vmem:[#allocation10 + $0x168] sm:$0xf]  ;;  %v6849_v63 = vor.u32 %v8580_v55, %v6848_v54  ;;  %v6898_v54 = vld [vmem:[#allocation10 + $0x3f8] sm:$0xf0] }
  0x97   : > { %1475 = vmatpush.bf16.msrb.mxu0 %v6397_v11  ;;  %v8512_v0 = vld [vmem:[#allocation10 + $0x174] sm:$0xf0]  ;;  %v6704_v1 = vld [vmem:[#allocation10 + $0x268] sm:$0xf]  ;;  %v6449_v8 = vor.u32 %v8480_v61, %v6448_v60  ;;  %v8490_v60 = vld [vmem:[#allocation10 + $0xcc] sm:$0xf] }
  0x98   : > { %1488 = vmatpush.bf16.msrb.mxu1 %v6525_v15  ;;  %v8544_v2 = vld [vmem:[#allocation10 + $0x274] sm:$0xf0]  ;;  %v6832_v3 = vld [vmem:[#allocation10 + $0x368] sm:$0xf]  ;;  %v6577_v9 = vor.u32 %v8512_v0, %v6576_v62  ;;  %v6498_v61 = vld [vmem:[#allocation10 + $0xd8] sm:$0xf0] }
  0x99   : > { %1501 = vmatpush.bf16.msrb.mxu2 %v6653_v16  ;;  %v8576_v4 = vld [vmem:[#allocation10 + $0x374] sm:$0xf0]  ;;  %v6705_v10 = vor.u32 %v8544_v2, %v6704_v1  ;;  %v6432_v11 = vld [vmem:[#allocation10 + $0x48] sm:$0xf]  ;;  %v8522_v62 = vld [vmem:[#allocation10 + $0x1cc] sm:$0xf] }
  0x9a   : > { %1514 = vmatpush.bf16.msrb.mxu3 %v6781_v19  ;;  %1476 = vmatmul.bf16.vlgmr.msrb.gmra.mxu0 %v9858_v6  ;;  %v8476_v12 = vld [vmem:[#allocation10 + $0x54] sm:$0xf0]  ;;  %v6560_v13 = vld [vmem:[#allocation10 + $0x148] sm:$0xf]  ;;  %v6833_v14 = vor.u32 %v8576_v4, %v6832_v3  ;;  %v6626_v0 = vld [vmem:[#allocation10 + $0x1d8] sm:$0xf0] }
  0x9b   : > { %1520 = vmatpush.bf16.msra.mxu0 %v6513_v20  ;;  %1489 = vmatmul.bf16.vlgmr.msrb.gmra.mxu1 %v9860_v7  ;;  %v8508_v15 = vld [vmem:[#allocation10 + $0x154] sm:$0xf0]  ;;  %v6688_v16 = vld [vmem:[#allocation10 + $0x248] sm:$0xf]  ;;  %v6433_v20 = vor.u32 %v8476_v12, %v6432_v11  ;;  %v8554_v1 = vld [vmem:[#allocation10 + $0x2cc] sm:$0xf] }
  0x9c   : > { %1533 = vmatpush.bf16.msra.mxu1 %v6641_v21  ;;  %1502 = vmatmul.bf16.vlgmr.msrb.gmra.mxu2 %v9850_v57  ;;  %v8540_v17 = vld [vmem:[#allocation10 + $0x254] sm:$0xf0]  ;;  %v6816_v18 = vld [vmem:[#allocation10 + $0x348] sm:$0xf]  ;;  %v6561_v21 = vor.u32 %v8508_v15, %v6560_v13  ;;  %v6754_v2 = vld [vmem:[#allocation10 + $0x2d8] sm:$0xf0] }
  0x9d   : > { %1546 = vmatpush.bf16.msra.mxu2 %v6769_v22  ;;  %1515 = vmatmul.bf16.vlgmr.msrb.gmra.mxu3 %v9856_v5  ;;  %v8572_v19 = vld [vmem:[#allocation10 + $0x354] sm:$0xf0]  ;;  %v6689_v22 = vor.u32 %v8540_v17, %v6688_v16  ;;  %v6416_v23 = vld [vmem:[#allocation10 + $0x28] sm:$0xf]  ;;  %v8586_v3 = vld [vmem:[#allocation10 + $0x3cc] sm:$0xf] }
  0x9e   : > { %1559 = vmatpush.bf16.msra.mxu3 %v6897_v26  ;;  %v8472_v24 = vld [vmem:[#allocation10 + $0x34] sm:$0xf0]  ;;  %v6544_v25 = vld [vmem:[#allocation10 + $0x128] sm:$0xf]  ;;  %v6817_v26 = vor.u32 %v8572_v19, %v6816_v18  ;;  %v6882_v4 = vld [vmem:[#allocation10 + $0x3d8] sm:$0xf0] }
  0x9f   : > { %1521 = vmatpush.bf16.msra.mxu0 %v6497_v32  ;;  %v8504_v27 = vld [vmem:[#allocation10 + $0x134] sm:$0xf0]  ;;  %v6672_v28 = vld [vmem:[#allocation10 + $0x228] sm:$0xf]  ;;  %v6417_v32 = vor.u32 %v8472_v24, %v6416_v23  ;;  %v8486_v11 = vld [vmem:[#allocation10 + $0xac] sm:$0xf] }
  0xa0   : > { %1534 = vmatpush.bf16.msra.mxu1 %v6625_v33  ;;  %v8536_v29 = vld [vmem:[#allocation10 + $0x234] sm:$0xf0]  ;;  %v6800_v30 = vld [vmem:[#allocation10 + $0x328] sm:$0xf]  ;;  %v6545_v35 = vor.u32 %v8504_v27, %v6544_v25  ;;  %v6482_v12 = vld [vmem:[#allocation10 + $0xb8] sm:$0xf0] }
  0xa1   : > { %1547 = vmatpush.bf16.msra.mxu2 %v6753_v34  ;;  %v8568_v31 = vld [vmem:[#allocation10 + $0x334] sm:$0xf0]  ;;  %v6400_v33 = vld [vmem:[#allocation10 + $0x8] sm:$0xf]  ;;  %v6673_v36 = vor.u32 %v8536_v29, %v6672_v28  ;;  %v8518_v13 = vld [vmem:[#allocation10 + $0x1ac] sm:$0xf] }
  0xa2   : > { %1560 = vmatpush.bf16.msra.mxu3 %v6881_v38  ;;  %v8468_v34 = vld [vmem:[#allocation10 + $0x14] sm:$0xf0]  ;;  %v6528_v37 = vld [vmem:[#allocation10 + $0x108] sm:$0xf]  ;;  %v6801_v40 = vor.u32 %v8568_v31, %v6800_v30  ;;  %v6610_v15 = vld [vmem:[#allocation10 + $0x1b8] sm:$0xf0] }
  0xa3   : > { %1522 = vmatpush.bf16.msra.mxu0 %v6481_v44  ;;  %v8500_v38 = vld [vmem:[#allocation10 + $0x114] sm:$0xf0]  ;;  %v6656_v39 = vld [vmem:[#allocation10 + $0x208] sm:$0xf]  ;;  %v8494_v44 = vld [vmem:[#allocation10 + $0xec] sm:$0xf]  ;;  %v6401_v47 = vor.u32 %v8468_v34, %v6400_v33 }
  0xa4   : > { %1535 = vmatpush.bf16.msra.mxu1 %v6609_v45  ;;  %v8532_v41 = vld [vmem:[#allocation10 + $0x214] sm:$0xf0]  ;;  %v6784_v42 = vld [vmem:[#allocation10 + $0x308] sm:$0xf]  ;;  %v6514_v45 = vld [vmem:[#allocation10 + $0xf8] sm:$0xf0]  ;;  %v6529_v51 = vor.u32 %v8500_v38, %v6528_v37 }
  0xa5   : > { %1548 = vmatpush.bf16.msra.mxu2 %v6737_v46  ;;  %v8564_v43 = vld [vmem:[#allocation10 + $0x314] sm:$0xf0]  ;;  %v8526_v46 = vld [vmem:[#allocation10 + $0x1ec] sm:$0xf]  ;;  %v6657_v52 = vor.u32 %v8532_v41, %v6656_v39  ;;  %v6738_v17 = vld [vmem:[#allocation10 + $0x2b8] sm:$0xf0] }
  0xa6   : > { %1561 = vmatpush.bf16.msra.mxu3 %v6865_v50  ;;  %v6770_v50 = vld [vmem:[#allocation10 + $0x2f8] sm:$0xf0]  ;;  %v6785_v55 = vor.u32 %v8564_v43, %v6784_v42  ;;  %v8550_v16 = vld [vmem:[#allocation10 + $0x2ac] sm:$0xf] }
  0xa7   : > { %1523 = vmatpush.bf16.msra.mxu0 %v6465_v56  ;;  %v6517_v56 = vor.u32 %v8494_v44, %v6514_v45  ;;  %v8582_v18 = vld [vmem:[#allocation10 + $0x3ac] sm:$0xf]  ;;  %v6866_v19 = vld [vmem:[#allocation10 + $0x3b8] sm:$0xf0] }
  0xa8   : > { %1536 = vmatpush.bf16.msra.mxu1 %v6593_v58  ;;  %v6645_v58 = vor.u32 %v8526_v46, %v6642_v48  ;;  %v8482_v23 = vld [vmem:[#allocation10 + $0x8c] sm:$0xf]  ;;  %v6466_v24 = vld [vmem:[#allocation10 + $0x98] sm:$0xf0] }
  0xa9   : > { %1549 = vmatpush.bf16.msra.mxu2 %v6721_v59  ;;  %v6773_v59 = vor.u32 %v8558_v49, %v6770_v50  ;;  %v8514_v25 = vld [vmem:[#allocation10 + $0x18c] sm:$0xf]  ;;  %v6594_v27 = vld [vmem:[#allocation10 + $0x198] sm:$0xf0] }
  0xaa   : > { %1562 = vmatpush.bf16.msra.mxu3 %v6849_v63  ;;  %v6901_v63 = vor.u32 %v8590_v53, %v6898_v54  ;;  %v8546_v28 = vld [vmem:[#allocation10 + $0x28c] sm:$0xf]  ;;  %v6722_v29 = vld [vmem:[#allocation10 + $0x298] sm:$0xf0]  ;;  %v6597_v33 = vor.u32 %v8514_v25, %v6594_v27  ;;  %v7272_v25 = vld [vmem:[#allocation11 + $0x2e0] sm:$0xf] }
  0xab   : > { %1524 = vmatpush.bf16.msra.mxu0 %v6449_v8  ;;  %v6501_v8 = vor.u32 %v8490_v60, %v6498_v61  ;;  %v8578_v30 = vld [vmem:[#allocation10 + $0x38c] sm:$0xf]  ;;  %v6850_v31 = vld [vmem:[#allocation10 + $0x398] sm:$0xf0]  ;;  %v6725_v34 = vor.u32 %v8546_v28, %v6722_v29  ;;  %v7400_v29 = vld [vmem:[#allocation11 + $0x3e0] sm:$0xf] }
  0xac   : > { %1537 = vmatpush.bf16.msra.mxu1 %v6577_v9  ;;  %v6629_v9 = vor.u32 %v8522_v62, %v6626_v0  ;;  %v8510_v37 = vld [vmem:[#allocation10 + $0x16c] sm:$0xf]  ;;  %v6853_v38 = vor.u32 %v8578_v30, %v6850_v31  ;;  %v6578_v39 = vld [vmem:[#allocation10 + $0x178] sm:$0xf0]  ;;  %v8719_v30 = vld [vmem:[#allocation11 + $0x3ec] sm:$0xf0] }
  0xad   : > { %1550 = vmatpush.bf16.msra.mxu2 %v6705_v10  ;;  %v6757_v10 = vor.u32 %v8554_v1, %v6754_v2  ;;  %v6706_v41 = vld [vmem:[#allocation10 + $0x278] sm:$0xf0]  ;;  %v8574_v42 = vld [vmem:[#allocation10 + $0x36c] sm:$0xf]  ;;  %v6581_v45 = vor.u32 %v8510_v37, %v6578_v39  ;;  %v7128_v37 = vld [vmem:[#allocation11 + $0x1c0] sm:$0xf] }
  0xae   : > { %1563 = vmatpush.bf16.msra.mxu3 %v6833_v14  ;;  %v6885_v14 = vor.u32 %v8586_v3, %v6882_v4  ;;  %v6834_v43 = vld [vmem:[#allocation10 + $0x378] sm:$0xf0]  ;;  %v8506_v49 = vld [vmem:[#allocation10 + $0x14c] sm:$0xf]  ;;  %v8651_v39 = vld [vmem:[#allocation11 + $0x1cc] sm:$0xf0] }
  0xaf   : > { %1525 = vmatpush.bf16.msra.mxu0 %v6433_v20  ;;  %v6485_v20 = vor.u32 %v8486_v11, %v6482_v12  ;;  %v6434_v48 = vld [vmem:[#allocation10 + $0x58] sm:$0xf0]  ;;  %v6837_v50 = vor.u32 %v8574_v42, %v6834_v43  ;;  %v8570_v54 = vld [vmem:[#allocation10 + $0x34c] sm:$0xf]  ;;  %v7384_v42 = vld [vmem:[#allocation11 + $0x3c0] sm:$0xf] }
  0xb0   : > { %1538 = vmatpush.bf16.msra.mxu1 %v6561_v21  ;;  %v6613_v21 = vor.u32 %v8518_v13, %v6610_v15  ;;  %v6690_v53 = vld [vmem:[#allocation10 + $0x258] sm:$0xf0]  ;;  %v8470_v60 = vld [vmem:[#allocation10 + $0x2c] sm:$0xf]  ;;  %v8715_v43 = vld [vmem:[#allocation11 + $0x3cc] sm:$0xf0] }
  0xb1   : > { %1551 = vmatpush.bf16.msra.mxu2 %v6689_v22  ;;  %v6741_v22 = vor.u32 %v8550_v16, %v6738_v17  ;;  %v6418_v61 = vld [vmem:[#allocation10 + $0x38] sm:$0xf0]  ;;  %v8502_v62 = vld [vmem:[#allocation10 + $0x12c] sm:$0xf] }
  0xb2   : > { %1564 = vmatpush.bf16.msra.mxu3 %v6817_v26  ;;  %v6869_v26 = vor.u32 %v8582_v18, %v6866_v19  ;;  %v6546_v0 = vld [vmem:[#allocation10 + $0x138] sm:$0xf0]  ;;  %v8534_v1 = vld [vmem:[#allocation10 + $0x22c] sm:$0xf] }
  0xb3   : > { %1526 = vmatpush.bf16.msra.mxu0 %v6417_v32  ;;  %v6469_v32 = vor.u32 %v8482_v23, %v6466_v24  ;;  %v6674_v2 = vld [vmem:[#allocation10 + $0x238] sm:$0xf0]  ;;  %v8566_v3 = vld [vmem:[#allocation10 + $0x32c] sm:$0xf]  ;;  %v6549_v11 = vor.u32 %v8502_v62, %v6546_v0  ;;  %v8655_v24 = vld [vmem:[#allocation11 + $0x1ec] sm:$0xf0] }
  0xb4   : > { %1539 = vmatpush.bf16.msra.mxu1 %v6545_v35  ;;  %v8478_v35 = vld [vmem:[#allocation10 + $0x6c] sm:$0xf]  ;;  %v6802_v4 = vld [vmem:[#allocation10 + $0x338] sm:$0xf0]  ;;  %v6677_v12 = vor.u32 %v8534_v1, %v6674_v2  ;;  %v7224_v0 = vld [vmem:[#allocation11 + $0x280] sm:$0xf] }
  0xb5   : > { %1552 = vmatpush.bf16.msra.mxu2 %v6673_v36  ;;  %v6450_v36 = vld [vmem:[#allocation10 + $0x78] sm:$0xf0]  ;;  %v8498_v13 = vld [vmem:[#allocation10 + $0x10c] sm:$0xf]  ;;  %v6805_v16 = vor.u32 %v8566_v3, %v6802_v4  ;;  %v7352_v1 = vld [vmem:[#allocation11 + $0x380] sm:$0xf] }
  0xb6   : > { %1565 = vmatpush.bf16.msra.mxu3 %v6801_v40  ;;  %v8542_v40 = vld [vmem:[#allocation10 + $0x26c] sm:$0xf]  ;;  %v6453_v44 = vor.u32 %v8478_v35, %v6450_v36  ;;  %v6658_v17 = vld [vmem:[#allocation10 + $0x218] sm:$0xf0]  ;;  %v7000_v35 = vld [vmem:[#allocation11 + $0xc0] sm:$0xf] }
  0xb7   : > { %1527 = vmatpush.bf16.msra.mxu0 %v6401_v47  ;;  %v6709_v46 = vor.u32 %v8542_v40, %v6706_v41  ;;  %v8474_v47 = vld [vmem:[#allocation10 + $0x4c] sm:$0xf]  ;;  %v6786_v19 = vld [vmem:[#allocation10 + $0x318] sm:$0xf0]  ;;  %v8619_v36 = vld [vmem:[#allocation11 + $0xcc] sm:$0xf0] }
  0xb8   : > { %1540 = vmatpush.bf16.msra.mxu1 %v6529_v51  ;;  %v6562_v51 = vld [vmem:[#allocation10 + $0x158] sm:$0xf0]  ;;  %v8530_v15 = vld [vmem:[#allocation10 + $0x20c] sm:$0xf]  ;;  %v7256_v40 = vld [vmem:[#allocation11 + $0x2c0] sm:$0xf] }
  0xb9   : > { %1553 = vmatpush.bf16.msra.mxu2 %v6657_v52  ;;  %v8538_v52 = vld [vmem:[#allocation10 + $0x24c] sm:$0xf]  ;;  %v6661_v28 = vor.u32 %v8530_v15, %v6658_v17  ;;  %v8683_v41 = vld [vmem:[#allocation11 + $0x2cc] sm:$0xf0]  ;;  %v6952_v4 = vld [vmem:[#allocation11 + $0x60] sm:$0xf] }
  0xba   : > { %1566 = vmatpush.bf16.msra.mxu3 %v6785_v55  ;;  %1528 = vmatmul.bf16.vlgmr.msra.gmra.mxu0 %v9858_v6  ;;  %v6818_v55 = vld [vmem:[#allocation10 + $0x358] sm:$0xf0]  ;;  %v8562_v18 = vld [vmem:[#allocation10 + $0x30c] sm:$0xf]  ;;  %v8703_v15 = vld [vmem:[#allocation11 + $0x36c] sm:$0xf0] }
  0xbb   : > { %1572 = vmatpush.bf16.msrb.mxu0 %v6517_v56  ;;  %1541 = vmatmul.bf16.vlgmr.msra.gmra.mxu1 %v9860_v7  ;;  %v6437_v56 = vor.u32 %v8474_v47, %v6434_v48  ;;  %v6789_v31 = vor.u32 %v8562_v18, %v6786_v19  ;;  %v6984_v47 = vld [vmem:[#allocation11 + $0xa0] sm:$0xf]  ;;  %v8615_v48 = vld [vmem:[#allocation11 + $0xac] sm:$0xf0] }
  0xbc   : > { %1585 = vmatpush.bf16.msrb.mxu1 %v6645_v58  ;;  %1554 = vmatmul.bf16.vlgmr.msra.gmra.mxu2 %v9850_v57  ;;  %v6565_v58 = vor.u32 %v8506_v49, %v6562_v51  ;;  %v7112_v49 = vld [vmem:[#allocation11 + $0x1a0] sm:$0xf]  ;;  %v8647_v51 = vld [vmem:[#allocation11 + $0x1ac] sm:$0xf0] }
  0xbd   : > { %1598 = vmatpush.bf16.msrb.mxu2 %v6773_v59  ;;  %1567 = vmatmul.bf16.vlgmr.msra.gmra.mxu3 %v9856_v5  ;;  %v6693_v59 = vor.u32 %v8538_v52, %v6690_v53  ;;  %v7240_v52 = vld [vmem:[#allocation11 + $0x2a0] sm:$0xf]  ;;  %v8679_v53 = vld [vmem:[#allocation11 + $0x2ac] sm:$0xf0] }
  0xbe   : > { %1611 = vmatpush.bf16.msrb.mxu3 %v6901_v63  ;;  %v6821_v63 = vor.u32 %v8570_v54, %v6818_v55  ;;  %v7368_v54 = vld [vmem:[#allocation11 + $0x3a0] sm:$0xf]  ;;  %v8711_v55 = vld [vmem:[#allocation11 + $0x3ac] sm:$0xf0] }
  0xbf   : > { %1573 = vmatpush.bf16.msrb.mxu0 %v6501_v8  ;;  %v6421_v8 = vor.u32 %v8470_v60, %v6418_v61  ;;  %v6968_v60 = vld [vmem:[#allocation11 + $0x80] sm:$0xf]  ;;  %v7369_v62 = vor.u32 %v8711_v55, %v7368_v54  ;;  %v8653_v54 = vld [vmem:[#allocation11 + $0x1e4] sm:$0xf] }
  0xc0   : > { %1586 = vmatpush.bf16.msrb.mxu1 %v6629_v9  ;;  %v8466_v9 = vld [vmem:[#allocation10 + $0xc] sm:$0xf]  ;;  %v7096_v61 = vld [vmem:[#allocation11 + $0x180] sm:$0xf] }
  0xc1   : > { %1599 = vmatpush.bf16.msrb.mxu2 %v6757_v10  ;;  %v6402_v10 = vld [vmem:[#allocation10 + $0x18] sm:$0xf0]  ;;  %v6936_v19 = vld [vmem:[#allocation11 + $0x40] sm:$0xf] }
  0xc2   : > { %1612 = vmatpush.bf16.msrb.mxu3 %v6885_v14  ;;  %v6530_v14 = vld [vmem:[#allocation10 + $0x118] sm:$0xf0]  ;;  %v6405_v23 = vor.u32 %v8466_v9, %v6402_v10  ;;  %v7080_v9 = vld [vmem:[#allocation11 + $0x160] sm:$0xf] }
  0xc3   : > { %1574 = vmatpush.bf16.msrb.mxu0 %v6485_v20  ;;  %v7016_v20 = vld [vmem:[#allocation11 + $0xe0] sm:$0xf]  ;;  %v6533_v27 = vor.u32 %v8498_v13, %v6530_v14  ;;  %v8671_v13 = vld [vmem:[#allocation11 + $0x26c] sm:$0xf0] }
  0xc4   : > { %1587 = vmatpush.bf16.msrb.mxu1 %v6613_v21  ;;  %v8623_v21 = vld [vmem:[#allocation11 + $0xec] sm:$0xf0]  ;;  %v7336_v14 = vld [vmem:[#allocation11 + $0x360] sm:$0xf] }
  0xc5   : > { %1600 = vmatpush.bf16.msrb.mxu2 %v6741_v22  ;;  %v7144_v22 = vld [vmem:[#allocation11 + $0x1e0] sm:$0xf] }
  0xc6   : > { %1613 = vmatpush.bf16.msrb.mxu3 %v6869_v26  ;;  %v8687_v26 = vld [vmem:[#allocation11 + $0x2ec] sm:$0xf0] }
  0xc7   : > { %1575 = vmatpush.bf16.msrb.mxu0 %v6469_v32  ;;  %v7017_v32 = vor.u32 %v8623_v21, %v7016_v20  ;;  %v8603_v20 = vld [vmem:[#allocation11 + $0x4c] sm:$0xf0]  ;;  %v7064_v21 = vld [vmem:[#allocation11 + $0x140] sm:$0xf] }
  0xc8   : > { %1588 = vmatpush.bf16.msrb.mxu1 %v6597_v33  ;;  %v7145_v33 = vor.u32 %v8655_v24, %v7144_v22  ;;  %v7337_v22 = vor.u32 %v8703_v15, %v7336_v14  ;;  %v7192_v24 = vld [vmem:[#allocation11 + $0x240] sm:$0xf]  ;;  %v8713_v15 = vld [vmem:[#allocation11 + $0x3c4] sm:$0xf] }
  0xc9   : > { %1601 = vmatpush.bf16.msrb.mxu2 %v6725_v34  ;;  %v7273_v34 = vor.u32 %v8687_v26, %v7272_v25  ;;  %v8667_v25 = vld [vmem:[#allocation11 + $0x24c] sm:$0xf0]  ;;  %v7320_v26 = vld [vmem:[#allocation11 + $0x340] sm:$0xf] }
  0xca   : > { %1614 = vmatpush.bf16.msrb.mxu3 %v6853_v38  ;;  %v7401_v38 = vor.u32 %v8719_v30, %v7400_v29  ;;  %v7193_v30 = vor.u32 %v8667_v25, %v7192_v24  ;;  %v6986_v24 = vld [vmem:[#allocation11 + $0xb0] sm:$0xf0]  ;;  %v8645_v25 = vld [vmem:[#allocation11 + $0x1a4] sm:$0xf] }
  0xcb   : > { %1576 = vmatpush.bf16.msrb.mxu0 %v6453_v44  ;;  %v7001_v44 = vor.u32 %v8619_v36, %v7000_v35  ;;  %v8631_v35 = vld [vmem:[#allocation11 + $0x12c] sm:$0xf0]  ;;  %v7176_v36 = vld [vmem:[#allocation11 + $0x220] sm:$0xf] }
  0xcc   : > { %1589 = vmatpush.bf16.msrb.mxu1 %v6581_v45  ;;  %v7129_v45 = vor.u32 %v8651_v39, %v7128_v37  ;;  %v8663_v37 = vld [vmem:[#allocation11 + $0x22c] sm:$0xf0] }
  0xcd   : > { %1602 = vmatpush.bf16.msrb.mxu2 %v6709_v46  ;;  %v7257_v46 = vor.u32 %v8683_v41, %v7256_v40  ;;  %v8695_v39 = vld [vmem:[#allocation11 + $0x32c] sm:$0xf0]  ;;  %v6904_v41 = vld [vmem:[#allocation11] sm:$0xf] }
  0xce   : > { %1615 = vmatpush.bf16.msrb.mxu3 %v6837_v50  ;;  %v7385_v50 = vor.u32 %v8715_v43, %v7384_v42  ;;  %v8595_v42 = vld [vmem:[#allocation11 + $0xc] sm:$0xf0] }
  0xcf   : > { %1577 = vmatpush.bf16.msrb.mxu0 %v6437_v56  ;;  %v6985_v56 = vor.u32 %v8615_v48, %v6984_v47  ;;  %v7160_v47 = vld [vmem:[#allocation11 + $0x200] sm:$0xf]  ;;  %v6905_v55 = vor.u32 %v8595_v42, %v6904_v41  ;;  %v7226_v41 = vld [vmem:[#allocation11 + $0x290] sm:$0xf0]  ;;  %v8705_v42 = vld [vmem:[#allocation11 + $0x384] sm:$0xf] }
  0xd0   : > { %1590 = vmatpush.bf16.msrb.mxu1 %v6565_v58  ;;  %v7113_v58 = vor.u32 %v8647_v51, %v7112_v49  ;;  %v8659_v49 = vld [vmem:[#allocation11 + $0x20c] sm:$0xf0] }
  0xd1   : > { %1603 = vmatpush.bf16.msrb.mxu2 %v6693_v59  ;;  %v7241_v59 = vor.u32 %v8679_v53, %v7240_v52  ;;  %v8691_v51 = vld [vmem:[#allocation11 + $0x30c] sm:$0xf0]  ;;  %v8621_v52 = vld [vmem:[#allocation11 + $0xe4] sm:$0xf]  ;;  %v7018_v53 = vld [vmem:[#allocation11 + $0xf0] sm:$0xf0] }
  0xd2   : > { %1616 = vmatpush.bf16.msrb.mxu3 %v6821_v63  ;;  %v8643_v63 = vld [vmem:[#allocation11 + $0x18c] sm:$0xf0] }
  0xd3   : > { %1578 = vmatpush.bf16.msrb.mxu0 %v6421_v8  ;;  %v8607_v8 = vld [vmem:[#allocation11 + $0x6c] sm:$0xf0] }
  0xd4   : > { %1591 = vmatpush.bf16.msrb.mxu1 %v6549_v11  ;;  %v8639_v11 = vld [vmem:[#allocation11 + $0x16c] sm:$0xf0] }
  0xd5   : > { %1604 = vmatpush.bf16.msrb.mxu2 %v6677_v12  ;;  %v7208_v12 = vld [vmem:[#allocation11 + $0x260] sm:$0xf]  ;;  %v7081_v17 = vor.u32 %v8639_v11, %v7080_v9  ;;  %v633_v9 = vld [vmem:[%s9821_s9 + $0x8] sm:$0xff]  ;;  %v7130_v11 = vld [vmem:[#allocation11 + $0x1d0] sm:$0xf0] }
  0xd6   : > { %1617 = vmatpush.bf16.msrb.mxu3 %v6805_v16  ;;  %v6953_v16 = vor.u32 %v8607_v8, %v6952_v4  ;;  %v7209_v18 = vor.u32 %v8671_v13, %v7208_v12  ;;  %v7002_v4 = vld [vmem:[#allocation11 + $0xd0] sm:$0xf0]  ;;  %v8649_v8 = vld [vmem:[#allocation11 + $0x1c4] sm:$0xf] }
  0xd7   : > { %1579 = vmatpush.bf16.msrb.mxu0 %v6405_v23  ;;  %v8635_v23 = vld [vmem:[#allocation11 + $0x14c] sm:$0xf0]  ;;  %v8681_v12 = vld [vmem:[#allocation11 + $0x2c4] sm:$0xf]  ;;  %v7258_v13 = vld [vmem:[#allocation11 + $0x2d0] sm:$0xf0] }
  0xd8   : > { %1592 = vmatpush.bf16.msrb.mxu1 %v6533_v27  ;;  %v8699_v27 = vld [vmem:[#allocation11 + $0x34c] sm:$0xf0]  ;;  %v7065_v29 = vor.u32 %v8635_v23, %v7064_v21  ;;  %v7133_v21 = vor.u32 %v8649_v8, %v7130_v11  ;;  %v8613_v23 = vld [vmem:[#allocation11 + $0xa4] sm:$0xf] }
  0xd9   : > { %1605 = vmatpush.bf16.msrb.mxu2 %v6661_v28  ;;  %v6937_v28 = vor.u32 %v8603_v20, %v6936_v19  ;;  %v9887_v20 = vpack.c.bf16 %v633_v9, %v633_v9 }
  0xda   : > { %1618 = vmatpush.bf16.msrb.mxu3 %v6789_v31  ;;  %1580 = vmatmul.bf16.vlgmr.msrb.gmra.mxu0 %v9858_v6  ;;  %v8707_v6 = vld [vmem:[#allocation11 + $0x38c] sm:$0xf0]  ;;  %v6920_v31 = vld [vmem:[#allocation11 + $0x20] sm:$0xf] }
  0xdb   : > { %2392 = vmatpush.bf16.msra.mxu0 %v7017_v32  ;;  %1593 = vmatmul.bf16.vlgmr.msrb.gmra.mxu1 %v9860_v7  ;;  %v7097_v7 = vor.u32 %v8643_v63, %v7096_v61  ;;  %v7353_v10 = vor.u32 %v8707_v6, %v7352_v1  ;;  %v8599_v32 = vld [vmem:[#allocation11 + $0x2c] sm:$0xf0]  ;;  %v8717_v61 = vld [vmem:[#allocation11 + $0x3e4] sm:$0xf]  ;;  %v635_v6 = vld [vmem:[%s9821_s9 + $0x18] sm:$0xff] }
  0xdc   : > { %2405 = vmatpush.bf16.msra.mxu1 %v7145_v33  ;;  %1606 = vmatmul.bf16.vlgmr.msrb.gmra.mxu2 %v9850_v57  ;;  %v8611_v57 = vld [vmem:[#allocation11 + $0x8c] sm:$0xf0]  ;;  %v7048_v33 = vld [vmem:[#allocation11 + $0x120] sm:$0xf]  ;;  %v6921_v40 = vor.u32 %v8599_v32, %v6920_v31  ;;  %v8617_v1 = vld [vmem:[#allocation11 + $0xc4] sm:$0xf]  ;;  %v6989_v32 = vor.u32 %v8613_v23, %v6986_v24 }
  0xdd   : > { %2418 = vmatpush.bf16.msra.mxu2 %v7273_v34  ;;  %1619 = vmatmul.bf16.vlgmr.msrb.gmra.mxu3 %v9856_v5  ;;  %v8675_v5 = vld [vmem:[#allocation11 + $0x28c] sm:$0xf0]  ;;  %v6969_v2 = vor.u32 %v8611_v57, %v6968_v60  ;;  %v7321_v34 = vor.u32 %v8699_v27, %v7320_v26  ;;  %v7049_v43 = vor.u32 %v8631_v35, %v7048_v33  ;;  %v7114_v27 = vld [vmem:[#allocation11 + $0x1b0] sm:$0xf0]  ;;  %v8609_v35 = vld [vmem:[#allocation11 + $0x84] sm:$0xf] }
  0xde   : > { %2431 = vmatpush.bf16.msra.mxu3 %v7401_v38  ;;  %v7225_v3 = vor.u32 %v8675_v5, %v7224_v0  ;;  %v7304_v38 = vld [vmem:[#allocation11 + $0x320] sm:$0xf]  ;;  %v7161_v57 = vor.u32 %v8659_v49, %v7160_v47  ;;  %v634_v63 = vld [vmem:[%s9821_s9 + $0x10] sm:$0xff]  ;;  %v7021_v5 = vor.u32 %v8621_v52, %v7018_v53  ;;  %v7005_v19 = vor.u32 %v8617_v1, %v7002_v4  ;;  %v7370_v31 = vld [vmem:[#allocation11 + $0x3b0] sm:$0xf0] }
  0xdf   : > { %2393 = vmatpush.bf16.msra.mxu0 %v7001_v44  ;;  %v7177_v44 = vor.u32 %v8663_v37, %v7176_v36  ;;  %v7305_v48 = vor.u32 %v8695_v39, %v7304_v38  ;;  %v9881_v14 = vpack.c.bf16 %v634_v63, %v634_v63  ;;  %v7117_v33 = vor.u32 %v8645_v25, %v7114_v27  ;;  %v6970_v36 = vld [vmem:[#allocation11 + $0x90] sm:$0xf0]  ;;  %v8641_v37 = vld [vmem:[#allocation11 + $0x184] sm:$0xf] }
  0xe0   : > { %2406 = vmatpush.bf16.msra.mxu1 %v7129_v45  ;;  %v7032_v45 = vld [vmem:[#allocation11 + $0x100] sm:$0xf]  ;;  %v7098_v39 = vld [vmem:[#allocation11 + $0x190] sm:$0xf0]  ;;  %v8605_v47 = vld [vmem:[#allocation11 + $0x64] sm:$0xf] }
  0xe1   : > { %2419 = vmatpush.bf16.msra.mxu2 %v7257_v46  ;;  %v8627_v46 = vld [vmem:[#allocation11 + $0x10c] sm:$0xf0]  ;;  %v8637_v49 = vld [vmem:[#allocation11 + $0x164] sm:$0xf]  ;;  %v7210_v53 = vld [vmem:[#allocation11 + $0x270] sm:$0xf0] }
  0xe2   : > { %2432 = vmatpush.bf16.msra.mxu3 %v7385_v50  ;;  %v7288_v50 = vld [vmem:[#allocation11 + $0x300] sm:$0xf]  ;;  %v7033_v60 = vor.u32 %v8627_v46, %v7032_v45  ;;  %v7101_v45 = vor.u32 %v8641_v37, %v7098_v39  ;;  %v8669_v52 = vld [vmem:[#allocation11 + $0x264] sm:$0xf]  ;;  %v7322_v4 = vld [vmem:[#allocation11 + $0x350] sm:$0xf0] }
  0xe3   : > { %2394 = vmatpush.bf16.msra.mxu0 %v6985_v56  ;;  %v7146_v56 = vld [vmem:[#allocation11 + $0x1f0] sm:$0xf0]  ;;  %v7289_v0 = vor.u32 %v8691_v51, %v7288_v50  ;;  %v8633_v63 = vld [vmem:[#allocation11 + $0x144] sm:$0xf] }
  0xe4   : > { %2407 = vmatpush.bf16.msra.mxu1 %v7113_v58  ;;  %v8685_v58 = vld [vmem:[#allocation11 + $0x2e4] sm:$0xf]  ;;  %v7082_v51 = vld [vmem:[#allocation11 + $0x170] sm:$0xf0] }
  0xe5   : > { %2420 = vmatpush.bf16.msra.mxu2 %v7241_v59  ;;  %v7274_v59 = vld [vmem:[#allocation11 + $0x2f0] sm:$0xf0]  ;;  %v8693_v24 = vld [vmem:[#allocation11 + $0x324] sm:$0xf] }
  0xe6   : > { %2433 = vmatpush.bf16.msra.mxu3 %v7369_v62  ;;  %v7402_v62 = vld [vmem:[#allocation11 + $0x3f0] sm:$0xf0] }
  0xe7   : > { %2395 = vmatpush.bf16.msra.mxu0 %v6969_v2  ;;  %v632_v2 = vld [vmem:[%s9821_s9] sm:$0xff]  ;;  %v7306_v25 = vld [vmem:[#allocation11 + $0x330] sm:$0xf0]  ;;  %s9450_s9 = scalar_lea.hbm %s10839_s13, 64 }
  0xe8   : > { %2408 = vmatpush.bf16.msra.mxu1 %v7097_v7  ;;  %v7149_v7 = vor.u32 %v8653_v54, %v7146_v56  ;;  %v8701_v54 = vld [vmem:[#allocation11 + $0x364] sm:$0xf]  ;;  %v7162_v39 = vld [vmem:[#allocation11 + $0x210] sm:$0xf0] }
  0xe9   : > { %2421 = vmatpush.bf16.msra.mxu2 %v7225_v3  ;;  %v7277_v3 = vor.u32 %v8685_v58, %v7274_v59 }
  0xea   : > { %2434 = vmatpush.bf16.msra.mxu3 %v7353_v10  ;;  %v7405_v10 = vor.u32 %v8717_v61, %v7402_v62  ;;  %v8601_v61 = vld [vmem:[#allocation11 + $0x44] sm:$0xf]  ;;  %v6938_v62 = vld [vmem:[#allocation11 + $0x50] sm:$0xf0] }
  0xeb   : > { %2396 = vmatpush.bf16.msra.mxu0 %v6953_v16  ;;  %v7386_v16 = vld [vmem:[#allocation11 + $0x3d0] sm:$0xf0]  ;;  %v6941_v9 = vor.u32 %v8601_v61, %v6938_v62  ;;  %v8652_v62 = vld [vmem:[#allocation11 + $0x1d4] sm:$0xf0] }
  0xec   : > { %2409 = vmatpush.bf16.msra.mxu1 %v7081_v17  ;;  %v9883_v17 = vpack.c.bf16 %v635_v6, %v635_v6  ;;  %v7389_v26 = vor.u32 %v8713_v15, %v7386_v16  ;;  %v7066_v6 = vld [vmem:[#allocation11 + $0x150] sm:$0xf0]  ;;  %v8629_v15 = vld [vmem:[#allocation11 + $0x124] sm:$0xf] }
  0xed   : > { %2422 = vmatpush.bf16.msra.mxu2 %v7209_v18  ;;  %v9885_v18 = vpack.c.bf16 %v632_v2, %v632_v2  ;;  %v8665_v2 = vld [vmem:[#allocation11 + $0x244] sm:$0xf] }
  0xee   : > { %2435 = vmatpush.bf16.msra.mxu3 %v7337_v22  ;;  %v7261_v22 = vor.u32 %v8681_v12, %v7258_v13  ;;  %v8597_v12 = vld [vmem:[#allocation11 + $0x24] sm:$0xf]  ;;  %v6922_v13 = vld [vmem:[#allocation11 + $0x30] sm:$0xf0] }
  0xef   : > { %2397 = vmatpush.bf16.msra.mxu0 %v6937_v28  ;;  %v8677_v28 = vld [vmem:[#allocation11 + $0x2a4] sm:$0xf] }
  0xf0   : > { %2410 = vmatpush.bf16.msra.mxu1 %v7065_v29  ;;  %v7242_v29 = vld [vmem:[#allocation11 + $0x2b0] sm:$0xf0] }
  0xf1   : > { %2423 = vmatpush.bf16.msra.mxu2 %v7193_v30  ;;  %v8709_v30 = vld [vmem:[#allocation11 + $0x3a4] sm:$0xf] }
  0xf2   : > { %2436 = vmatpush.bf16.msra.mxu3 %v7321_v34  ;;  %v7245_v34 = vor.u32 %v8677_v28, %v7242_v29  ;;  %v7373_v38 = vor.u32 %v8709_v30, %v7370_v31  ;;  %v6925_v28 = vor.u32 %v8597_v12, %v6922_v13  ;;  %v8593_v29 = vld [vmem:[#allocation11 + $0x4] sm:$0xf]  ;;  %v6906_v30 = vld [vmem:[#allocation11 + $0x10] sm:$0xf0]  ;;  %v8680_v12 = vld [vmem:[#allocation11 + $0x2b4] sm:$0xf0] }
  0xf3   : > { %2398 = vmatpush.bf16.msra.mxu0 %v6921_v40  ;;  %v8673_v40 = vld [vmem:[#allocation11 + $0x284] sm:$0xf]  ;;  %v7376_v13 = vld [vmem:[#allocation11 + $0x3a8] sm:$0xf] }
  0xf4   : > { %2411 = vmatpush.bf16.msra.mxu1 %v7049_v43  ;;  %v7354_v43 = vld [vmem:[#allocation11 + $0x390] sm:$0xf0]  ;;  %v7229_v46 = vor.u32 %v8673_v40, %v7226_v41  ;;  %v8689_v40 = vld [vmem:[#allocation11 + $0x304] sm:$0xf] }
  0xf5   : > { %2424 = vmatpush.bf16.msra.mxu2 %v7177_v44  ;;  %v6973_v44 = vor.u32 %v8609_v35, %v6970_v36  ;;  %v7357_v50 = vor.u32 %v8705_v42, %v7354_v43  ;;  %v7034_v35 = vld [vmem:[#allocation11 + $0x110] sm:$0xf0]  ;;  %v8657_v36 = vld [vmem:[#allocation11 + $0x204] sm:$0xf]  ;;  %v7024_v42 = vld [vmem:[#allocation11 + $0xe8] sm:$0xf] }
  0xf6   : > { %2437 = vmatpush.bf16.msra.mxu3 %v7305_v48  ;;  %v6954_v48 = vld [vmem:[#allocation11 + $0x70] sm:$0xf0]  ;;  %v8624_v43 = vld [vmem:[#allocation11 + $0xf4] sm:$0xf0] }
  0xf7   : > { %2399 = vmatpush.bf16.msra.mxu0 %v6905_v55  ;;  %v7338_v55 = vld [vmem:[#allocation11 + $0x370] sm:$0xf0]  ;;  %v6957_v58 = vor.u32 %v8605_v47, %v6954_v48  ;;  %v7280_v47 = vld [vmem:[#allocation11 + $0x2e8] sm:$0xf]  ;;  %v8688_v48 = vld [vmem:[#allocation11 + $0x2f4] sm:$0xf0] }
  0xf8   : > { %2412 = vmatpush.bf16.msra.mxu1 %v7033_v60  ;;  %v7085_v60 = vor.u32 %v8637_v49, %v7082_v51  ;;  %v7341_v1 = vor.u32 %v8701_v54, %v7338_v55  ;;  %v7290_v41 = vld [vmem:[#allocation11 + $0x310] sm:$0xf0]  ;;  %v7408_v51 = vld [vmem:[#allocation11 + $0x3e8] sm:$0xf]  ;;  %v7025_v54 = vor.u32 %v8624_v43, %v7024_v42  ;;  %v8640_v42 = vld [vmem:[#allocation11 + $0x174] sm:$0xf0] }
  0xf9   : > { %2425 = vmatpush.bf16.msra.mxu2 %v7161_v57  ;;  %v7213_v57 = vor.u32 %v8669_v52, %v7210_v53  ;;  %v8720_v52 = vld [vmem:[#allocation11 + $0x3f4] sm:$0xf0]  ;;  %v7293_v53 = vor.u32 %v8689_v40, %v7290_v41  ;;  %v7216_v43 = vld [vmem:[#allocation11 + $0x268] sm:$0xf] }
  0xfa   : > { %2438 = vmatpush.bf16.msra.mxu3 %v7289_v0  ;;  %2400 = vmatmul.bf16.vlgmr.msra.gmra.mxu0 %v9885_v18  ;;  %v1425_v56 = vpop.f32.mrf.mxu0  ;;  %v7409_v61 = vor.u32 %v8720_v52, %v7408_v51  ;;  %v8604_v52 = vld [vmem:[#allocation11 + $0x54] sm:$0xf0] }
  0xfb   : > { %2444 = vmatpush.bf16.msrb.mxu0 %v7021_v5  ;;  %2413 = vmatmul.bf16.vlgmr.msra.gmra.mxu1 %v9887_v20  ;;  %v1438_v59 = vpop.f32.mrf.mxu1 }
  0xfc   : > { %2457 = vmatpush.bf16.msrb.mxu1 %v7149_v7  ;;  %2426 = vmatmul.bf16.vlgmr.msra.gmra.mxu2 %v9881_v14  ;;  %v1439_v0 = vadd.f32 %v1438_v59, %v1425_v56  ;;  %v7194_v7 = vld [vmem:[#allocation11 + $0x250] sm:$0xf0]  ;;  %v7008_v59 = vld [vmem:[#allocation11 + $0xc8] sm:$0xf] }
  0xfd   : > { %2470 = vmatpush.bf16.msrb.mxu2 %v7277_v3  ;;  %2439 = vmatmul.bf16.vlgmr.msra.gmra.mxu3 %v9883_v17  ;;  %v8697_v3 = vld [vmem:[#allocation11 + $0x344] sm:$0xf]  ;;  %v7197_v11 = vor.u32 %v8665_v2, %v7194_v7 }
  0xfe   : > { %2483 = vmatpush.bf16.msrb.mxu3 %v7405_v10  ;;  %v7069_v10 = vor.u32 %v8633_v63, %v7066_v6  ;;  %v7325_v16 = vor.u32 %v8697_v3, %v7322_v4  ;;  %v7264_v63 = vld [vmem:[#allocation11 + $0x2c8] sm:$0xf]  ;;  %v8616_v4 = vld [vmem:[#allocation11 + $0xb4] sm:$0xf0] }
  0xff   : > { %2445 = vmatpush.bf16.msrb.mxu0 %v7005_v19  ;;  %v1451_v5 = vpop.f32.mrf.mxu2  ;;  %v7050_v19 = vld [vmem:[#allocation11 + $0x130] sm:$0xf0]  ;;  %v6992_v3 = vld [vmem:[#allocation11 + $0xa8] sm:$0xf] }
 0x100   : > { %2458 = vmatpush.bf16.msrb.mxu1 %v7133_v21  ;;  %v1452_v8 = vadd.f32 %v1451_v5, %v1439_v0  ;;  %v8661_v21 = vld [vmem:[#allocation11 + $0x224] sm:$0xf]  ;;  %v8684_v0 = vld [vmem:[#allocation11 + $0x2d4] sm:$0xf0]  ;;  %v7392_v5 = vld [vmem:[#allocation11 + $0x3c8] sm:$0xf] }
 0x101   : > { %2471 = vmatpush.bf16.msrb.mxu2 %v7261_v22  ;;  %v7178_v22 = vld [vmem:[#allocation11 + $0x230] sm:$0xf0]  ;;  %v7265_v7 = vor.u32 %v8684_v0, %v7264_v63 }
 0x102   : > { %2484 = vmatpush.bf16.msrb.mxu3 %v7389_v26  ;;  %v1464_v23 = vpop.f32.mrf.mxu3  ;;  %v1427_v27 = vpop.f32.mrf.mxu0 }
 0x103   : > { %2446 = vmatpush.bf16.msrb.mxu0 %v6989_v32  ;;  %v9893_v26 = vadd.f32 %v1464_v23, %v1452_v8  ;;  %v1440_v31 = vpop.f32.mrf.mxu1  ;;  %v7053_v32 = vor.u32 %v8629_v15, %v7050_v19  ;;  %v7120_v8 = vld [vmem:[#allocation11 + $0x1a8] sm:$0xf]  ;;  %v8712_v15 = vld [vmem:[#allocation11 + $0x3b4] sm:$0xf0] }
 0x104   : > { %2459 = vmatpush.bf16.msrb.mxu1 %v7117_v33  ;;  %v7181_v33 = vor.u32 %v8661_v21, %v7178_v22  ;;  %v6976_v22 = vld [vmem:[#allocation11 + $0x88] sm:$0xf]  ;;  %v8612_v23 = vld [vmem:[#allocation11 + $0x94] sm:$0xf0] }
 0x105   : > { %2472 = vmatpush.bf16.msrb.mxu2 %v7245_v34  ;;  %v8625_v34 = vld [vmem:[#allocation11 + $0x104] sm:$0xf]  ;;  %v8644_v27 = vld [vmem:[#allocation11 + $0x194] sm:$0xf0] }
 0x106   : > { %2485 = vmatpush.bf16.msrb.mxu3 %v7373_v38  ;;  %v7309_v38 = vor.u32 %v8693_v24, %v7306_v25  ;;  %v7037_v49 = vor.u32 %v8625_v34, %v7034_v35  ;;  %v7104_v24 = vld [vmem:[#allocation11 + $0x188] sm:$0xf]  ;;  %v7377_v25 = vor.u32 %v8712_v15, %v7376_v13  ;;  %v8708_v31 = vld [vmem:[#allocation11 + $0x394] sm:$0xf0] }
 0x107   : > { %2447 = vmatpush.bf16.msrb.mxu0 %v6973_v44  ;;  %v1453_v37 = vpop.f32.mrf.mxu2  ;;  %v7152_v44 = vld [vmem:[#allocation11 + $0x1e8] sm:$0xf]  ;;  %v7105_v34 = vor.u32 %v8644_v27, %v7104_v24  ;;  %v8664_v13 = vld [vmem:[#allocation11 + $0x234] sm:$0xf0] }
 0x108   : > { %2460 = vmatpush.bf16.msrb.mxu1 %v7101_v45  ;;  %v6909_v45 = vor.u32 %v8593_v29, %v6906_v30  ;;  %v8676_v29 = vld [vmem:[#allocation11 + $0x294] sm:$0xf0]  ;;  %v7360_v30 = vld [vmem:[#allocation11 + $0x388] sm:$0xf] }
 0x109   : > { %2473 = vmatpush.bf16.msrb.mxu2 %v7229_v46  ;;  %v8656_v46 = vld [vmem:[#allocation11 + $0x1f4] sm:$0xf0]  ;;  %v6960_v37 = vld [vmem:[#allocation11 + $0x68] sm:$0xf]  ;;  %v7361_v40 = vor.u32 %v8708_v31, %v7360_v30 }
 0x10a   : > { %2486 = vmatpush.bf16.msrb.mxu3 %v7357_v50  ;;  %v7165_v50 = vor.u32 %v8657_v36, %v7162_v39  ;;  %v1466_v55 = vpop.f32.mrf.mxu3  ;;  %v7153_v56 = vor.u32 %v8656_v46, %v7152_v44  ;;  %v7088_v39 = vld [vmem:[#allocation11 + $0x168] sm:$0xf]  ;;  %v8672_v44 = vld [vmem:[#allocation11 + $0x274] sm:$0xf0] }
 0x10b   : > { %2448 = vmatpush.bf16.msrb.mxu0 %v6957_v58  ;;  %v7281_v58 = vor.u32 %v8688_v48, %v7280_v47  ;;  %v8704_v46 = vld [vmem:[#allocation11 + $0x374] sm:$0xf0]  ;;  %v6944_v48 = vld [vmem:[#allocation11 + $0x48] sm:$0xf]  ;;  %v3595_v55 = vrot.slane %v9893_v26, 4 }
 0x10c   : > { %2461 = vmatpush.bf16.msrb.mxu1 %v7085_v60  ;;  %v8620_v60 = vld [vmem:[#allocation11 + $0xd4] sm:$0xf0]  ;;  %v6945_v0 = vor.u32 %v8604_v52, %v6944_v48  ;;  %v7312_v15 = vld [vmem:[#allocation11 + $0x328] sm:$0xf]  ;;  %v7010_v52 = vld [vmem:[#allocation11 + $0xd8] sm:$0xf0] }
 0x10d   : > { %2474 = vmatpush.bf16.msrb.mxu2 %v7213_v57  ;;  %v7136_v57 = vld [vmem:[#allocation11 + $0x1c8] sm:$0xf]  ;;  %v7009_v6 = vor.u32 %v8620_v60, %v7008_v59 }
 0x10e   : > { %2487 = vmatpush.bf16.msrb.mxu3 %v7341_v1  ;;  %v8716_v1 = vld [vmem:[#allocation11 + $0x3d4] sm:$0xf0]  ;;  %v7137_v2 = vor.u32 %v8652_v62, %v7136_v57  ;;  %v7200_v60 = vld [vmem:[#allocation11 + $0x248] sm:$0xf] }
 0x10f   : > { %2449 = vmatpush.bf16.msrb.mxu0 %v6941_v9  ;;  %v7393_v9 = vor.u32 %v8716_v1, %v7392_v5  ;;  %v8668_v57 = vld [vmem:[#allocation11 + $0x254] sm:$0xf0]  ;;  %v6928_v5 = vld [vmem:[#allocation11 + $0x28] sm:$0xf] }
 0x110   : > { %2462 = vmatpush.bf16.msrb.mxu1 %v7069_v10  ;;  %v8648_v10 = vld [vmem:[#allocation11 + $0x1b4] sm:$0xf0]  ;;  %v7040_v27 = vld [vmem:[#allocation11 + $0x108] sm:$0xf] }
 0x111   : > { %2475 = vmatpush.bf16.msrb.mxu2 %v7197_v11  ;;  %v7248_v11 = vld [vmem:[#allocation11 + $0x2a8] sm:$0xf]  ;;  %v7121_v19 = vor.u32 %v8648_v10, %v7120_v8  ;;  %v8700_v62 = vld [vmem:[#allocation11 + $0x354] sm:$0xf0] }
 0x112   : > { %2488 = vmatpush.bf16.msrb.mxu3 %v7325_v16  ;;  %v6993_v16 = vor.u32 %v8616_v4, %v6992_v3  ;;  %v7249_v21 = vor.u32 %v8680_v12, %v7248_v11  ;;  %v7056_v3 = vld [vmem:[#allocation11 + $0x128] sm:$0xf]  ;;  %v8632_v4 = vld [vmem:[#allocation11 + $0x134] sm:$0xf0] }
 0x113   : > { %2450 = vmatpush.bf16.msrb.mxu0 %v6925_v28  ;;  %v7232_v28 = vld [vmem:[#allocation11 + $0x288] sm:$0xf]  ;;  %v7057_v24 = vor.u32 %v8632_v4, %v7056_v3  ;;  %v7250_v3 = vld [vmem:[#allocation11 + $0x2b8] sm:$0xf0]  ;;  %v8710_v4 = vld [vmem:[#allocation11 + $0x3ac] sm:$0xf] }
 0x114   : > { %2463 = vmatpush.bf16.msrb.mxu1 %v7053_v32  ;;  %v6977_v32 = vor.u32 %v8612_v23, %v6976_v22  ;;  %v7233_v35 = vor.u32 %v8676_v29, %v7232_v28  ;;  %v7184_v12 = vld [vmem:[#allocation11 + $0x228] sm:$0xf]  ;;  %v8596_v23 = vld [vmem:[#allocation11 + $0x14] sm:$0xf0] }
 0x115   : > { %2476 = vmatpush.bf16.msrb.mxu2 %v7181_v33  ;;  %v6912_v22 = vld [vmem:[#allocation11 + $0x8] sm:$0xf]  ;;  %v8628_v28 = vld [vmem:[#allocation11 + $0x114] sm:$0xf0] }
 0x116   : > { %2489 = vmatpush.bf16.msrb.mxu3 %v7309_v38  ;;  %v8608_v38 = vld [vmem:[#allocation11 + $0x74] sm:$0xf0]  ;;  %v7168_v29 = vld [vmem:[#allocation11 + $0x208] sm:$0xf] }
 0x117   : > { %2451 = vmatpush.bf16.msrb.mxu0 %v6909_v45  ;;  %v1477_v33 = vpop.f32.mrf.mxu0  ;;  %v7344_v45 = vld [vmem:[#allocation11 + $0x368] sm:$0xf]  ;;  %v6961_v47 = vor.u32 %v8608_v38, %v6960_v37  ;;  %v7026_v37 = vld [vmem:[#allocation11 + $0xf8] sm:$0xf0]  ;;  %v8654_v38 = vld [vmem:[#allocation11 + $0x1ec] sm:$0xf] }
 0x118   : > { %2464 = vmatpush.bf16.msrb.mxu1 %v7037_v49  ;;  %v1490_v36 = vpop.f32.mrf.mxu1  ;;  %v7089_v49 = vor.u32 %v8640_v42, %v7088_v39  ;;  %v6913_v39 = vor.u32 %v8596_v23, %v6912_v22  ;;  %v7282_v42 = vld [vmem:[#allocation11 + $0x2f8] sm:$0xf0]  ;;  %v8674_v23 = vld [vmem:[#allocation11 + $0x28c] sm:$0xf] }
 0x119   : > { %2477 = vmatpush.bf16.msrb.mxu2 %v7165_v50  ;;  %v1491_v41 = vadd.f32 %v1490_v36, %v1477_v33  ;;  %v7217_v50 = vor.u32 %v8672_v44, %v7216_v43  ;;  %v7296_v33 = vld [vmem:[#allocation11 + $0x308] sm:$0xf]  ;;  %v8622_v36 = vld [vmem:[#allocation11 + $0xec] sm:$0xf]  ;;  %v7041_v43 = vor.u32 %v8628_v28, %v7040_v27  ;;  %v7106_v22 = vld [vmem:[#allocation11 + $0x198] sm:$0xf0] }
 0x11a   : > { %2490 = vmatpush.bf16.msrb.mxu3 %v7293_v53  ;;  %2452 = vmatmul.bf16.vlgmr.msrb.gmra.mxu0 %v9885_v18  ;;  %v7072_v53 = vld [vmem:[#allocation11 + $0x148] sm:$0xf]  ;;  %v7029_v48 = vor.u32 %v8622_v36, %v7026_v37  ;;  %v7362_v27 = vld [vmem:[#allocation11 + $0x398] sm:$0xf0] }
 0x11b   : > { %2496 = vmatpush.bf16.msra.mxu0 %v7025_v54  ;;  %2465 = vmatmul.bf16.vlgmr.msrb.gmra.mxu1 %v9887_v20  ;;  %v8636_v54 = vld [vmem:[#allocation11 + $0x154] sm:$0xf0]  ;;  %v7090_v37 = vld [vmem:[#allocation11 + $0x178] sm:$0xf0] }
 0x11c   : > { %2509 = vmatpush.bf16.msra.mxu1 %v7153_v56  ;;  %2478 = vmatmul.bf16.vlgmr.msrb.gmra.mxu2 %v9881_v14  ;;  %v7345_v56 = vor.u32 %v8704_v46, %v7344_v45  ;;  %v8718_v45 = vld [vmem:[#allocation11 + $0x3ec] sm:$0xf]  ;;  %v7410_v46 = vld [vmem:[#allocation11 + $0x3f8] sm:$0xf0] }
 0x11d   : > { %2522 = vmatpush.bf16.msra.mxu2 %v7281_v58  ;;  %2491 = vmatmul.bf16.vlgmr.msrb.gmra.mxu3 %v9883_v17 }
 0x11e   : > { %2535 = vmatpush.bf16.msra.mxu3 %v7409_v61  ;;  %v7328_v61 = vld [vmem:[#allocation11 + $0x348] sm:$0xf] }
 0x11f   : > { %2497 = vmatpush.bf16.msra.mxu0 %v7009_v6  ;;  %v1503_v51 = vpop.f32.mrf.mxu2  ;;  %v1479_v1 = vpop.f32.mrf.mxu0  ;;  %v7073_v6 = vor.u32 %v8636_v54, %v7072_v53  ;;  %v7329_v11 = vor.u32 %v8700_v62, %v7328_v61  ;;  %v8650_v53 = vld [vmem:[#allocation11 + $0x1cc] sm:$0xf]  ;;  %v7413_v54 = vor.u32 %v8718_v45, %v7410_v46 }
 0x120   : > { %2510 = vmatpush.bf16.msra.mxu1 %v7137_v2  ;;  %v1504_v58 = vadd.f32 %v1503_v51, %v1491_v41  ;;  %v1516_v59 = vpop.f32.mrf.mxu3  ;;  %v7201_v2 = vor.u32 %v8668_v57, %v7200_v60  ;;  %v1492_v8 = vpop.f32.mrf.mxu1  ;;  %v8686_v41 = vld [vmem:[#allocation11 + $0x2ec] sm:$0xf]  ;;  %v7394_v60 = vld [vmem:[#allocation11 + $0x3d8] sm:$0xf0] }
 0x121   : > { %2523 = vmatpush.bf16.msra.mxu2 %v7265_v7  ;;  %v8600_v7 = vld [vmem:[#allocation11 + $0x34] sm:$0xf0]  ;;  %v8618_v51 = vld [vmem:[#allocation11 + $0xcc] sm:$0xf]  ;;  %v7378_v8 = vld [vmem:[#allocation11 + $0x3b8] sm:$0xf0] }
 0x122   : > { %2536 = vmatpush.bf16.msra.mxu3 %v7393_v9  ;;  %v9900_v63 = vadd.f32 %v1516_v59, %v1504_v58  ;;  %v7266_v58 = vld [vmem:[#allocation11 + $0x2d8] sm:$0xf0]  ;;  %v8714_v59 = vld [vmem:[#allocation11 + $0x3cc] sm:$0xf]  ;;  %v7013_v57 = vor.u32 %v8618_v51, %v7010_v52 }
 0x123   : > { %2498 = vmatpush.bf16.msra.mxu0 %v6993_v16  ;;  %v8696_v16 = vld [vmem:[#allocation11 + $0x334] sm:$0xf0]  ;;  %v8646_v1 = vld [vmem:[#allocation11 + $0x1ac] sm:$0xf]  ;;  %v7074_v51 = vld [vmem:[#allocation11 + $0x158] sm:$0xf0] }
 0x124   : > { %2511 = vmatpush.bf16.msra.mxu1 %v7121_v19  ;;  %v3592_v9 = vrot.slane %v9900_v63, 4  ;;  %v9905_v10 = vsel %vm3593_vm0, %v9900_v63, %v3595_v55  ;;  %v7313_v31 = vor.u32 %v8696_v16, %v7312_v15  ;;  %v7138_v55 = vld [vmem:[#allocation11 + $0x1d8] sm:$0xf0]  ;;  %v8642_v16 = vld [vmem:[#allocation11 + $0x18c] sm:$0xf] }
 0x125   : > { %2524 = vmatpush.bf16.msra.mxu2 %v7249_v21  ;;  %v6929_v21 = vor.u32 %v8600_v7, %v6928_v5  ;;  %v7141_v61 = vor.u32 %v8650_v53, %v7138_v55  ;;  %v6994_v5 = vld [vmem:[#allocation11 + $0xb8] sm:$0xf0]  ;;  %v8678_v7 = vld [vmem:[#allocation11 + $0x2ac] sm:$0xf] }
 0x126   : > { %2537 = vmatpush.bf16.msra.mxu3 %v7377_v25  ;;  %v9909_v19 = vsel %vm3593_vm0, %v3592_v9, %v9893_v26  ;;  %v7185_v25 = vor.u32 %v8664_v13, %v7184_v12  ;;  %v7253_v12 = vor.u32 %v8678_v7, %v7250_v3  ;;  %v8610_v13 = vld [vmem:[#allocation11 + $0x8c] sm:$0xf]  ;;  %v6978_v15 = vld [vmem:[#allocation11 + $0x98] sm:$0xf0] }
 0x127   : > { %2499 = vmatpush.bf16.msra.mxu0 %v6977_v32  ;;  %v1505_v30 = vpop.f32.mrf.mxu2  ;;  %v8660_v32 = vld [vmem:[#allocation11 + $0x214] sm:$0xf0]  ;;  %v6981_v28 = vor.u32 %v8610_v13, %v6978_v15  ;;  %v8602_v46 = vld [vmem:[#allocation11 + $0x4c] sm:$0xf]  ;;  %v7202_v53 = vld [vmem:[#allocation11 + $0x258] sm:$0xf0] }
 0x128   : > { %2512 = vmatpush.bf16.msra.mxu1 %v7105_v34  ;;  %v8692_v34 = vld [vmem:[#allocation11 + $0x314] sm:$0xf0]  ;;  %v7169_v44 = vor.u32 %v8660_v32, %v7168_v29  ;;  %v7109_v30 = vor.u32 %v8642_v16, %v7106_v22  ;;  %v8666_v52 = vld [vmem:[#allocation11 + $0x24c] sm:$0xf]  ;;  %v7330_v55 = vld [vmem:[#allocation11 + $0x358] sm:$0xf0] }
 0x129   : > { %2525 = vmatpush.bf16.msra.mxu2 %v7233_v35  ;;  %v1518_v35 = vpop.f32.mrf.mxu3  ;;  %v8694_v7 = vld [vmem:[#allocation11 + $0x32c] sm:$0xf]  ;;  %v7314_v3 = vld [vmem:[#allocation11 + $0x338] sm:$0xf0] }
 0x12a   : > { %2538 = vmatpush.bf16.msra.mxu3 %v7361_v40  ;;  %v7154_v40 = vld [vmem:[#allocation11 + $0x1f8] sm:$0xf0]  ;;  %v8638_v35 = vld [vmem:[#allocation11 + $0x16c] sm:$0xf]  ;;  %v7317_v16 = vor.u32 %v8694_v7, %v7314_v3 }
 0x12b   : > { %2500 = vmatpush.bf16.msra.mxu0 %v6961_v47  ;;  %v7297_v47 = vor.u32 %v8692_v34, %v7296_v33  ;;  %v8606_v33 = vld [vmem:[#allocation11 + $0x6c] sm:$0xf]  ;;  %v6962_v34 = vld [vmem:[#allocation11 + $0x78] sm:$0xf0] }
 0x12c   : > { %2513 = vmatpush.bf16.msra.mxu1 %v7089_v49  ;;  %v7157_v49 = vor.u32 %v8654_v38, %v7154_v40  ;;  %v8670_v38 = vld [vmem:[#allocation11 + $0x26c] sm:$0xf] }
 0x12d   : > { %2526 = vmatpush.bf16.msra.mxu2 %v7217_v50  ;;  %v7285_v50 = vor.u32 %v8686_v41, %v7282_v42  ;;  %v8702_v40 = vld [vmem:[#allocation11 + $0x36c] sm:$0xf]  ;;  %v7346_v41 = vld [vmem:[#allocation11 + $0x378] sm:$0xf0]  ;;  %v6965_v42 = vor.u32 %v8606_v33, %v6962_v34 }
 0x12e   : > { %2539 = vmatpush.bf16.msra.mxu3 %v7345_v56  ;;  %v8682_v56 = vld [vmem:[#allocation11 + $0x2cc] sm:$0xf] }
 0x12f   : > { %2501 = vmatpush.bf16.msra.mxu0 %v6945_v0  ;;  %v7269_v62 = vor.u32 %v8682_v56, %v7266_v58  ;;  %v8614_v0 = vld [vmem:[#allocation11 + $0xac] sm:$0xf] }
 0x130   : > { %2514 = vmatpush.bf16.msra.mxu1 %v7073_v6  ;;  %v7397_v6 = vor.u32 %v8714_v59, %v7394_v60  ;;  %v6997_v9 = vor.u32 %v8614_v0, %v6994_v5  ;;  %v7205_v60 = vor.u32 %v8666_v52, %v7202_v53  ;;  %v8626_v13 = vld [vmem:[#allocation11 + $0x10c] sm:$0xf] }
 0x131   : > { %2527 = vmatpush.bf16.msra.mxu2 %v7201_v2  ;;  %v7122_v2 = vld [vmem:[#allocation11 + $0x1b8] sm:$0xf0]  ;;  %v8658_v22 = vld [vmem:[#allocation11 + $0x20c] sm:$0xf] }
 0x132   : > { %2540 = vmatpush.bf16.msra.mxu3 %v7329_v11  ;;  %v7125_v11 = vor.u32 %v8646_v1, %v7122_v2  ;;  %v7058_v1 = vld [vmem:[#allocation11 + $0x138] sm:$0xf0] }
 0x133   : > { %2502 = vmatpush.bf16.msra.mxu0 %v6929_v21  ;;  %v7381_v21 = vor.u32 %v8710_v4, %v7378_v8  ;;  %v7186_v2 = vld [vmem:[#allocation11 + $0x238] sm:$0xf0] }
 0x134   : > { %2515 = vmatpush.bf16.msra.mxu1 %v7057_v24  ;;  %v7234_v24 = vld [vmem:[#allocation11 + $0x298] sm:$0xf0] }
 0x135   : > { %2528 = vmatpush.bf16.msra.mxu2 %v7185_v25  ;;  %v8706_v25 = vld [vmem:[#allocation11 + $0x38c] sm:$0xf] }
 0x136   : > { %2541 = vmatpush.bf16.msra.mxu3 %v7313_v31  ;;  %v7237_v31 = vor.u32 %v8674_v23, %v7234_v24  ;;  %v7365_v36 = vor.u32 %v8706_v25, %v7362_v27  ;;  %v7170_v23 = vld [vmem:[#allocation11 + $0x218] sm:$0xf0]  ;;  %v8690_v25 = vld [vmem:[#allocation11 + $0x30c] sm:$0xf] }
 0x137   : > { %2503 = vmatpush.bf16.msra.mxu0 %v6913_v39  ;;  %v9915_v29 = vpop.f32.mrf.mxu0  ;;  %v7218_v39 = vld [vmem:[#allocation11 + $0x278] sm:$0xf0] }
 0x138   : > { %2516 = vmatpush.bf16.msra.mxu1 %v7041_v43  ;;  %v9917_v32 = vpop.f32.mrf.mxu1  ;;  %v7093_v43 = vor.u32 %v8638_v35, %v7090_v37  ;;  %v7298_v27 = vld [vmem:[#allocation11 + $0x318] sm:$0xf0] }
 0x139   : > { %2529 = vmatpush.bf16.msra.mxu2 %v7169_v44  ;;  %v7221_v44 = vor.u32 %v8670_v38, %v7218_v39  ;;  %v7301_v33 = vor.u32 %v8690_v25, %v7298_v27  ;;  %v1543_v34 = vadd.f32 %v9917_v32, %v9915_v29  ;;  %v8751_v25 = vld [vmem:[#allocation13 + $0xec] sm:$0xf0]  ;;  %v7656_v27 = vld [vmem:[#allocation13 + $0x1e0] sm:$0xf] }
 0x13a   : > { %2542 = vmatpush.bf16.msra.mxu3 %v7297_v47  ;;  %2504 = vmatmul.bf16.vlgmr.msra.gmra.mxu0 %v9885_v18  ;;  %v6946_v47 = vld [vmem:[#allocation11 + $0x58] sm:$0xf0] }
 0x13b   : > { %2548 = vmatpush.bf16.msrb.mxu0 %v7029_v48  ;;  %2517 = vmatmul.bf16.vlgmr.msra.gmra.mxu1 %v9887_v20  ;;  %v8634_v48 = vld [vmem:[#allocation11 + $0x14c] sm:$0xf]  ;;  %v6949_v56 = vor.u32 %v8602_v46, %v6946_v47 }
 0x13c   : > { %2561 = vmatpush.bf16.msrb.mxu1 %v7157_v49  ;;  %2530 = vmatmul.bf16.vlgmr.msra.gmra.mxu2 %v9881_v14  ;;  %v7349_v49 = vor.u32 %v8702_v40, %v7346_v41  ;;  %v7077_v59 = vor.u32 %v8634_v48, %v7074_v51 }
 0x13d   : > { %2574 = vmatpush.bf16.msrb.mxu2 %v7285_v50  ;;  %2543 = vmatmul.bf16.vlgmr.msra.gmra.mxu3 %v9883_v17 }
 0x13e   : > { %2587 = vmatpush.bf16.msrb.mxu3 %v7413_v54  ;;  %v8698_v54 = vld [vmem:[#allocation11 + $0x34c] sm:$0xf] }
 0x13f   : > { %2549 = vmatpush.bf16.msrb.mxu0 %v7013_v57  ;;  %v9919_v45 = vpop.f32.mrf.mxu2  ;;  %v1531_v58 = vpop.f32.mrf.mxu0  ;;  %v8598_v57 = vld [vmem:[#allocation11 + $0x2c] sm:$0xf]  ;;  %v7333_v5 = vor.u32 %v8698_v54, %v7330_v55 }
 0x140   : > { %2562 = vmatpush.bf16.msrb.mxu1 %v7141_v61  ;;  %v9921_v50 = vpop.f32.mrf.mxu3  ;;  %v6930_v61 = vld [vmem:[#allocation11 + $0x38] sm:$0xf0]  ;;  %v1544_v0 = vpop.f32.mrf.mxu1  ;;  %v1556_v35 = vadd.f32 %v9919_v45, %v1543_v34  ;;  %v8811_v34 = vld [vmem:[#allocation13 + $0x2cc] sm:$0xf0] }
 0x141   : > { %2575 = vmatpush.bf16.msrb.mxu2 %v7269_v62  ;;  %v8630_v62 = vld [vmem:[#allocation11 + $0x12c] sm:$0xf]  ;;  %v6933_v4 = vor.u32 %v8598_v57, %v6930_v61 }
 0x142   : > { %2588 = vmatpush.bf16.msrb.mxu3 %v7397_v6  ;;  %v8662_v6 = vld [vmem:[#allocation11 + $0x22c] sm:$0xf]  ;;  %v7061_v8 = vor.u32 %v8630_v62, %v7058_v1  ;;  %v1569_v39 = vadd.f32 %v9921_v50, %v1556_v35 }
 0x143   : > { %2550 = vmatpush.bf16.msrb.mxu0 %v6997_v9  ;;  %v7189_v9 = vor.u32 %v8662_v6, %v7186_v2 }
 0x144   : > { %2563 = vmatpush.bf16.msrb.mxu1 %v7125_v11  ;;  %v8594_v11 = vld [vmem:[#allocation11 + $0xc] sm:$0xf]  ;;  %v3619_v41 = vrot.slane %v1569_v39, 4  ;;  %v9125_v47 = vpack.i.bf16 %v9893_v26, %v1569_v39 }
 0x145   : > { %2576 = vmatpush.bf16.msrb.mxu2 %v7253_v12  ;;  %v6914_v12 = vld [vmem:[#allocation11 + $0x18] sm:$0xf0] }
 0x146   : > { %2589 = vmatpush.bf16.msrb.mxu3 %v7381_v21  ;;  %v7042_v21 = vld [vmem:[#allocation11 + $0x118] sm:$0xf0] }
 0x147   : > { %2551 = vmatpush.bf16.msrb.mxu0 %v6981_v28  ;;  %v1557_v15 = vpop.f32.mrf.mxu2  ;;  %v6917_v28 = vor.u32 %v8594_v11, %v6914_v12  ;;  %v7784_v12 = vld [vmem:[#allocation13 + $0x2e0] sm:$0xf] }
 0x148   : > { %2564 = vmatpush.bf16.msrb.mxu1 %v7109_v30  ;;  %v1570_v24 = vpop.f32.mrf.mxu3  ;;  %v7045_v30 = vor.u32 %v8626_v13, %v7042_v21  ;;  %v8815_v13 = vld [vmem:[#allocation13 + $0x2ec] sm:$0xf0] }
 0x149   : > { %2577 = vmatpush.bf16.msrb.mxu2 %v7237_v31  ;;  %v7173_v31 = vor.u32 %v8658_v22, %v7170_v23  ;;  %v7785_v15 = vor.u32 %v8815_v13, %v7784_v12  ;;  %v8847_v21 = vld [vmem:[#allocation13 + $0x3ec] sm:$0xf0]  ;;  %v7528_v24 = vld [vmem:[#allocation13 + $0xe0] sm:$0xf] }
 0x14a   : > { %2590 = vmatpush.bf16.msrb.mxu3 %v7365_v36  ;;  %v8771_v12 = vld [vmem:[#allocation13 + $0x18c] sm:$0xf0]  ;;  %v7720_v13 = vld [vmem:[#allocation13 + $0x260] sm:$0xf] }
 0x14b   : > { %2552 = vmatpush.bf16.msrb.mxu0 %v6965_v42 }
 0x14c   : > { %2565 = vmatpush.bf16.msrb.mxu1 %v7093_v43 }
 0x14d   : > { %2578 = vmatpush.bf16.msrb.mxu2 %v7221_v44 }
 0x14e   : > { %2591 = vmatpush.bf16.msrb.mxu3 %v7349_v49 }
 0x14f   : > { %2553 = vmatpush.bf16.msrb.mxu0 %v6949_v56 }
 0x150   : > { %2566 = vmatpush.bf16.msrb.mxu1 %v7077_v59 }
 0x151   : > { %2579 = vmatpush.bf16.msrb.mxu2 %v7205_v60 }
 0x152   : > { %2592 = vmatpush.bf16.msrb.mxu3 %v7333_v5 }
 0x153   : > { %2554 = vmatpush.bf16.msrb.mxu0 %v6933_v4 }
 0x154   : > { %2567 = vmatpush.bf16.msrb.mxu1 %v7061_v8 }
 0x155   : > { %2580 = vmatpush.bf16.msrb.mxu2 %v7189_v9 }
 0x156   : > { %2593 = vmatpush.bf16.msrb.mxu3 %v7317_v16  ;;  %v7912_v16 = vld [vmem:[#allocation13 + $0x3e0] sm:$0xf] }
 0x157   : > { %2555 = vmatpush.bf16.msrb.mxu0 %v6917_v28  ;;  %v1581_v36 = vpop.f32.mrf.mxu0  ;;  %v7913_v22 = vor.u32 %v8847_v21, %v7912_v16 }
 0x158   : > { %2568 = vmatpush.bf16.msrb.mxu1 %v7045_v30  ;;  %v1594_v37 = vpop.f32.mrf.mxu1  ;;  %v7529_v30 = vor.u32 %v8751_v25, %v7528_v24  ;;  %v8831_v24 = vld [vmem:[#allocation13 + $0x36c] sm:$0xf0] }
 0x159   : > { %2581 = vmatpush.bf16.msrb.mxu2 %v7173_v31  ;;  %v1595_v38 = vadd.f32 %v1594_v37, %v1581_v36  ;;  %v8783_v31 = vld [vmem:[#allocation13 + $0x1ec] sm:$0xf0]  ;;  %v7896_v37 = vld [vmem:[#allocation13 + $0x3c0] sm:$0xf] }
 0x15a   : > { %2594 = vmatpush.bf16.msrb.mxu3 %v7301_v33  ;;  %2556 = vmatmul.bf16.vlgmr.msrb.gmra.mxu0 %v9885_v18  ;;  %v7768_v33 = vld [vmem:[#allocation13 + $0x2c0] sm:$0xf]  ;;  %v7657_v35 = vor.u32 %v8783_v31, %v7656_v27  ;;  %v8735_v31 = vld [vmem:[#allocation13 + $0x6c] sm:$0xf0] }
 0x15b   : > { %2569 = vmatmul.bf16.vlgmr.msrb.gmra.mxu1 %v9887_v20  ;;  %v7769_v36 = vor.u32 %v8811_v34, %v7768_v33  ;;  %3368 = vmatpush.bf16.msra.mxu0 %v7529_v30  ;;  %v7464_v30 = vld [vmem:[#allocation13 + $0x60] sm:$0xf] }
 0x15c   : > { %2582 = vmatmul.bf16.vlgmr.msrb.gmra.mxu2 %v9881_v14  ;;  %3381 = vmatpush.bf16.msra.mxu1 %v7657_v35  ;;  %v7592_v33 = vld [vmem:[#allocation13 + $0x160] sm:$0xf]  ;;  %v7465_v34 = vor.u32 %v8735_v31, %v7464_v30  ;;  %v8767_v35 = vld [vmem:[#allocation13 + $0x16c] sm:$0xf0]  ;;  %v8749_v31 = vld [vmem:[#allocation13 + $0xe4] sm:$0xf] }
 0x15d   : > { %2595 = vmatmul.bf16.vlgmr.msrb.gmra.mxu3 %v9883_v17  ;;  %3394 = vmatpush.bf16.msra.mxu2 %v7785_v15  ;;  %v8799_v15 = vld [vmem:[#allocation13 + $0x26c] sm:$0xf0] }
 0x15e   : > { %3407 = vmatpush.bf16.msra.mxu3 %v7913_v22  ;;  %v7721_v21 = vor.u32 %v8799_v15, %v7720_v13  ;;  %v7848_v22 = vld [vmem:[#allocation13 + $0x360] sm:$0xf]  ;;  %v7914_v13 = vld [vmem:[#allocation13 + $0x3f0] sm:$0xf0]  ;;  %v8755_v30 = vld [vmem:[#allocation13 + $0x10c] sm:$0xf0] }
 0x15f   : > { %v1607_v40 = vpop.f32.mrf.mxu2  ;;  %v1583_v20 = vpop.f32.mrf.mxu0  ;;  %v7849_v27 = vor.u32 %v8831_v24, %v7848_v22  ;;  %v7416_v22 = vld [vmem:[#allocation13] sm:$0xf] }
 0x160   : > { %v1608_v42 = vadd.f32 %v1607_v40, %v1595_v38  ;;  %v1620_v18 = vpop.f32.mrf.mxu3  ;;  %v1596_v44 = vpop.f32.mrf.mxu1  ;;  %v8843_v38 = vld [vmem:[#allocation13 + $0x3cc] sm:$0xf0]  ;;  %v7544_v24 = vld [vmem:[#allocation13 + $0x100] sm:$0xf] }
 0x161   : > { %v7897_v40 = vor.u32 %v8843_v38, %v7896_v37  ;;  %3395 = vmatpush.bf16.msra.mxu2 %v7769_v36  ;;  %v8779_v44 = vld [vmem:[#allocation13 + $0x1cc] sm:$0xf0]  ;;  %v7704_v36 = vld [vmem:[#allocation13 + $0x240] sm:$0xf]  ;;  %v7593_v38 = vor.u32 %v8767_v35, %v7592_v33  ;;  %v7530_v33 = vld [vmem:[#allocation13 + $0xf0] sm:$0xf0] }
 0x162   : > { %v1621_v43 = vadd.f32 %v1620_v18, %v1608_v42  ;;  %v7512_v42 = vld [vmem:[#allocation13 + $0xc0] sm:$0xf]  ;;  %v8747_v18 = vld [vmem:[#allocation13 + $0xcc] sm:$0xf0] }
 0x163   : > { %3408 = vmatpush.bf16.msra.mxu3 %v7897_v40  ;;  %v7513_v20 = vor.u32 %v8747_v18, %v7512_v42  ;;  %v8795_v37 = vld [vmem:[#allocation13 + $0x24c] sm:$0xf0]  ;;  %v7832_v40 = vld [vmem:[#allocation13 + $0x340] sm:$0xf] }
 0x164   : > { %v3617_v14 = vrot.slane %v1621_v43, 4  ;;  %v9932_v17 = vsel %vm3593_vm0, %v1621_v43, %v3619_v41  ;;  %v9120_v29 = vpack.i.bf16 %v9900_v63, %v1621_v43  ;;  %v7640_v43 = vld [vmem:[#allocation13 + $0x1c0] sm:$0xf] }
 0x165   : > { %3369 = vmatpush.bf16.msra.mxu0 %v7513_v20  ;;  %v7448_v20 = vld [vmem:[#allocation13 + $0x40] sm:$0xf] }
 0x166   : > { %v9936_v32 = vsel %vm3593_vm0, %v3617_v14, %v1569_v39  ;;  %9121 = vrot.lane.b32.xlu1 %v9120_v29, %s9572_s23  ;;  %v7752_v14 = vld [vmem:[#allocation13 + $0x2a0] sm:$0xf]  ;;  %v7641_v29 = vor.u32 %v8779_v44, %v7640_v43  ;;  %v8731_v44 = vld [vmem:[#allocation13 + $0x4c] sm:$0xf0] }
 0x167   : > { %v1609_v45 = vpop.f32.mrf.mxu2 }
 0x168   : > { %v1622_v46 = vpop.f32.mrf.mxu3  ;;  %v8807_v45 = vld [vmem:[#allocation13 + $0x2ac] sm:$0xf0]  ;;  %3382 = vmatpush.bf16.msra.mxu1 %v7641_v29  ;;  %v7449_v29 = vor.u32 %v8731_v44, %v7448_v20 }
 0x169   : > { %v7880_v46 = vld [vmem:[#allocation13 + $0x3a0] sm:$0xf] }
 0x16e   : > { %9126 = vrot.lane.b32.xlu1 %v9125_v47, %s9572_s23  ;;  %v8839_v47 = vld [vmem:[#allocation13 + $0x3ac] sm:$0xf0] }
 0x177   : > { %v2401_v48 = vpop.f32.mrf.mxu0 }
 0x178   : > { %v2414_v49 = vpop.f32.mrf.mxu1 }
 0x179   : > { %v2415_v50 = vadd.f32 %v2414_v49, %v2401_v48  ;;  %v7753_v48 = vor.u32 %v8807_v45, %v7752_v14  ;;  %v7881_v49 = vor.u32 %v8839_v47, %v7880_v46  ;;  %v7576_v14 = vld [vmem:[#allocation13 + $0x140] sm:$0xf]  ;;  %v8763_v45 = vld [vmem:[#allocation13 + $0x14c] sm:$0xf0] }
 0x17a   : > { %v7688_v46 = vld [vmem:[#allocation13 + $0x220] sm:$0xf]  ;;  %v8791_v47 = vld [vmem:[#allocation13 + $0x22c] sm:$0xf0] }
 0x17b   : > { %3396 = vmatpush.bf16.msra.mxu2 %v7753_v48  ;;  %3409 = vmatpush.bf16.msra.mxu3 %v7881_v49  ;;  %v7577_v48 = vor.u32 %v8763_v45, %v7576_v14  ;;  %v7689_v49 = vor.u32 %v8791_v47, %v7688_v46  ;;  %v8841_v14 = vld [vmem:[#allocation13 + $0x3c4] sm:$0xf] }
 0x17f   : > { %v2427_v51 = vpop.f32.mrf.mxu2  ;;  %v2403_v63 = vpop.f32.mrf.mxu0 }
 0x180   : > { %v2428_v52 = vadd.f32 %v2427_v51, %v2415_v50  ;;  %v2440_v53 = vpop.f32.mrf.mxu3  ;;  %v2416_v55 = vpop.f32.mrf.mxu1  ;;  %v7496_v51 = vld [vmem:[#allocation13 + $0xa0] sm:$0xf] }
 0x182   : > { %v9941_v54 = vadd.f32 %v2440_v53, %v2428_v52  ;;  %v8743_v52 = vld [vmem:[#allocation13 + $0xac] sm:$0xf0]  ;;  %v7624_v53 = vld [vmem:[#allocation13 + $0x1a0] sm:$0xf] }
 0x183   : > { %v7497_v55 = vor.u32 %v8743_v52, %v7496_v51 }
 0x184   : > { %v3843_v26 = vrot.slane %v9941_v54, 4 }
 0x185   : > { %3370 = vmatpush.bf16.msra.mxu0 %v7497_v55 }
 0x187   : > { %v2429_v56 = vpop.f32.mrf.mxu2 }
 0x188   : > { %v2442_v58 = vpop.f32.mrf.mxu3  ;;  %v8775_v56 = vld [vmem:[#allocation13 + $0x1ac] sm:$0xf0] }
 0x189   : > { %v7736_v58 = vld [vmem:[#allocation13 + $0x280] sm:$0xf] }
 0x197   : > { %v2453_v59 = vpop.f32.mrf.mxu0 }
 0x198   : > { %v2466_v60 = vpop.f32.mrf.mxu1 }
 0x199   : > { %v2467_v57 = vadd.f32 %v2466_v60, %v2453_v59  ;;  %v8803_v59 = vld [vmem:[#allocation13 + $0x28c] sm:$0xf0]  ;;  %v7625_v60 = vor.u32 %v8775_v56, %v7624_v53  ;;  %v7432_v56 = vld [vmem:[#allocation13 + $0x20] sm:$0xf] }
 0x19b   : > { %3383 = vmatpush.bf16.msra.mxu1 %v7625_v60 }
 0x19f   : > { %v2479_v61 = vpop.f32.mrf.mxu2  ;;  %v2455_v1 = vpop.f32.mrf.mxu0 }
 0x1a0   : > { %v2480_v62 = vadd.f32 %v2479_v61, %v2467_v57  ;;  %v2492_v0 = vpop.f32.mrf.mxu3  ;;  %v2468_v6 = vpop.f32.mrf.mxu1  ;;  %v7737_v57 = vor.u32 %v8803_v59, %v7736_v58  ;;  %v7864_v61 = vld [vmem:[#allocation13 + $0x380] sm:$0xf]  ;;  %v8727_v58 = vld [vmem:[#allocation13 + $0x2c] sm:$0xf0] }
 0x1a1   : > { %v7480_v6 = vld [vmem:[#allocation13 + $0x80] sm:$0xf]  ;;  %v7433_v60 = vor.u32 %v8727_v58, %v7432_v56  ;;  %v7642_v56 = vld [vmem:[#allocation13 + $0x1d0] sm:$0xf0]  ;;  %v8805_v58 = vld [vmem:[#allocation13 + $0x2a4] sm:$0xf] }
 0x1a2   : > { %v9944_v5 = vadd.f32 %v2492_v0, %v2480_v62  ;;  %v9573_v62 = vmov 1983009808   ;;  %3397 = vmatpush.bf16.msra.mxu2 %v7737_v57  ;;  %v7560_v59 = vld [vmem:[#allocation13 + $0x120] sm:$0xf]  ;;  %v8787_v57 = vld [vmem:[#allocation13 + $0x20c] sm:$0xf0] }
 0x1a3   : > { %v3598_v0 = vunpack.c.l.s4 %v9573_v62 }
 0x1a4   : > { %v3841_v2 = vrot.slane %v9944_v5, 4  ;;  %v9949_v7 = vsel %vm3593_vm0, %v9944_v5, %v3843_v26  ;;  %v8835_v26 = vld [vmem:[#allocation13 + $0x38c] sm:$0xf0] }
 0x1a5   : > { %v7865_v1 = vor.u32 %v8835_v26, %v7864_v61  ;;  %v9963_v25 = vunpack.c.0.s8 %v3598_v0  ;;  %v8813_v0 = vld [vmem:[#allocation13 + $0x2e4] sm:$0xf] }
 0x1a6   : > { %v9953_v3 = vsel %vm3593_vm0, %v3841_v2, %v9941_v54  ;;  %v8739_v2 = vld [vmem:[#allocation13 + $0x8c] sm:$0xf0]  ;;  %3398 = vmatpush.bf16.msra.mxu2 %v7721_v21 }
 0x1a7   : > { %v2481_v4 = vpop.f32.mrf.mxu2  ;;  %3410 = vmatpush.bf16.msra.mxu3 %v7865_v1  ;;  %v9967_v42 = vperm.slane %v9909_v19, %v9963_v25  ;;  %v9971_v18 = vperm.slane %v9905_v10, %v9963_v25  ;;  %v8823_v10 = vld [vmem:[#allocation13 + $0x32c] sm:$0xf0]  ;;  %v7786_v1 = vld [vmem:[#allocation13 + $0x2f0] sm:$0xf0]  ;;  %v9980_v15 = vperm.slane %v9932_v17, %v9963_v25  ;;  %v7533_v17 = vor.u32 %v8749_v31, %v7530_v33  ;;  %v8833_v31 = vld [vmem:[#allocation13 + $0x384] sm:$0xf] }
 0x1a8   : > { %v2494_v8 = vpop.f32.mrf.mxu3  ;;  %v7608_v4 = vld [vmem:[#allocation13 + $0x180] sm:$0xf]  ;;  %v642_v33 = vld [vmem:[%s9829_s5 + $0x10] sm:$0xff] }
 0x1a9   : > { %v7481_v8 = vor.u32 %v8739_v2, %v7480_v6  ;;  %v7609_v16 = vor.u32 %v8771_v12, %v7608_v4  ;;  %v3643_v51 = vrot.slane %v9967_v42, 4  ;;  %v3655_v52 = vrot.slane %v9971_v18, 4  ;;  %v7800_v6 = vld [vmem:[#allocation13 + $0x300] sm:$0xf]  ;;  %v8845_v12 = vld [vmem:[#allocation13 + $0x3e4] sm:$0xf] }
 0x1aa   : > { %v7789_v4 = vor.u32 %v8813_v0, %v7786_v1  ;;  %v7917_v21 = vor.u32 %v8845_v12, %v7914_v13  ;;  %v3679_v45 = vrot.slane %v9980_v15, 4  ;;  %v7882_v1 = vld [vmem:[#allocation13 + $0x3b0] sm:$0xf0]  ;;  %v8773_v13 = vld [vmem:[#allocation13 + $0x1a4] sm:$0xf] }
 0x1ab   : > { %3371 = vmatpush.bf16.msra.mxu0 %v7481_v8  ;;  %3384 = vmatpush.bf16.msra.mxu1 %v7609_v16  ;;  %v8819_v8 = vld [vmem:[#allocation13 + $0x30c] sm:$0xf0] }
 0x1ac   : > { %3411 = vmatpush.bf16.msra.mxu3 %v7849_v27  ;;  %v7801_v16 = vor.u32 %v8819_v8, %v7800_v6  ;;  %v8741_v6 = vld [vmem:[#allocation13 + $0xa4] sm:$0xf] }
 0x1af   : > { %3372 = vmatpush.bf16.msra.mxu0 %v7465_v34  ;;  %3385 = vmatpush.bf16.msra.mxu1 %v7593_v38  ;;  %v7658_v38 = vld [vmem:[#allocation13 + $0x1f0] sm:$0xf0] }
 0x1b3   : > { %3373 = vmatpush.bf16.msra.mxu0 %v7449_v29  ;;  %3386 = vmatpush.bf16.msra.mxu1 %v7577_v48  ;;  %v7898_v29 = vld [vmem:[#allocation13 + $0x3d0] sm:$0xf0] }
 0x1b4   : > { %v7901_v48 = vor.u32 %v8841_v14, %v7898_v29  ;;  %v7610_v14 = vld [vmem:[#allocation13 + $0x190] sm:$0xf0] }
 0x1b5   : > { %v643_v29 = vld [vmem:[%s9829_s5 + $0x18] sm:$0xff] }
 0x1b7   : > { %v9955_v9 = vpop.f32.mrf.mxu0  ;;  %3374 = vmatpush.bf16.msra.mxu0 %v7433_v60 }
 0x1b8   : > { %v9957_v11 = vpop.f32.mrf.mxu1 }
 0x1b9   : > { %v2519_v19 = vadd.f32 %v9957_v11, %v9955_v9  ;;  %v8759_v9 = vld [vmem:[#allocation13 + $0x12c] sm:$0xf0]  ;;  %v7672_v11 = vld [vmem:[#allocation13 + $0x200] sm:$0xf] }
 0x1ba   : > { %v7561_v26 = vor.u32 %v8759_v9, %v7560_v59  ;;  %v7673_v62 = vor.u32 %v8787_v57, %v7672_v11  ;;  %v7754_v59 = vld [vmem:[#allocation13 + $0x2b0] sm:$0xf0]  ;;  %v8837_v57 = vld [vmem:[#allocation13 + $0x3a4] sm:$0xf] }
 0x1bb   : > { %v7757_v0 = vor.u32 %v8805_v58, %v7754_v59  ;;  %v7885_v8 = vor.u32 %v8837_v57, %v7882_v1  ;;  %v7850_v58 = vld [vmem:[#allocation13 + $0x370] sm:$0xf0]  ;;  %v8733_v59 = vld [vmem:[#allocation13 + $0x64] sm:$0xf] }
 0x1bc   : > { %3387 = vmatpush.bf16.msra.mxu1 %v7561_v26  ;;  %v8765_v1 = vld [vmem:[#allocation13 + $0x164] sm:$0xf] }
 0x1bf   : > { %v9959_v23 = vpop.f32.mrf.mxu2  ;;  %v2507_v39 = vpop.f32.mrf.mxu0 }
 0x1c0   : > { %v9961_v28 = vpop.f32.mrf.mxu3  ;;  %v2520_v41 = vpop.f32.mrf.mxu1  ;;  %v7705_v39 = vor.u32 %v8795_v37, %v7704_v36  ;;  %v2532_v61 = vadd.f32 %v9959_v23, %v2519_v19  ;;  %v8723_v23 = vld [vmem:[#allocation13 + $0xc] sm:$0xf0]  ;;  %v7545_v36 = vor.u32 %v8755_v30, %v7544_v24  ;;  %v8781_v37 = vld [vmem:[#allocation13 + $0x1e4] sm:$0xf]  ;;  %v7738_v30 = vld [vmem:[#allocation13 + $0x290] sm:$0xf0] }
 0x1c1   : > { %v8827_v41 = vld [vmem:[#allocation13 + $0x34c] sm:$0xf0]  ;;  %v7417_v27 = vor.u32 %v8723_v23, %v7416_v22  ;;  %v7661_v44 = vor.u32 %v8781_v37, %v7658_v38  ;;  %v9574_v23 = vmov 1934713408   ;;  %v8737_v37 = vld [vmem:[#allocation13 + $0x84] sm:$0xf] }
 0x1c2   : > { %v7833_v43 = vor.u32 %v8827_v41, %v7832_v40  ;;  %3399 = vmatpush.bf16.msra.mxu2 %v7705_v39  ;;  %v9983_v34 = vadd.f32 %v9961_v28, %v2532_v61  ;;  %v8809_v39 = vld [vmem:[#allocation13 + $0x2c4] sm:$0xf]  ;;  %v9987_v40 = vperm.slane %v9936_v32, %v9963_v25  ;;  %v7770_v28 = vld [vmem:[#allocation13 + $0x2d0] sm:$0xf0]  ;;  %3388 = vmatpush.bf16.msra.mxu1 %v7545_v36  ;;  %v3646_v24 = vunpack.c.l.s4 %v9574_v23 }
 0x1c3   : > { %3375 = vmatpush.bf16.msra.mxu0 %v7417_v27  ;;  %v7773_v32 = vor.u32 %v8809_v39, %v7770_v28  ;;  %v7482_v38 = vld [vmem:[#allocation13 + $0x90] sm:$0xf0]  ;;  %v10008_v39 = vpack.c.bf16 %v642_v33, %v642_v33  ;;  %v8769_v28 = vld [vmem:[#allocation13 + $0x184] sm:$0xf] }
 0x1c4   : > { %3412 = vmatpush.bf16.msra.mxu3 %v7833_v43  ;;  %v3867_v46 = vrot.slane %v9983_v34, 4  ;;  %v3667_v60 = vrot.slane %v9987_v40, 4 }
 0x1c6   : > { %3400 = vmatpush.bf16.msra.mxu2 %v7689_v49  ;;  %3433 = vmatpush.bf16.msrb.mxu1 %v7661_v44  ;;  %v7485_v44 = vor.u32 %v8737_v37, %v7482_v38 }
 0x1c7   : > { %v2533_v50 = vpop.f32.mrf.mxu2  ;;  %3420 = vmatpush.bf16.msrb.mxu0 %v7533_v17  ;;  %v7866_v17 = vld [vmem:[#allocation13 + $0x390] sm:$0xf0] }
 0x1c8   : > { %v2546_v63 = vpop.f32.mrf.mxu3  ;;  %v7816_v50 = vld [vmem:[#allocation13 + $0x320] sm:$0xf] }
 0x1c9   : > { %v7817_v63 = vor.u32 %v8823_v10, %v7816_v50  ;;  %v8745_v50 = vld [vmem:[#allocation13 + $0xc4] sm:$0xf]  ;;  %v7514_v10 = vld [vmem:[#allocation13 + $0xd0] sm:$0xf0] }
 0x1ca   : > { %3401 = vmatpush.bf16.msra.mxu2 %v7673_v62 }
 0x1cb   : > { %3413 = vmatpush.bf16.msra.mxu3 %v7817_v63 }
 0x1cd   : > { %3402 = vmatmul.bf16.vlgmr.msra.gmra.mxu2 %v10008_v39 }
 0x1ce   : > { %3446 = vmatpush.bf16.msrb.mxu2 %v7789_v4 }
 0x1cf   : > { %3414 = vmatpush.bf16.msra.mxu3 %v7801_v16  ;;  %v7626_v16 = vld [vmem:[#allocation13 + $0x1b0] sm:$0xf0] }
 0x1d0   : > { %v7629_v27 = vor.u32 %v8773_v13, %v7626_v16  ;;  %v7706_v13 = vld [vmem:[#allocation13 + $0x250] sm:$0xf0]  ;;  %v8825_v16 = vld [vmem:[#allocation13 + $0x344] sm:$0xf] }
 0x1d2   : > { %3447 = vmatpush.bf16.msrb.mxu2 %v7773_v32  ;;  %v8797_v32 = vld [vmem:[#allocation13 + $0x264] sm:$0xf] }
 0x1d3   : > { %3459 = vmatpush.bf16.msrb.mxu3 %v7917_v21  ;;  %v8801_v21 = vld [vmem:[#allocation13 + $0x284] sm:$0xf] }
 0x1d4   : > { %v7741_v36 = vor.u32 %v8801_v21, %v7738_v30 }
 0x1d6   : > { %3448 = vmatpush.bf16.msrb.mxu2 %v7757_v0 }
 0x1d7   : > { %v2557_v53 = vpop.f32.mrf.mxu0  ;;  %3460 = vmatpush.bf16.msrb.mxu3 %v7901_v48  ;;  %v7722_v48 = vld [vmem:[#allocation13 + $0x270] sm:$0xf0] }
 0x1d8   : > { %v2570_v55 = vpop.f32.mrf.mxu1  ;;  %v9991_v19 = vpop.permute.xlu1 %9121 }
 0x1d9   : > { %v2571_v2 = vadd.f32 %v2570_v55, %v2557_v53  ;;  %v8777_v53 = vld [vmem:[#allocation13 + $0x1c4] sm:$0xf]  ;;  %v9124_v63 = vunpack.i.h.bf16 %v9991_v19  ;;  %v7517_v55 = vor.u32 %v8745_v50, %v7514_v10  ;;  %v9123_v61 = vunpack.i.l.bf16 %v9991_v19 }
 0x1da   : > { %v7645_v62 = vor.u32 %v8777_v53, %v7642_v56  ;;  %v10014_v50 = vpack.c.bf16 %v643_v29, %v643_v29  ;;  %v10016_v10 = vunpack.c.0.s8 %v3646_v24  ;;  %v9115_v53 = vpack.i.bf16 %v9941_v54, %v9983_v34  ;;  %3449 = vmatpush.bf16.msrb.mxu2 %v7741_v36  ;;  %v7834_v24 = vld [vmem:[#allocation13 + $0x350] sm:$0xf0] }
 0x1db   : > { %3421 = vmatpush.bf16.msrb.mxu0 %v7517_v55  ;;  %v3605_v22 = vrot.slane %v9124_v63, 4  ;;  %3461 = vmatpush.bf16.msrb.mxu3 %v7885_v8  ;;  %v7613_v55 = vor.u32 %v8769_v28, %v7610_v14  ;;  %v7725_v56 = vor.u32 %v8797_v32, %v7722_v48 }
 0x1dc   : > { %3434 = vmatpush.bf16.msrb.mxu1 %v7645_v62  ;;  %3415 = vmatmul.bf16.vlgmr.msra.gmra.mxu3 %v10014_v50 }
 0x1de   : > { %3450 = vmatpush.bf16.msrb.mxu2 %v7725_v56 }
 0x1df   : > { %v2583_v35 = vpop.f32.mrf.mxu2  ;;  %v2559_v20 = vpop.f32.mrf.mxu0 }
 0x1e0   : > { %v2584_v41 = vadd.f32 %v2583_v35, %v2571_v2  ;;  %v2596_v43 = vpop.f32.mrf.mxu3  ;;  %v2572_v47 = vpop.f32.mrf.mxu1  ;;  %v7498_v2 = vld [vmem:[#allocation13 + $0xb0] sm:$0xf0]  ;;  %v7869_v20 = vor.u32 %v8833_v31, %v7866_v17  ;;  %3435 = vmatpush.bf16.msrb.mxu1 %v7629_v27 }
 0x1e1   : > { %v7501_v12 = vor.u32 %v8741_v6, %v7498_v2  ;;  %v7594_v6 = vld [vmem:[#allocation13 + $0x170] sm:$0xf0] }
 0x1e2   : > { %v2597_v49 = vadd.f32 %v2596_v43, %v2584_v41  ;;  %v3629_v41 = vrot.slane %v9123_v61, 4  ;;  %v9127_v43 = vpop.permute.xlu1 %9126  ;;  %3462 = vmatpush.bf16.msrb.mxu3 %v7869_v20 }
 0x1e3   : > { %3422 = vmatpush.bf16.msrb.mxu0 %v7501_v12  ;;  %v9128_v47 = vunpack.i.l.bf16 %v9127_v43  ;;  %v8793_v12 = vld [vmem:[#allocation13 + $0x244] sm:$0xf] }
 0x1e4   : > { %v3865_v9 = vrot.slane %v2597_v49, 4  ;;  %v9996_v11 = vsel %vm3593_vm0, %v2597_v49, %v3867_v46  ;;  %v9110_v26 = vpack.i.bf16 %v9944_v5, %v2597_v49  ;;  %v9129_v46 = vunpack.i.h.bf16 %v9127_v43  ;;  %v8829_v49 = vld [vmem:[#allocation13 + $0x364] sm:$0xf]  ;;  %3436 = vmatpush.bf16.msrb.mxu1 %v7613_v55 }
 0x1e5   : > { %v3630_v62 = vsel %vm3593_vm0, %v3629_v41, %v9128_v47  ;;  %v3631_v0 = vrot.slane %v9128_v47, 4  ;;  %v7709_v23 = vor.u32 %v8793_v12, %v7706_v13 }
 0x1e6   : > { %v10002_v4 = vsel %vm3593_vm0, %v3865_v9, %v9983_v34  ;;  %9111 = vrot.lane.b32.xlu0 %v9110_v26, %s9572_s23  ;;  %v7466_v9 = vld [vmem:[#allocation13 + $0x70] sm:$0xf0]  ;;  %v3607_v57 = vrot.slane %v9129_v46, 4  ;;  %v3606_v26 = vsel %vm3593_vm0, %v3605_v22, %v9129_v46  ;;  %v3636_v54 = vperm.slane %v3630_v62, %v9963_v25 }
 0x1e7   : > { %v2585_v5 = vpop.f32.mrf.mxu2  ;;  %v3612_v2 = vperm.slane %v3606_v26, %v9963_v25  ;;  %3423 = vmatpush.bf16.msrb.mxu0 %v7485_v44  ;;  %v7853_v34 = vor.u32 %v8829_v49, %v7850_v58  ;;  %v7469_v8 = vor.u32 %v8733_v59, %v7466_v9  ;;  %v3632_v22 = vsel %vm3593_vm0, %v9123_v61, %v3631_v0 }
 0x1e8   : > { %v2598_v35 = vpop.f32.mrf.mxu3  ;;  %v3608_v21 = vsel %vm3593_vm0, %v9124_v63, %v3607_v57  ;;  %v7597_v5 = vor.u32 %v8765_v1, %v7594_v6  ;;  %v3640_v30 = vperm.slane %v3632_v22, %v9963_v25  ;;  %v3665_v63 = vrot.slane %v3636_v54, 4  ;;  %3451 = vmatpush.bf16.msrb.mxu2 %v7709_v23  ;;  %v7450_v22 = vld [vmem:[#allocation13 + $0x50] sm:$0xf0] }
 0x1e9   : > { %v3616_v27 = vperm.slane %v3608_v21, %v9963_v25  ;;  %v3641_v31 = vrot.slane %v3612_v2, 4  ;;  %v3644_v33 = vsel %vm3593_vm0, %v3612_v2, %v3643_v51  ;;  %v3668_v61 = vsel %vm3593_vm0, %v3636_v54, %v3667_v60  ;;  %3463 = vmatpush.bf16.msrb.mxu3 %v7853_v34  ;;  %v8729_v21 = vld [vmem:[#allocation13 + $0x44] sm:$0xf] }
 0x1ea   : > { %v3652_v19 = vperm.slane %v3644_v33, %v10016_v10  ;;  %v7837_v35 = vor.u32 %v8825_v16, %v7834_v24  ;;  %v3676_v37 = vperm.slane %v3668_v61, %v10016_v10  ;;  %v3666_v60 = vsel %vm3593_vm0, %v3665_v63, %v9987_v40  ;;  %3437 = vmatpush.bf16.msrb.mxu1 %v7597_v5  ;;  %v7690_v33 = vld [vmem:[#allocation13 + $0x230] sm:$0xf0]  ;;  %v8821_v61 = vld [vmem:[#allocation13 + $0x324] sm:$0xf] }
 0x1eb   : > { %v3642_v36 = vsel %vm3593_vm0, %v3641_v31, %v9967_v42  ;;  %v3653_v17 = vrot.slane %v3616_v27, 4  ;;  %v3656_v51 = vsel %vm3593_vm0, %v3616_v27, %v3655_v52  ;;  %3424 = vmatpush.bf16.msrb.mxu0 %v7469_v8  ;;  %v3677_v43 = vrot.slane %v3640_v30, 4  ;;  %v8761_v27 = vld [vmem:[#allocation13 + $0x144] sm:$0xf] }
 0x1ec   : > { %v3648_v38 = vperm.slane %v3642_v36, %v10016_v10  ;;  %v3664_v41 = vperm.slane %v3656_v51, %v10016_v10  ;;  %v3672_v42 = vperm.slane %v3666_v60, %v10016_v10  ;;  %v3680_v52 = vsel %vm3593_vm0, %v3640_v30, %v3679_v45  ;;  %v7578_v30 = vld [vmem:[#allocation13 + $0x150] sm:$0xf0]  ;;  %v8789_v31 = vld [vmem:[#allocation13 + $0x224] sm:$0xf] }
 0x1ed   : > { %v3654_v20 = vsel %vm3593_vm0, %v3653_v17, %v9971_v18  ;;  %v3693_v44 = vrot.slane %v3676_v37, 4  ;;  %v3678_v14 = vsel %vm3593_vm0, %v3677_v43, %v9980_v15  ;;  %v3688_v29 = vperm.slane %v3680_v52, %v10016_v10  ;;  %3464 = vmatpush.bf16.msrb.mxu3 %v7837_v35  ;;  %v7818_v35 = vld [vmem:[#allocation13 + $0x330] sm:$0xf0]  ;;  %v8725_v17 = vld [vmem:[#allocation13 + $0x24] sm:$0xf] }
 0x1ee   : > { %9116 = vrot.lane.b32.xlu0 %v9115_v53, %s9572_s23  ;;  %v3660_v28 = vperm.slane %v3654_v20, %v10016_v10  ;;  %v3691_v40 = vrot.slane %v3648_v38, 4  ;;  %v3684_v18 = vperm.slane %v3678_v14, %v10016_v10  ;;  %v3689_v46 = vrot.slane %v3672_v42, 4  ;;  %v7434_v51 = vld [vmem:[#allocation13 + $0x30] sm:$0xf0]  ;;  %v641_v43 = vld [vmem:[%s9829_s5 + $0x8] sm:$0xff]  ;;  %v640_v14 = vld [vmem:[%s9829_s5] sm:$0xff] }
 0x1ef   : > { %v3694_v47 = vsel %vm3593_vm0, %v3693_v44, %v3652_v19  ;;  %v3695_v32 = vrot.slane %v3652_v19, 4  ;;  %v3701_v49 = vrot.slane %v3688_v29, 4  ;;  %v3703_v53 = vrot.slane %v3664_v41, 4  ;;  %v7562_v60 = vld [vmem:[#allocation13 + $0x130] sm:$0xf0] }
 0x1f0   : > { %v3692_v45 = vsel %vm3593_vm0, %v3672_v42, %v3691_v40  ;;  %v3699_v48 = vrot.slane %v3660_v28, 4  ;;  %v3690_v55 = vsel %vm3593_vm0, %v3689_v46, %v3648_v38  ;;  %v3697_v56 = vrot.slane %v3684_v18, 4  ;;  %v8785_v52 = vld [vmem:[#allocation13 + $0x204] sm:$0xf]  ;;  %v7674_v44 = vld [vmem:[#allocation13 + $0x210] sm:$0xf0] }
 0x1f1   : > { %v3696_v15 = vsel %vm3593_vm0, %v3676_v37, %v3695_v32  ;;  %v3705_v58 = vrot.slane %v3694_v47, 4  ;;  %v3702_v9 = vsel %vm3593_vm0, %v3701_v49, %v3664_v41  ;;  %v3704_v57 = vsel %vm3593_vm0, %v3688_v29, %v3703_v53  ;;  %v8757_v41 = vld [vmem:[#allocation13 + $0x124] sm:$0xf] }
 0x1f2   : > { %v3700_v59 = vsel %vm3593_vm0, %v3684_v18, %v3699_v48  ;;  %v3707_v26 = vrot.slane %v3690_v55, 4  ;;  %v3698_v62 = vsel %vm3593_vm0, %v3697_v56, %v3660_v28  ;;  %v3717_v1 = vrot.slane %v3696_v15, 4  ;;  %v7792_v28 = vld [vmem:[#allocation13 + $0x2e8] sm:$0xf]  ;;  %v8817_v32 = vld [vmem:[#allocation13 + $0x304] sm:$0xf] }
 0x1f3   : > { %v3706_v0 = vsel %vm3593_vm0, %v3705_v58, %v3690_v55  ;;  %v3719_v6 = vrot.slane %v3692_v45, 4  ;;  %v3729_v54 = vrot.slane %v3702_v9, 4  ;;  %v3731_v34 = vrot.slane %v3698_v62, 4  ;;  %v7920_v55 = vld [vmem:[#allocation13 + $0x3e8] sm:$0xf] }
 0x1f4   : > { %v3708_v2 = vsel %vm3593_vm0, %v3694_v47, %v3707_v26  ;;  %v3718_v12 = vsel %vm3593_vm0, %v3717_v1, %v3692_v45  ;;  %v3741_v16 = vrot.slane %v3704_v57, 4  ;;  %v3743_v63 = vrot.slane %v3700_v59, 4  ;;  %v8816_v47 = vld [vmem:[#allocation13 + $0x2f4] sm:$0xf0]  ;;  %v7802_v45 = vld [vmem:[#allocation13 + $0x310] sm:$0xf0] }
 0x1f5   : > { %v3716_v8 = vperm.slane %v3708_v2, %v9963_v25  ;;  %v3720_v13 = vsel %vm3593_vm0, %v3696_v15, %v3719_v6  ;;  %v3730_v23 = vsel %vm3593_vm0, %v3729_v54, %v3698_v62  ;;  %v3732_v24 = vsel %vm3593_vm0, %v3702_v9, %v3731_v34  ;;  %v8848_v15 = vld [vmem:[#allocation13 + $0x3f4] sm:$0xf0]  ;;  %v8721_v56 = vld [vmem:[#allocation13 + $0x4] sm:$0xf]  ;;  %v7546_v62 = vld [vmem:[#allocation13 + $0x110] sm:$0xf0] }
 0x1f6   : > { %v3728_v5 = vperm.slane %v3720_v13, %v9963_v25  ;;  %v3742_v19 = vsel %vm3593_vm0, %v3741_v16, %v3700_v59  ;;  %v3744_v37 = vsel %vm3593_vm0, %v3704_v57, %v3743_v63  ;;  %v7453_v42 = vor.u32 %v8729_v21, %v7450_v22  ;;  %v7418_v57 = vld [vmem:[#allocation13 + $0x10] sm:$0xf0]  ;;  %v8753_v26 = vld [vmem:[#allocation13 + $0x104] sm:$0xf]  ;;  %v7536_v54 = vld [vmem:[#allocation13 + $0xe8] sm:$0xf] }
 0x1f7   : > { %v3767_v38 = vrot.slane %v3716_v8, 4  ;;  %v7581_v40 = vor.u32 %v8761_v27, %v7578_v30  ;;  %v7693_v18 = vor.u32 %v8789_v31, %v7690_v33  ;;  %v7821_v46 = vor.u32 %v8821_v61, %v7818_v35  ;;  %v8752_v34 = vld [vmem:[#allocation13 + $0xf4] sm:$0xf0]  ;;  %v7776_v21 = vld [vmem:[#allocation13 + $0x2c8] sm:$0xf] }
 0x1f8   : > { %v3765_v36 = vrot.slane %v3728_v5, 4  ;;  %v10089_v48 = vperm.slane %v3706_v0, %v9963_v25  ;;  %v10092_v49 = vperm.slane %v3718_v12, %v9963_v25  ;;  %3425 = vmatpush.bf16.msrb.mxu0 %v7453_v42  ;;  %v7437_v53 = vor.u32 %v8725_v17, %v7434_v51  ;;  %v8784_v16 = vld [vmem:[#allocation13 + $0x1f4] sm:$0xf0]  ;;  %v7904_v30 = vld [vmem:[#allocation13 + $0x3c8] sm:$0xf] }
 0x1f9   : > { %v10086_v29 = vsel %vm3593_vm0, %v3728_v5, %v3767_v38  ;;  %v10095_v58 = vperm.slane %v3742_v19, %v9963_v25  ;;  %3438 = vmatpush.bf16.msrb.mxu1 %v7581_v40  ;;  %3452 = vmatpush.bf16.msrb.mxu2 %v7693_v18  ;;  %v7565_v59 = vor.u32 %v8757_v41, %v7562_v60  ;;  %v8812_v22 = vld [vmem:[#allocation13 + $0x2d4] sm:$0xf0]  ;;  %v7520_v35 = vld [vmem:[#allocation13 + $0xc8] sm:$0xf] }
 0x1fa   : > { %v10082_v20 = vsel %vm3593_vm0, %v3765_v36, %v3716_v8  ;;  %v7677_v9 = vor.u32 %v8785_v52, %v7674_v44  ;;  %v10098_v0 = vperm.slane %v3730_v23, %v9963_v25  ;;  %3465 = vmatpush.bf16.msrb.mxu3 %v7821_v46  ;;  %v7793_v1 = vor.u32 %v8816_v47, %v7792_v28  ;;  %v7664_v8 = vld [vmem:[#allocation13 + $0x1e8] sm:$0xf]  ;;  %v8844_v31 = vld [vmem:[#allocation13 + $0x3d4] sm:$0xf0] }
 0x1fb   : > { %v7805_v6 = vor.u32 %v8817_v32, %v7802_v45  ;;  %v10100_v2 = vpack.c.bf16 %v641_v43, %v641_v43  ;;  %v7921_v12 = vor.u32 %v8848_v15, %v7920_v55  ;;  %v10102_v13 = vpack.c.bf16 %v640_v14, %v640_v14  ;;  %v8748_v38 = vld [vmem:[#allocation13 + $0xd4] sm:$0xf0]  ;;  %v7648_v41 = vld [vmem:[#allocation13 + $0x1c8] sm:$0xf] }
 0x1fc   : > { %v10105_v5 = vperm.slane %v3732_v24, %v9963_v25  ;;  %v3753_v23 = vrot.slane %v10092_v49, 4  ;;  %3426 = vmatpush.bf16.msrb.mxu0 %v7437_v53  ;;  %v7421_v27 = vor.u32 %v8721_v56, %v7418_v57  ;;  %v10110_v33 = vperm.slane %v3744_v37, %v9963_v25  ;;  %v8780_v60 = vld [vmem:[#allocation13 + $0x1d4] sm:$0xf0]  ;;  %v7760_v43 = vld [vmem:[#allocation13 + $0x2a8] sm:$0xf] }
 0x1fd   : > { %3389 = vmatmul.bf16.vlgmr.msra.gmra.mxu1 %v10100_v2  ;;  %v3777_v19 = vrot.slane %v10095_v58, 4  ;;  %3453 = vmatpush.bf16.msrb.mxu2 %v7677_v9  ;;  %v7549_v63 = vor.u32 %v8753_v26, %v7546_v62  ;;  %v7537_v61 = vor.u32 %v8752_v34, %v7536_v54  ;;  %v3755_v24 = vrot.slane %v10089_v48, 4  ;;  %v8808_v42 = vld [vmem:[#allocation13 + $0x2b4] sm:$0xf0]  ;;  %v7888_v44 = vld [vmem:[#allocation13 + $0x3a8] sm:$0xf] }
 0x1fe   : > { %3439 = vmatpush.bf16.msrb.mxu1 %v7565_v59  ;;  %v3779_v36 = vrot.slane %v10098_v0, 4  ;;  %3466 = vmatpush.bf16.msrb.mxu3 %v7805_v6  ;;  %v7665_v17 = vor.u32 %v8784_v16, %v7664_v8  ;;  %v7777_v51 = vor.u32 %v8812_v22, %v7776_v21  ;;  %v7905_v37 = vor.u32 %v8844_v31, %v7904_v30  ;;  %v8840_v28 = vld [vmem:[#allocation13 + $0x3b4] sm:$0xf0]  ;;  %v7504_v45 = vld [vmem:[#allocation13 + $0xa8] sm:$0xf] }
 0x1ff   : > { %3376 = vmatmul.bf16.vlgmr.msra.gmra.mxu0 %v10102_v13  ;;  %v3791_v52 = vrot.slane %v10105_v5, 4  ;;  %v3789_v14 = vrot.slane %v10110_v33, 4  ;;  %v7521_v40 = vor.u32 %v8748_v38, %v7520_v35  ;;  %v10121_v18 = vsel %vm3593_vm0, %v3753_v23, %v10089_v48  ;;  %v8744_v53 = vld [vmem:[#allocation13 + $0xb4] sm:$0xf0]  ;;  %v7632_v55 = vld [vmem:[#allocation13 + $0x1a8] sm:$0xf] }
 0x200   : > { %3427 = vmatpush.bf16.msrb.mxu0 %v7421_v27  ;;  %3454 = vmatmul.bf16.vlgmr.msrb.gmra.mxu2 %v10008_v39  ;;  %v10125_v46 = vsel %vm3593_vm0, %v3777_v19, %v10098_v0  ;;  %v7649_v47 = vor.u32 %v8780_v60, %v7648_v41  ;;  %v7761_v32 = vor.u32 %v8808_v42, %v7760_v43  ;;  %v8776_v56 = vld [vmem:[#allocation13 + $0x1b4] sm:$0xf0]  ;;  %v7744_v59 = vld [vmem:[#allocation13 + $0x288] sm:$0xf] }
 0x201   : > { %3498 = vmatpush.bf16.msra.mxu2 %v7793_v1  ;;  %v7889_v15 = vor.u32 %v8840_v28, %v7888_v44  ;;  %v8804_v9 = vld [vmem:[#allocation13 + $0x294] sm:$0xf0]  ;;  %v10129_v48 = vsel %vm3593_vm0, %v10092_v49, %v3755_v24  ;;  %v10133_v57 = vsel %vm3593_vm0, %v10095_v58, %v3779_v36  ;;  %v7872_v26 = vld [vmem:[#allocation13 + $0x388] sm:$0xf]  ;;  %3467 = vmatmul.bf16.vlgmr.msrb.gmra.mxu3 %v10014_v50 }
 0x202   : > { %3511 = vmatpush.bf16.msra.mxu3 %v7921_v12  ;;  %3440 = vmatpush.bf16.msrb.mxu1 %v7549_v63  ;;  %v8836_v62 = vld [vmem:[#allocation13 + $0x394] sm:$0xf0]  ;;  %v7505_v0 = vor.u32 %v8744_v53, %v7504_v45  ;;  %v10138_v1 = vsel %vm3593_vm0, %v3789_v14, %v10105_v5  ;;  %v7633_v6 = vor.u32 %v8776_v56, %v7632_v55  ;;  %v7488_v49 = vld [vmem:[#allocation13 + $0x88] sm:$0xf] }
 0x203   : > { %v7745_v54 = vor.u32 %v8804_v9, %v7744_v59  ;;  %v8740_v34 = vld [vmem:[#allocation13 + $0x94] sm:$0xf0]  ;;  %v7616_v8 = vld [vmem:[#allocation13 + $0x188] sm:$0xf]  ;;  %v7873_v58 = vor.u32 %v8836_v62, %v7872_v26  ;;  %v10142_v22 = vsel %vm3593_vm0, %v10110_v33, %v3791_v52 }
 0x204   : > { %3472 = vmatpush.bf16.msra.mxu0 %v7537_v61  ;;  %v8772_v12 = vld [vmem:[#allocation13 + $0x194] sm:$0xf0]  ;;  %v7728_v16 = vld [vmem:[#allocation13 + $0x268] sm:$0xf]  ;;  %v7489_v5 = vor.u32 %v8740_v34, %v7488_v49 }
 0x205   : > { %3499 = vmatpush.bf16.msra.mxu2 %v7777_v51  ;;  %v8800_v21 = vld [vmem:[#allocation13 + $0x274] sm:$0xf0]  ;;  %v7856_v23 = vld [vmem:[#allocation13 + $0x368] sm:$0xf]  ;;  %v7617_v30 = vor.u32 %v8772_v12, %v7616_v8  ;;  %v8846_v8 = vld [vmem:[#allocation13 + $0x3ec] sm:$0xf] }
 0x206   : > { %3485 = vmatpush.bf16.msra.mxu1 %v7665_v17  ;;  %3512 = vmatpush.bf16.msra.mxu3 %v7905_v37  ;;  %v8832_v27 = vld [vmem:[#allocation13 + $0x374] sm:$0xf0]  ;;  %v7729_v31 = vor.u32 %v8800_v21, %v7728_v16  ;;  %v7472_v19 = vld [vmem:[#allocation13 + $0x68] sm:$0xf] }
 0x207   : > { %v8736_v63 = vld [vmem:[#allocation13 + $0x74] sm:$0xf0]  ;;  %v7600_v61 = vld [vmem:[#allocation13 + $0x168] sm:$0xf]  ;;  %v7857_v35 = vor.u32 %v8832_v27, %v7856_v23 }
 0x208   : > { %3473 = vmatpush.bf16.msra.mxu0 %v7521_v40  ;;  %v8768_v24 = vld [vmem:[#allocation13 + $0x174] sm:$0xf0]  ;;  %v7712_v36 = vld [vmem:[#allocation13 + $0x248] sm:$0xf]  ;;  %v7473_v38 = vor.u32 %v8736_v63, %v7472_v19  ;;  %v8750_v19 = vld [vmem:[#allocation13 + $0xec] sm:$0xf] }
 0x209   : > { %3500 = vmatpush.bf16.msra.mxu2 %v7761_v32  ;;  %v8796_v17 = vld [vmem:[#allocation13 + $0x254] sm:$0xf0]  ;;  %v7840_v33 = vld [vmem:[#allocation13 + $0x348] sm:$0xf]  ;;  %v7601_v41 = vor.u32 %v8768_v24, %v7600_v61  ;;  %v7538_v63 = vld [vmem:[#allocation13 + $0xf8] sm:$0xf0] }
 0x20a   : > { %3486 = vmatpush.bf16.msra.mxu1 %v7649_v47  ;;  %3513 = vmatpush.bf16.msra.mxu3 %v7889_v15  ;;  %v8828_v51 = vld [vmem:[#allocation13 + $0x354] sm:$0xf0]  ;;  %v7713_v37 = vor.u32 %v8796_v17, %v7712_v36  ;;  %v7456_v60 = vld [vmem:[#allocation13 + $0x48] sm:$0xf]  ;;  %v8782_v61 = vld [vmem:[#allocation13 + $0x1ec] sm:$0xf] }
 0x20b   : > { %v8732_v43 = vld [vmem:[#allocation13 + $0x54] sm:$0xf0]  ;;  %v7584_v42 = vld [vmem:[#allocation13 + $0x148] sm:$0xf]  ;;  %v7841_v52 = vor.u32 %v8828_v51, %v7840_v33  ;;  %v7666_v24 = vld [vmem:[#allocation13 + $0x1f8] sm:$0xf0]  ;;  %v3760_v33 = vperm.slane %v10121_v18, %v10016_v10  ;;  %v3784_v51 = vperm.slane %v10125_v46, %v10016_v10  ;;  %v7541_v46 = vor.u32 %v8750_v19, %v7538_v63 }
 0x20c   : > { %3474 = vmatpush.bf16.msra.mxu0 %v7505_v0  ;;  %v8764_v44 = vld [vmem:[#allocation13 + $0x154] sm:$0xf0]  ;;  %v7696_v28 = vld [vmem:[#allocation13 + $0x228] sm:$0xf]  ;;  %v7457_v32 = vor.u32 %v8732_v43, %v7456_v60  ;;  %v8814_v0 = vld [vmem:[#allocation13 + $0x2ec] sm:$0xf]  ;;  %v3788_v43 = vperm.slane %v10133_v57, %v10016_v10 }
 0x20d   : > { %3501 = vmatpush.bf16.msra.mxu2 %v7745_v54  ;;  %3441 = vmatmul.bf16.vlgmr.msrb.gmra.mxu1 %v10100_v2  ;;  %v8792_v14 = vld [vmem:[#allocation13 + $0x234] sm:$0xf0]  ;;  %v7824_v40 = vld [vmem:[#allocation13 + $0x328] sm:$0xf]  ;;  %v7585_v53 = vor.u32 %v8764_v44, %v7584_v42  ;;  %v8810_v36 = vld [vmem:[#allocation13 + $0x2cc] sm:$0xf]  ;;  %v3772_v42 = vperm.slane %v10082_v20, %v10016_v10  ;;  %v3800_v20 = vperm.slane %v10142_v22, %v10016_v10 }
 0x20e   : > { %3487 = vmatpush.bf16.msra.mxu1 %v7633_v6  ;;  %3514 = vmatpush.bf16.msra.mxu3 %v7873_v58  ;;  %v8824_v47 = vld [vmem:[#allocation13 + $0x334] sm:$0xf0]  ;;  %v7440_v45 = vld [vmem:[#allocation13 + $0x28] sm:$0xf]  ;;  %v7697_v55 = vor.u32 %v8792_v14, %v7696_v28  ;;  %v7794_v6 = vld [vmem:[#allocation13 + $0x2f8] sm:$0xf0]  ;;  %v7669_v14 = vor.u32 %v8782_v61, %v7666_v24 }
 0x20f   : > { %3428 = vmatmul.bf16.vlgmr.msrb.gmra.mxu0 %v10102_v13  ;;  %v8728_v15 = vld [vmem:[#allocation13 + $0x34] sm:$0xf0]  ;;  %v7568_v56 = vld [vmem:[#allocation13 + $0x128] sm:$0xf]  ;;  %v7825_v9 = vor.u32 %v8824_v47, %v7824_v40  ;;  %v7922_v58 = vld [vmem:[#allocation13 + $0x3f8] sm:$0xf0] }
 0x210   : > { %3475 = vmatpush.bf16.msra.mxu0 %v7489_v5  ;;  %v8760_v59 = vld [vmem:[#allocation13 + $0x134] sm:$0xf0]  ;;  %v7680_v26 = vld [vmem:[#allocation13 + $0x208] sm:$0xf]  ;;  %v7441_v34 = vor.u32 %v8728_v15, %v7440_v45  ;;  %v7778_v17 = vld [vmem:[#allocation13 + $0x2d8] sm:$0xf0] }
 0x211   : > { %3502 = vmatpush.bf16.msra.mxu2 %v7729_v31  ;;  %v8788_v62 = vld [vmem:[#allocation13 + $0x214] sm:$0xf0]  ;;  %v7808_v54 = vld [vmem:[#allocation13 + $0x308] sm:$0xf]  ;;  %v7569_v16 = vor.u32 %v8760_v59, %v7568_v56  ;;  %v7906_v60 = vld [vmem:[#allocation13 + $0x3d8] sm:$0xf0]  ;;  %v7781_v40 = vor.u32 %v8810_v36, %v7778_v17 }
 0x212   : > { %3488 = vmatpush.bf16.msra.mxu1 %v7617_v30  ;;  %3515 = vmatpush.bf16.msra.mxu3 %v7857_v35  ;;  %v8820_v49 = vld [vmem:[#allocation13 + $0x314] sm:$0xf0]  ;;  %v7424_v12 = vld [vmem:[#allocation13 + $0x8] sm:$0xf]  ;;  %v7681_v21 = vor.u32 %v8788_v62, %v7680_v26  ;;  %v7797_v30 = vor.u32 %v8814_v0, %v7794_v6  ;;  %v7925_v35 = vor.u32 %v8846_v8, %v7922_v58  ;;  %v8746_v44 = vld [vmem:[#allocation13 + $0xcc] sm:$0xf] }
 0x213   : > { %v8724_v23 = vld [vmem:[#allocation13 + $0x14] sm:$0xf0]  ;;  %v7552_v27 = vld [vmem:[#allocation13 + $0x108] sm:$0xf]  ;;  %v7809_v31 = vor.u32 %v8820_v49, %v7808_v54  ;;  %v7522_v28 = vld [vmem:[#allocation13 + $0xd8] sm:$0xf0] }
 0x214   : > { %3476 = vmatpush.bf16.msra.mxu0 %v7473_v38  ;;  %v8756_v5 = vld [vmem:[#allocation13 + $0x114] sm:$0xf0]  ;;  %v3764_v38 = vperm.slane %v10129_v48, %v10016_v10  ;;  %v3796_v48 = vperm.slane %v10138_v1, %v10016_v10  ;;  %v8778_v57 = vld [vmem:[#allocation13 + $0x1cc] sm:$0xf]  ;;  %v7650_v47 = vld [vmem:[#allocation13 + $0x1d8] sm:$0xf0]  ;;  %v7525_v15 = vor.u32 %v8746_v44, %v7522_v28 }
 0x215   : > { %3503 = vmatpush.bf16.msra.mxu2 %v7713_v37  ;;  %v8842_v37 = vld [vmem:[#allocation13 + $0x3cc] sm:$0xf]  ;;  %v7553_v18 = vor.u32 %v8756_v5, %v7552_v27  ;;  %v7762_v45 = vld [vmem:[#allocation13 + $0x2b8] sm:$0xf0]  ;;  %v3801_v56 = vrot.slane %v3784_v51, 4  ;;  %v3805_v59 = vrot.slane %v3788_v43, 4  ;;  %v7653_v49 = vor.u32 %v8778_v57, %v7650_v47 }
 0x216   : > { %3489 = vmatpush.bf16.msra.mxu1 %v7601_v41  ;;  %3516 = vmatpush.bf16.msra.mxu3 %v7841_v52  ;;  %v7425_v41 = vor.u32 %v8724_v23, %v7424_v12  ;;  %v3776_v52 = vperm.slane %v10086_v29, %v10016_v10  ;;  %v7909_v29 = vor.u32 %v8842_v37, %v7906_v60  ;;  %v8838_v1 = vld [vmem:[#allocation13 + $0x3ac] sm:$0xf]  ;;  %v7890_v26 = vld [vmem:[#allocation13 + $0x3b8] sm:$0xf0]  ;;  %v3809_v54 = vrot.slane %v3796_v48, 4 }
 0x217   : > { %v8742_v62 = vld [vmem:[#allocation13 + $0xac] sm:$0xf]  ;;  %v7506_v8 = vld [vmem:[#allocation13 + $0xb8] sm:$0xf0]  ;;  %v10170_v12 = vsel %vm3593_vm0, %v3801_v56, %v3760_v33  ;;  %v10175_v5 = vsel %vm3593_vm0, %v3805_v59, %v3764_v38 }
 0x218   : > { %3477 = vmatpush.bf16.msra.mxu0 %v7457_v32  ;;  %v8806_v32 = vld [vmem:[#allocation13 + $0x2ac] sm:$0xf]  ;;  %v3815_v6 = vrot.slane %v3776_v52, 4  ;;  %v7746_v27 = vld [vmem:[#allocation13 + $0x298] sm:$0xf0]  ;;  %v7509_v63 = vor.u32 %v8742_v62, %v7506_v8  ;;  %v10185_v24 = vsel %vm3593_vm0, %v3809_v54, %v3772_v42 }
 0x219   : > { %3504 = vmatpush.bf16.msra.mxu2 %v7697_v55  ;;  %v3807_v55 = vrot.slane %v3764_v38, 4  ;;  %v8774_v58 = vld [vmem:[#allocation13 + $0x1ac] sm:$0xf]  ;;  %v7490_v38 = vld [vmem:[#allocation13 + $0x98] sm:$0xf0] }
 0x21a   : > { %3490 = vmatpush.bf16.msra.mxu1 %v7585_v53  ;;  %3517 = vmatpush.bf16.msra.mxu3 %v7825_v9  ;;  %v3803_v53 = vrot.slane %v3760_v33, 4  ;;  %v3811_v9 = vrot.slane %v3772_v42, 4  ;;  %v8802_v23 = vld [vmem:[#allocation13 + $0x28c] sm:$0xf]  ;;  %v10182_v19 = vsel %vm3593_vm0, %v3800_v20, %v3815_v6  ;;  %v7618_v37 = vld [vmem:[#allocation13 + $0x198] sm:$0xf0] }
 0x21b   : > { %v10167_v0 = vsel %vm3593_vm0, %v3788_v43, %v3807_v55  ;;  %v8834_v61 = vld [vmem:[#allocation13 + $0x38c] sm:$0xf]  ;;  %v7749_v33 = vor.u32 %v8802_v23, %v7746_v27  ;;  %v7730_v43 = vld [vmem:[#allocation13 + $0x278] sm:$0xf0] }
 0x21c   : > { %3478 = vmatpush.bf16.msra.mxu0 %v7441_v34  ;;  %v10164_v22 = vsel %vm3593_vm0, %v3784_v51, %v3803_v53  ;;  %v7765_v34 = vor.u32 %v8806_v32, %v7762_v45  ;;  %v8738_v51 = vld [vmem:[#allocation13 + $0x8c] sm:$0xf]  ;;  %v7858_v42 = vld [vmem:[#allocation13 + $0x378] sm:$0xf0] }
 0x21d   : > { %3505 = vmatpush.bf16.msra.mxu2 %v7681_v21  ;;  %v7634_v21 = vld [vmem:[#allocation13 + $0x1b8] sm:$0xf0]  ;;  %v8798_v60 = vld [vmem:[#allocation13 + $0x26c] sm:$0xf] }
 0x21e   : > { %3491 = vmatpush.bf16.msra.mxu1 %v7569_v16  ;;  %3518 = vmatpush.bf16.msra.mxu3 %v7809_v31  ;;  %v3813_v16 = vrot.slane %v3800_v20, 4  ;;  %v7893_v31 = vor.u32 %v8838_v1, %v7890_v26  ;;  %v7637_v17 = vor.u32 %v8774_v58, %v7634_v21  ;;  %v8830_v44 = vld [vmem:[#allocation13 + $0x36c] sm:$0xf]  ;;  %v7733_v28 = vor.u32 %v8798_v60, %v7730_v43  ;;  %v7602_v57 = vld [vmem:[#allocation13 + $0x178] sm:$0xf0] }
 0x21f   : > { %v8794_v47 = vld [vmem:[#allocation13 + $0x24c] sm:$0xf]  ;;  %v7714_v20 = vld [vmem:[#allocation13 + $0x258] sm:$0xf0] }
 0x220   : > { %3479 = vmatpush.bf16.msra.mxu0 %v7425_v41  ;;  %3506 = vmatmul.bf16.vlgmr.msra.gmra.mxu2 %v10008_v39  ;;  %v10188_v36 = vsel %vm3593_vm0, %v3813_v16, %v3776_v52  ;;  %v8770_v41 = vld [vmem:[#allocation13 + $0x18c] sm:$0xf]  ;;  %v7842_v53 = vld [vmem:[#allocation13 + $0x358] sm:$0xf0] }
 0x221   : > { %3550 = vmatpush.bf16.msrb.mxu2 %v7797_v30  ;;  %3519 = vmatmul.bf16.vlgmr.msra.gmra.mxu3 %v10014_v50  ;;  %v10178_v30 = vsel %vm3593_vm0, %v3796_v48, %v3811_v9  ;;  %v7621_v52 = vor.u32 %v8770_v41, %v7618_v37  ;;  %v8734_v48 = vld [vmem:[#allocation13 + $0x6c] sm:$0xf]  ;;  %v7458_v56 = vld [vmem:[#allocation13 + $0x58] sm:$0xf0] }
 0x222   : > { %3563 = vmatpush.bf16.msrb.mxu3 %v7925_v35  ;;  %3492 = vmatpush.bf16.msra.mxu1 %v7553_v18  ;;  %v7874_v35 = vld [vmem:[#allocation13 + $0x398] sm:$0xf0]  ;;  %v8826_v45 = vld [vmem:[#allocation13 + $0x34c] sm:$0xf] }
 0x223   : > { %3480 = vmatmul.bf16.vlgmr.msra.gmra.mxu0 %v10102_v13  ;;  %v7877_v18 = vor.u32 %v8834_v61, %v7874_v35  ;;  %v8730_v1 = vld [vmem:[#allocation13 + $0x4c] sm:$0xf]  ;;  %v7586_v9 = vld [vmem:[#allocation13 + $0x158] sm:$0xf0]  ;;  %v7845_v6 = vor.u32 %v8826_v45, %v7842_v53 }
 0x224   : > { %3524 = vmatpush.bf16.msrb.mxu0 %v7541_v46  ;;  %v7493_v46 = vor.u32 %v8738_v51, %v7490_v38  ;;  %v8762_v59 = vld [vmem:[#allocation13 + $0x14c] sm:$0xf]  ;;  %v7698_v62 = vld [vmem:[#allocation13 + $0x238] sm:$0xf0]  ;;  %v7461_v54 = vor.u32 %v8730_v1, %v7458_v56 }
 0x225   : > { %3551 = vmatpush.bf16.msrb.mxu2 %v7781_v40  ;;  %3493 = vmatmul.bf16.vlgmr.msra.gmra.mxu1 %v10100_v2  ;;  %v8766_v40 = vld [vmem:[#allocation13 + $0x16c] sm:$0xf]  ;;  %v7589_v8 = vor.u32 %v8762_v59, %v7586_v9  ;;  %v7442_v21 = vld [vmem:[#allocation13 + $0x38] sm:$0xf0] }
 0x226   : > { %3537 = vmatpush.bf16.msrb.mxu1 %v7669_v14  ;;  %3564 = vmatpush.bf16.msrb.mxu3 %v7909_v29  ;;  %v7474_v14 = vld [vmem:[#allocation13 + $0x78] sm:$0xf0]  ;;  %v7861_v29 = vor.u32 %v8830_v44, %v7858_v42  ;;  %v7605_v55 = vor.u32 %v8766_v40, %v7602_v57  ;;  %v8790_v26 = vld [vmem:[#allocation13 + $0x22c] sm:$0xf] }
 0x227   : > { %v7477_v32 = vor.u32 %v8734_v48, %v7474_v14  ;;  %v7701_v58 = vor.u32 %v8790_v26, %v7698_v62  ;;  %v8726_v16 = vld [vmem:[#allocation13 + $0x2c] sm:$0xf]  ;;  %v7570_v27 = vld [vmem:[#allocation13 + $0x138] sm:$0xf0]  ;;  %v3848_v48 = vperm.slane %v9953_v3, %v9963_v25  ;;  %v3852_v14 = vperm.slane %v9949_v7, %v9963_v25 }
 0x228   : > { %3525 = vmatpush.bf16.msrb.mxu0 %v7525_v15  ;;  %v7717_v15 = vor.u32 %v8794_v47, %v7714_v20  ;;  %v8758_v23 = vld [vmem:[#allocation13 + $0x12c] sm:$0xf]  ;;  %v7445_v35 = vor.u32 %v8726_v16, %v7442_v21  ;;  %v7426_v37 = vld [vmem:[#allocation13 + $0x18] sm:$0xf0] }
 0x229   : > { %3552 = vmatpush.bf16.msrb.mxu2 %v7765_v34  ;;  %v7826_v34 = vld [vmem:[#allocation13 + $0x338] sm:$0xf0]  ;;  %v7573_v51 = vor.u32 %v8758_v23, %v7570_v27  ;;  %v8722_v41 = vld [vmem:[#allocation13 + $0xc] sm:$0xf]  ;;  %v3891_v45 = vrot.slane %v3848_v48, 4 }
 0x22a   : > { %3538 = vmatpush.bf16.msrb.mxu1 %v7653_v49  ;;  %3565 = vmatpush.bf16.msrb.mxu3 %v7893_v31  ;;  %v8822_v49 = vld [vmem:[#allocation13 + $0x32c] sm:$0xf]  ;;  %v7554_v43 = vld [vmem:[#allocation13 + $0x118] sm:$0xf0] }
 0x22b   : > { %v8786_v31 = vld [vmem:[#allocation13 + $0x20c] sm:$0xf]  ;;  %v7829_v61 = vor.u32 %v8822_v49, %v7826_v34 }
 0x22c   : > { %3526 = vmatpush.bf16.msrb.mxu0 %v7509_v63  ;;  %v7682_v63 = vld [vmem:[#allocation13 + $0x218] sm:$0xf0]  ;;  %v8754_v60 = vld [vmem:[#allocation13 + $0x10c] sm:$0xf] }
 0x22d   : > { %3553 = vmatpush.bf16.msrb.mxu2 %v7749_v33  ;;  %v7810_v33 = vld [vmem:[#allocation13 + $0x318] sm:$0xf0]  ;;  %v7685_v38 = vor.u32 %v8786_v31, %v7682_v63  ;;  %v7557_v44 = vor.u32 %v8754_v60, %v7554_v43 }
 0x22e   : > { %3539 = vmatpush.bf16.msrb.mxu1 %v7637_v17  ;;  %3566 = vmatpush.bf16.msrb.mxu3 %v7877_v18  ;;  %v8818_v17 = vld [vmem:[#allocation13 + $0x30c] sm:$0xf] }
 0x22f   : > { %v7813_v18 = vor.u32 %v8818_v17, %v7810_v33 }
 0x230   : > { %3527 = vmatpush.bf16.msrb.mxu0 %v7493_v46  ;;  %v7429_v46 = vor.u32 %v8722_v41, %v7426_v37 }
 0x231   : > { %3554 = vmatpush.bf16.msrb.mxu2 %v7733_v28 }
 0x232   : > { %3540 = vmatpush.bf16.msrb.mxu1 %v7621_v52  ;;  %3567 = vmatpush.bf16.msrb.mxu3 %v7861_v29 }
 0x234   : > { %3528 = vmatpush.bf16.msrb.mxu0 %v7477_v32 }
 0x235   : > { %3555 = vmatpush.bf16.msrb.mxu2 %v7717_v15 }
 0x236   : > { %3541 = vmatpush.bf16.msrb.mxu1 %v7605_v55  ;;  %3568 = vmatpush.bf16.msrb.mxu3 %v7845_v6 }
 0x238   : > { %3529 = vmatpush.bf16.msrb.mxu0 %v7461_v54 }
 0x239   : > { %3556 = vmatpush.bf16.msrb.mxu2 %v7701_v58 }
 0x23a   : > { %3542 = vmatpush.bf16.msrb.mxu1 %v7589_v8  ;;  %3569 = vmatpush.bf16.msrb.mxu3 %v7829_v61 }
 0x23c   : > { %3530 = vmatpush.bf16.msrb.mxu0 %v7445_v35 }
 0x23d   : > { %3557 = vmatpush.bf16.msrb.mxu2 %v7685_v38 }
 0x23e   : > { %3543 = vmatpush.bf16.msrb.mxu1 %v7573_v51  ;;  %3570 = vmatpush.bf16.msrb.mxu3 %v7813_v18 }
 0x240   : > { %3558 = vmatmul.bf16.vlgmr.msrb.gmra.mxu2 %v10008_v39  ;;  %3531 = vmatpush.bf16.msrb.mxu0 %v7429_v46  ;;  %v3872_v39 = vperm.slane %v10002_v4, %v9963_v25  ;;  %v3903_v4 = vrot.slane %v3852_v14, 4 }
 0x241   : > { %3571 = vmatmul.bf16.vlgmr.msrb.gmra.mxu3 %v10014_v50 }
 0x242   : > { %3544 = vmatpush.bf16.msrb.mxu1 %v7557_v44  ;;  %v3915_v55 = vrot.slane %v3872_v39, 4 }
 0x243   : > { %3532 = vmatmul.bf16.vlgmr.msrb.gmra.mxu0 %v10102_v13 }
 0x245   : > { %3545 = vmatmul.bf16.vlgmr.msrb.gmra.mxu1 %v10100_v2  ;;  %v3876_v2 = vperm.slane %v9996_v11, %v9963_v25 }
 0x247   : > { %v3927_v26 = vrot.slane %v3876_v2, 4 }
 0x258   : > { %v9112_v42 = vpop.permute.xlu0 %9111 }
 0x259   : > { %v9114_v52 = vunpack.i.h.bf16 %v9112_v42  ;;  %v9113_v28 = vunpack.i.l.bf16 %v9112_v42 }
 0x25b   : > { %v3853_v57 = vrot.slane %v9114_v52, 4  ;;  %v3877_v47 = vrot.slane %v9113_v28, 4 }
 0x260   : > { %v9117_v40 = vpop.permute.xlu0 %9116 }
 0x261   : > { %v9119_v50 = vunpack.i.h.bf16 %v9117_v40  ;;  %v9118_v20 = vunpack.i.l.bf16 %v9117_v40 }
 0x263   : > { %v3855_v13 = vrot.slane %v9119_v50, 4  ;;  %v3854_v29 = vsel %vm3593_vm0, %v3853_v57, %v9119_v50  ;;  %v3878_v32 = vsel %vm3593_vm0, %v3877_v47, %v9118_v20  ;;  %v3879_v3 = vrot.slane %v9118_v20, 4 }
 0x264   : > { %v3860_v7 = vperm.slane %v3854_v29, %v9963_v25  ;;  %v3884_v53 = vperm.slane %v3878_v32, %v9963_v25 }
 0x265   : > { %v3856_v15 = vsel %vm3593_vm0, %v9114_v52, %v3855_v13  ;;  %v3880_v1 = vsel %vm3593_vm0, %v9113_v28, %v3879_v3 }
 0x266   : > { %v3864_v56 = vperm.slane %v3856_v15, %v9963_v25  ;;  %v3888_v11 = vperm.slane %v3880_v1, %v9963_v25  ;;  %v3889_v59 = vrot.slane %v3860_v7, 4  ;;  %v3892_v9 = vsel %vm3593_vm0, %v3860_v7, %v3891_v45 }
 0x267   : > { %v3900_v62 = vperm.slane %v3892_v9, %v10016_v10  ;;  %v3913_v6 = vrot.slane %v3884_v53, 4  ;;  %v3916_v54 = vsel %vm3593_vm0, %v3884_v53, %v3915_v55 }
 0x268   : > { %v3890_v49 = vsel %vm3593_vm0, %v3889_v59, %v3848_v48  ;;  %v3901_v34 = vrot.slane %v3864_v56, 4  ;;  %v3904_v8 = vsel %vm3593_vm0, %v3864_v56, %v3903_v4  ;;  %v3924_v58 = vperm.slane %v3916_v54, %v10016_v10 }
 0x269   : > { %v3896_v16 = vperm.slane %v3890_v49, %v10016_v10  ;;  %v3912_v21 = vperm.slane %v3904_v8, %v10016_v10  ;;  %v3914_v23 = vsel %vm3593_vm0, %v3913_v6, %v3872_v39  ;;  %v3925_v27 = vrot.slane %v3888_v11, 4 }
 0x26a   : > { %v3902_v31 = vsel %vm3593_vm0, %v3901_v34, %v3852_v14  ;;  %v3920_v63 = vperm.slane %v3914_v23, %v10016_v10  ;;  %v3928_v61 = vsel %vm3593_vm0, %v3888_v11, %v3927_v26  ;;  %v3941_v35 = vrot.slane %v3924_v58, 4 }
 0x26b   : > { %v3908_v17 = vperm.slane %v3902_v31, %v10016_v10  ;;  %v3926_v33 = vsel %vm3593_vm0, %v3925_v27, %v3876_v2  ;;  %v3936_v51 = vperm.slane %v3928_v61, %v10016_v10  ;;  %v3939_v38 = vrot.slane %v3896_v16, 4 }
 0x26c   : > { %v3932_v41 = vperm.slane %v3926_v33, %v10016_v10  ;;  %v3937_v37 = vrot.slane %v3920_v63, 4  ;;  %v3942_v60 = vsel %vm3593_vm0, %v3941_v35, %v3900_v62  ;;  %v3943_v43 = vrot.slane %v3900_v62, 4 }
 0x26d   : > { %v3940_v18 = vsel %vm3593_vm0, %v3920_v63, %v3939_v38  ;;  %v3947_v46 = vrot.slane %v3908_v17, 4  ;;  %v3949_v44 = vrot.slane %v3936_v51, 4  ;;  %v3951_v42 = vrot.slane %v3912_v21, 4  ;;  %v10259_v38 = vpop.f32.mrf.mxu3 }
 0x26e   : > { %v3938_v52 = vsel %vm3593_vm0, %v3937_v37, %v3896_v16  ;;  %v3944_v28 = vsel %vm3593_vm0, %v3924_v58, %v3943_v43  ;;  %v3945_v48 = vrot.slane %v3932_v41, 4  ;;  %v3953_v14 = vrot.slane %v3942_v60, 4 }
 0x26f   : > { %v3950_v39 = vsel %vm3593_vm0, %v3949_v44, %v3912_v21  ;;  %v3952_v40 = vsel %vm3593_vm0, %v3936_v51, %v3951_v42  ;;  %v3955_v57 = vrot.slane %v3938_v52, 4  ;;  %v3965_v47 = vrot.slane %v3944_v28, 4  ;;  %v10257_v51 = vpop.f32.mrf.mxu2 }
 0x270   : > { %v3967_v50 = vrot.slane %v3940_v18, 4  ;;  %v3977_v20 = vrot.slane %v3950_v39, 4  ;;  %v3989_v2 = vrot.slane %v3952_v40, 4  ;;  %v3946_v13 = vsel %vm3593_vm0, %v3945_v48, %v3908_v17 }
 0x271   : > { %v3948_v29 = vsel %vm3593_vm0, %v3932_v41, %v3947_v46  ;;  %v3954_v32 = vsel %vm3593_vm0, %v3953_v14, %v3938_v52  ;;  %v3966_v3 = vsel %vm3593_vm0, %v3965_v47, %v3940_v18  ;;  %v3979_v45 = vrot.slane %v3946_v13, 4 }
 0x272   : > { %v3968_v7 = vsel %vm3593_vm0, %v3944_v28, %v3967_v50  ;;  %v3960_v53 = vperm.slane %v3954_v32, %v9963_v25  ;;  %v3972_v4 = vperm.slane %v3966_v3, %v9963_v25  ;;  %v3978_v55 = vsel %vm3593_vm0, %v3977_v20, %v3946_v13 }
 0x273   : > { %v3984_v15 = vperm.slane %v3978_v55, %v9963_v25  ;;  %v3990_v1 = vsel %vm3593_vm0, %v3989_v2, %v3948_v29  ;;  %v3991_v56 = vrot.slane %v3948_v29, 4  ;;  %v3956_v11 = vsel %vm3593_vm0, %v3942_v60, %v3955_v57 }
 0x274   : > { %v3996_v59 = vperm.slane %v3990_v1, %v9963_v25  ;;  %v4001_v9 = vrot.slane %v3972_v4, 4  ;;  %v4003_v26 = vrot.slane %v3960_v53, 4  ;;  %v3964_v62 = vperm.slane %v3956_v11, %v9963_v25 }
 0x275   : > { %v4027_v6 = vrot.slane %v3984_v15, 4  ;;  %v3976_v54 = vperm.slane %v3968_v7, %v9963_v25  ;;  %v3980_v49 = vsel %vm3593_vm0, %v3950_v39, %v3979_v45  ;;  %v3992_v34 = vsel %vm3593_vm0, %v3952_v40, %v3991_v56 }
 0x276   : > { %v4002_v8 = vsel %vm3593_vm0, %v4001_v9, %v3960_v53  ;;  %v4025_v58 = vrot.slane %v3996_v59, 4  ;;  %v4004_v16 = vsel %vm3593_vm0, %v3972_v4, %v4003_v26  ;;  %v3988_v21 = vperm.slane %v3980_v49, %v9963_v25  ;;  %v3418_v9 = vpop.f32.mrf.mxu3 }
 0x277   : > { %v4008_v23 = vperm.slane %v4002_v8, %v10016_v10  ;;  %v4012_v27 = vperm.slane %v4004_v16, %v10016_v10  ;;  %v4028_v31 = vsel %vm3593_vm0, %v3996_v59, %v4027_v6  ;;  %v4000_v63 = vperm.slane %v3992_v34, %v9963_v25  ;;  %v3405_v59 = vpop.f32.mrf.mxu2 }
 0x278   : > { %v4026_v61 = vsel %vm3593_vm0, %v4025_v58, %v3984_v15  ;;  %v4036_v35 = vperm.slane %v4028_v31, %v10016_v10  ;;  %v4013_v17 = vrot.slane %v3976_v54, 4  ;;  %v4015_v33 = vrot.slane %v3964_v62, 4 }
 0x279   : > { %v4032_v41 = vperm.slane %v4026_v61, %v10016_v10  ;;  %v4051_v37 = vrot.slane %v4008_v23, 4  ;;  %v4055_v60 = vrot.slane %v4012_v27, 4  ;;  %v4037_v43 = vrot.slane %v4000_v63, 4 }
 0x27a   : > { %v4053_v18 = vrot.slane %v4036_v35, 4  ;;  %v4014_v46 = vsel %vm3593_vm0, %v4013_v17, %v3964_v62  ;;  %v4016_v44 = vsel %vm3593_vm0, %v3976_v54, %v4015_v33  ;;  %v4039_v42 = vrot.slane %v3988_v21, 4  ;;  %v3390_v34 = vpop.f32.mrf.mxu1 }
 0x27b   : > { %v4052_v52 = vsel %vm3593_vm0, %v4032_v41, %v4051_v37  ;;  %v4056_v28 = vsel %vm3593_vm0, %v4036_v35, %v4055_v60  ;;  %v4049_v48 = vrot.slane %v4032_v41, 4  ;;  %v4020_v14 = vperm.slane %v4014_v46, %v10016_v10 }
 0x27c   : > { %v4066_v39 = vpack.c.bf16 %v4052_v52, %v4052_v52  ;;  %v4068_v40 = vpack.c.bf16 %v4056_v28, %v4056_v28  ;;  %v4054_v57 = vsel %vm3593_vm0, %v4053_v18, %v4012_v27  ;;  %v4038_v47 = vsel %vm3593_vm0, %v4037_v43, %v3988_v21  ;;  %v3377_v61 = vpop.f32.mrf.mxu0 }
 0x27d   : > { %v4050_v50 = vsel %vm3593_vm0, %v4049_v48, %v4008_v23  ;;  %v4067_v20 = vpack.c.bf16 %v4054_v57, %v4054_v57  ;;  %v4044_v2 = vperm.slane %v4038_v47, %v10016_v10  ;;  %v4059_v13 = vrot.slane %v4020_v14, 4 }
 0x27e   : > { %v4347_v29 = vsel %vm4323_vm1, %v4066_v39, 0  ;;  %v4385_v32 = vsel %vm4323_vm1, %v4068_v40, 0  ;;  %v4065_v3 = vpack.c.bf16 %v4050_v50, %v4050_v50  ;;  %v4024_v45 = vperm.slane %v4016_v44, %v10016_v10 }
 0x27f   : > { %4356 = vmatpush.bf16.xpose.msra.mxu1 %v4347_v29  ;;  %4394 = vmatpush.bf16.xpose.msra.mxu3 %v4385_v32  ;;  %v4366_v7 = vsel %vm4323_vm1, %v4067_v20, 0  ;;  %v4060_v53 = vsel %vm3593_vm0, %v4044_v2, %v4059_v13  ;;  %v4040_v4 = vsel %vm3593_vm0, %v4000_v63, %v4039_v42  ;;  %v4057_v55 = vrot.slane %v4044_v2, 4 }
 0x280   : > { %v4328_v15 = vsel %vm4323_vm1, %v4065_v3, 0  ;;  %4375 = vmatpush.bf16.xpose.msra.mxu2 %v4366_v7  ;;  %v4070_v1 = vpack.c.bf16 %v4060_v53, %v4060_v53  ;;  %v4048_v56 = vperm.slane %v4040_v4, %v10016_v10  ;;  %v4063_v11 = vrot.slane %v4024_v45, 4 }
 0x281   : > { %4337 = vmatpush.bf16.xpose.msra.mxu0 %v4328_v15  ;;  %v4058_v26 = vsel %vm3593_vm0, %v4057_v55, %v4020_v14  ;;  %v3818_v21 = vpack.c.bf16 %v10164_v22, %v10164_v22  ;;  %v3820_v31 = vpack.c.bf16 %v10167_v0, %v10167_v0  ;;  %v3819_v63 = vpack.c.bf16 %v10175_v5, %v10175_v5 }
 0x282   : > { %v4423_v62 = vsel %vm4323_vm1, %v4070_v1, 0  ;;  %v4064_v6 = vsel %vm3593_vm0, %v4048_v56, %v4063_v11  ;;  %v4069_v54 = vpack.c.bf16 %v4058_v26, %v4058_v26  ;;  %v4061_v49 = vrot.slane %v4048_v56, 4  ;;  %v3392_v33 = vpop.f32.mrf.mxu1 }
 0x283   : > { %v4072_v8 = vpack.c.bf16 %v4064_v6, %v4064_v6  ;;  %v3817_v35 = vpack.c.bf16 %v10170_v12, %v10170_v12  ;;  %v3391_v17 = vadd.f32 %v3390_v34, %v3377_v61  ;;  %v3455_v41 = vpop.f32.mrf.mxu2  ;;  %v3822_v43 = vpack.c.bf16 %v10178_v30, %v10178_v30  ;;  %v4321_v6 = vld [vmem:[%s9831_s10] sm:$0x3] }
 0x284   : > { %v4404_v58 = vsel %vm4323_vm1, %v4069_v54, 0  ;;  %v4062_v16 = vsel %vm3593_vm0, %v4061_v49, %v4024_v45  ;;  %v3379_v37 = vpop.f32.mrf.mxu0  ;;  %v3468_v60 = vpop.f32.mrf.mxu3  ;;  %v3824_v46 = vpack.c.bf16 %v10182_v19, %v10182_v19  ;;  %v3823_v44 = vpack.c.bf16 %v10188_v36, %v10188_v36 }
 0x285   : > { %v4461_v23 = vsel %vm4323_vm1, %v4072_v8, 0  ;;  %v4071_v27 = vpack.c.bf16 %v4062_v16, %v4062_v16  ;;  %v3404_v0 = vadd.f32 %v10257_v51, %v3391_v17  ;;  %v3821_v51 = vpack.c.bf16 %v10185_v24, %v10185_v24 }
 0x286   : > { %7927 = vmatmul.msk.bf16.vlgmr.msra.gmra.mxu1 %vm4323_vm1, %v3818_v21  ;;  %7929 = vmatmul.msk.bf16.vlgmr.msra.gmra.mxu3 %vm4323_vm1, %v3820_v31  ;;  %vm4322_vm2 = vnez %v4321_v6  ;;  %v9575_v54 = vmov 0  }
 0x287   : > { %4432 = vmatpush.bf16.xpose.msrb.mxu1 %v4423_v62  ;;  %4470 = vmatpush.bf16.xpose.msrb.mxu3 %v4461_v23  ;;  %v4442_v22 = vsel %vm4323_vm1, %v4071_v27, 0  ;;  %v10300_v5 = vadd.f32 %v10259_v38, %v3404_v0  ;;  %v4476_v49 = vsel %vm4322_vm2, 16843009, %v9575_v54 }
 0x288   : > { %7928 = vmatmul.msk.bf16.vlgmr.msra.gmra.mxu2 %vm4323_vm1, %v3819_v63  ;;  %7926 = vmatmul.msk.bf16.vlgmr.msra.gmra.mxu0 %vm4323_vm1, %v3817_v35  ;;  %v4477_v34 = vunpack.c.0.s8 %v4476_v49 }
 0x289   : > { %4413 = vmatpush.bf16.xpose.msrb.mxu0 %v4404_v58  ;;  %4451 = vmatpush.bf16.xpose.msrb.mxu2 %v4442_v22 }
 0x28a   : > { %v3442_v12 = vpop.f32.mrf.mxu1  ;;  %vm10324_vm3 = vcmp.ne.s32.totalorder %v4477_v34, 0 }
 0x28b   : > { %v3457_v18 = vpop.f32.mrf.mxu2 }
 0x28c   : > { %v3429_v42 = vpop.f32.mrf.mxu0  ;;  %v3470_v52 = vpop.f32.mrf.mxu3 }
 0x28d   : > { %v3443_v38 = vadd.f32 %v3442_v12, %v3429_v42 }
 0x28f   : > { %v3456_v30 = vadd.f32 %v3455_v41, %v3443_v38 }
 0x291   : > { %v10314_v28 = vadd.f32 %v3468_v60, %v3456_v30 }
 0x292   : > { %v3444_v19 = vpop.f32.mrf.mxu1 }
 0x294   : > { %v3431_v48 = vpop.f32.mrf.mxu0 }
 0x296   : > { %7931 = vmatmul.msk.bf16.vlgmr.msrb.gmra.mxu1 %vm4323_vm1, %v3822_v43  ;;  %7933 = vmatmul.msk.bf16.vlgmr.msrb.gmra.mxu3 %vm4323_vm1, %v3824_v46 }
 0x298   : > { %7932 = vmatmul.msk.bf16.vlgmr.msrb.gmra.mxu2 %vm4323_vm1, %v3823_v44  ;;  %7930 = vmatmul.msk.bf16.vlgmr.msrb.gmra.mxu0 %vm4323_vm1, %v3821_v51 }
 0x2a0   : > { %v3481_v36 = vpop.f32.mrf.mxu0 }
 0x2a2   : > { %v3494_v14 = vpop.f32.mrf.mxu1 }
 0x2a3   : > { %v3495_v39 = vadd.f32 %v3494_v14, %v3481_v36  ;;  %v3507_v40 = vpop.f32.mrf.mxu2 }
 0x2a4   : > { %v3520_v47 = vpop.f32.mrf.mxu3 }
 0x2a5   : > { %v3508_v57 = vadd.f32 %v3507_v40, %v3495_v39 }
 0x2a7   : > { %v3521_v24 = vadd.f32 %v3520_v47, %v3508_v57 }
 0x2a8   : > { %v3483_v50 = vpop.f32.mrf.mxu0 }
 0x2a9   : > { %v9135_v45 = vpack.i.bf16 %v10300_v5, %v3521_v24  ;;  %v4115_v53 = vrot.slane %v3521_v24, 4 }
 0x2aa   : > { %v3496_v20 = vpop.f32.mrf.mxu1 }
 0x2ab   : > { %v3509_v2 = vpop.f32.mrf.mxu2 }
 0x2ac   : > { %v3522_v13 = vpop.f32.mrf.mxu3 }
 0x2c0   : > { %v3533_v29 = vpop.f32.mrf.mxu0 }
 0x2c2   : > { %v3546_v32 = vpop.f32.mrf.mxu1 }
 0x2c3   : > { %v3547_v3 = vadd.f32 %v3546_v32, %v3533_v29  ;;  %v3559_v7 = vpop.f32.mrf.mxu2 }
 0x2c4   : > { %v3572_v55 = vpop.f32.mrf.mxu3 }
 0x2c5   : > { %v3560_v4 = vadd.f32 %v3559_v7, %v3547_v3 }
 0x2c7   : > { %v3573_v15 = vadd.f32 %v3572_v55, %v3560_v4 }
 0x2c8   : > { %v3535_v11 = vpop.f32.mrf.mxu0 }
 0x2c9   : > { %v4113_v1 = vrot.slane %v3573_v15, 4  ;;  %v10318_v56 = vsel %vm3593_vm0, %v3573_v15, %v4115_v53  ;;  %v9130_v57 = vpack.i.bf16 %v10314_v28, %v3573_v15 }
 0x2ca   : > { %v3548_v59 = vpop.f32.mrf.mxu1 }
 0x2cb   : > { %v10321_v9 = vsel %vm3593_vm0, %v4113_v1, %v3521_v24  ;;  %v3561_v26 = vpop.f32.mrf.mxu2 }
 0x2cc   : > { %v3574_v62 = vpop.f32.mrf.mxu3 }
 0x303   : > { %v4358_v58 = vpop.f32.mrf.mxu1 }
 0x304   : > { %v4482_v16 = vsel %vm10324_vm3, -1e+09, %v4358_v58 }
 0x305   : > { %v4339_v21 = vpop.f32.mrf.mxu0  ;;  %v4493_v23 = vsel %vm4489_vm4, %v4482_v16, -inf }
 0x306   : > { %v4481_v27 = vsel %vm10324_vm3, -1e+09, %v4339_v21  ;;  %4494 = vmax.xlane.f32.xlu0 %v4493_v23 }
 0x307   : > { %v4490_v31 = vsel %vm4489_vm4, %v4481_v27, -inf }
 0x308   : > { %4491 = vmax.xlane.f32.xlu1 %v4490_v31 }
 0x309   : > { %v4396_v63 = vpop.f32.mrf.mxu3 }
 0x30a   : > { %v4484_v33 = vsel %vm10324_vm3, -1e+09, %v4396_v63 }
 0x30b   : > { %v4377_v61 = vpop.f32.mrf.mxu2  ;;  %v4360_v35 = vpop.f32.mrf.mxu1  ;;  %v4499_v12 = vsel %vm4489_vm4, %v4484_v33, -inf }
 0x30c   : > { %v4483_v17 = vsel %vm10324_vm3, -1e+09, %v4377_v61 }
 0x30d   : > { %v4496_v22 = vsel %vm4489_vm4, %v4483_v17, -inf  ;;  %v4341_v0 = vpop.f32.mrf.mxu0 }
 0x30e   : > { %4497 = vmax.xlane.f32.xlu2 %v4496_v22 }
 0x311   : > { %v4398_v41 = vpop.f32.mrf.mxu3 }
 0x313   : > { %v4379_v37 = vpop.f32.mrf.mxu2  ;;  %v4434_v60 = vpop.f32.mrf.mxu1 }
 0x314   : > { %v4486_v30 = vsel %vm10324_vm3, -1e+09, %v4434_v60 }
 0x315   : > { %v4415_v43 = vpop.f32.mrf.mxu0  ;;  %v4505_v48 = vsel %vm4489_vm4, %v4486_v30, -inf }
 0x316   : > { %4500 = vmax.xlane.f32.xlu2 %v4499_v12  ;;  %v4485_v18 = vsel %vm10324_vm3, -1e+09, %v4415_v43 }
 0x317   : > { %v4502_v51 = vsel %vm4489_vm4, %v4485_v18, -inf }
 0x319   : > { %v4472_v46 = vpop.f32.mrf.mxu3 }
 0x31a   : > { %9136 = vrot.lane.b32.xlu0 %v9135_v45, %s9572_s23  ;;  %v10352_v39 = vsel %vm10324_vm3, -1e+09, %v4472_v46 }
 0x31b   : > { %v4453_v44 = vpop.f32.mrf.mxu2  ;;  %v4436_v42 = vpop.f32.mrf.mxu1  ;;  %v4511_v40 = vsel %vm4489_vm4, %v10352_v39, -inf }
 0x31c   : > { %v4487_v36 = vsel %vm10324_vm3, -1e+09, %v4453_v44 }
 0x31d   : > { %v4417_v38 = vpop.f32.mrf.mxu0  ;;  %v4508_v14 = vsel %vm4489_vm4, %v4487_v36, -inf }
 0x31e   : > { %4503 = vmax.xlane.f32.xlu2 %v4502_v51  ;;  %v4091_v51 = vrot.slane %v10300_v5, 4 }
 0x321   : > { %v4474_v52 = vpop.f32.mrf.mxu3 }
 0x323   : > { %v4455_v19 = vpop.f32.mrf.mxu2 }
 0x324   : > { %v4089_v19 = vrot.slane %v10314_v28, 4 }
 0x326   : > { %4506 = vmax.xlane.f32.xlu2 %v4505_v48 }
 0x32e   : > { %4509 = vmax.xlane.f32.xlu2 %v4508_v14  ;;  %v4092_v14 = vsel %vm3593_vm0, %v10314_v28, %v4091_v51 }
 0x336   : > { %4512 = vmax.xlane.f32.xlu2 %v4511_v40 }
 0x34e   : > { %9131 = vrot.lane.b32.xlu2 %v9130_v57, %s9572_s23 }
 0x379   : > { %v4495_v47 = vpop.xlane.xlu0 %4494 }
 0x37a   : > { %v4515_v24 = vsub.f32 %v4482_v16, %v4495_v47 }
 0x37b   : > { %v4492_v13 = vpop.xlane.xlu1 %4491 }
 0x37c   : > { %v4523_v50 = vpack.c.bf16 %v4515_v24, %v4515_v24  ;;  %v4514_v3 = vsub.f32 %v4481_v27, %v4492_v13  ;;  %v4090_v24 = vsel %vm3593_vm0, %v4089_v19, %v10300_v5 }
 0x37e   : > { %v4531_v20 = vunpack.c.l.bf16 %v4523_v50  ;;  %v4522_v53 = vpack.c.bf16 %v4514_v3, %v4514_v3  ;;  %v4100_v50 = vperm.slane %v4092_v14, %v9963_v25  ;;  %v4096_v3 = vperm.slane %v4090_v24, %v9963_v25 }
 0x380   : > { %v4540_v2 = vmul.f32 1.442695, %v4531_v20  ;;  %v4530_v59 = vunpack.c.l.bf16 %v4522_v53 }
 0x381   : > { %v4498_v29 = vpop.xlane.xlu2 %4497 }
 0x382   : > { %v4516_v32 = vsub.f32 %v4483_v17, %v4498_v29  ;;  %9150 = vpow2.f32 %v4540_v2  ;;  %v4538_v34 = vmul.f32 1.442695, %v4530_v59 }
 0x384   : > { %v4524_v45 = vpack.c.bf16 %v4516_v32, %v4516_v32 }
 0x386   : > { %v4532_v7 = vunpack.c.l.bf16 %v4524_v45 }
 0x388   : > { %v4542_v4 = vmul.f32 1.442695, %v4532_v7  ;;  %v9151_v55 = vpop.eup %9150  ;;  %v4151_v7 = vrot.slane %v4100_v50, 4 }
 0x389   : > { %v4501_v1 = vpop.xlane.xlu2 %4500  ;;  %v4555_v11 = vpack.c.bf16 %v9151_v55, %v9151_v55 }
 0x38a   : > { %9152 = vpow2.f32 %v4542_v4  ;;  %v4517_v15 = vsub.f32 %v4484_v33, %v4501_v1  ;;  %v4124_v4 = vperm.slane %v10318_v56, %v9963_v25 }
 0x38b   : > { %v10358_v62 = vunpack.c.l.bf16 %v4555_v11 }
 0x38c   : > { %v4525_v26 = vpack.c.bf16 %v4517_v15, %v4517_v15  ;;  %v9137_v57 = vpop.permute.xlu0 %9136  ;;  %v4175_v56 = vrot.slane %v4124_v4, 4 }
 0x38d   : > { %v4573_v54 = vsel %vm4489_vm4, %v10358_v62, 0.0  ;;  %v9139_v2 = vunpack.i.h.bf16 %v9137_v57  ;;  %v9138_v13 = vunpack.i.l.bf16 %v9137_v57 }
 0x38e   : > { %v4533_v6 = vunpack.c.l.bf16 %v4525_v26  ;;  %4574 = vadd.xlane.f32.xlu2 %v4573_v54 }
 0x38f   : > { %v4103_v5 = vrot.slane %v9139_v2, 4  ;;  %v4127_v15 = vrot.slane %v9138_v13, 4 }
 0x390   : > { %v9153_v49 = vpop.eup %9152  ;;  %v4544_v8 = vmul.f32 1.442695, %v4533_v6  ;;  %v4139_v6 = vrot.slane %v4096_v3, 4 }
 0x391   : > { %v4504_v58 = vpop.xlane.xlu2 %4503  ;;  %v4556_v16 = vpack.c.bf16 %v9153_v49, %v9153_v49 }
 0x392   : > { %9154 = vpow2.f32 %v4544_v8  ;;  %v4518_v31 = vsub.f32 %v4485_v18, %v4504_v58 }
 0x393   : > { %v10362_v21 = vunpack.c.l.bf16 %v4556_v16  ;;  %9156 = vpow2.f32 %v4538_v34 }
 0x394   : > { %v4526_v33 = vpack.c.bf16 %v4518_v31, %v4518_v31 }
 0x395   : > { %v4576_v23 = vsel %vm4489_vm4, %v10362_v21, 0.0 }
 0x396   : > { %4577 = vadd.xlane.f32.xlu1 %v4576_v23  ;;  %v4534_v12 = vunpack.c.l.bf16 %v4526_v33 }
 0x398   : > { %v9155_v27 = vpop.eup %9154  ;;  %v4546_v38 = vmul.f32 1.442695, %v4534_v12 }
 0x399   : > { %v4507_v63 = vpop.xlane.xlu2 %4506  ;;  %v4557_v61 = vpack.c.bf16 %v9155_v27, %v9155_v27  ;;  %v9157_v35 = vpop.eup %9156 }
 0x39a   : > { %v4519_v17 = vsub.f32 %v4486_v30, %v4507_v63  ;;  %v4554_v37 = vpack.c.bf16 %v9157_v35, %v9157_v35 }
 0x39b   : > { %v10366_v22 = vunpack.c.l.bf16 %v4557_v61 }
 0x39c   : > { %v4527_v0 = vpack.c.bf16 %v4519_v17, %v4519_v17  ;;  %v10370_v46 = vunpack.c.l.bf16 %v4554_v37 }
 0x39d   : > { %v4579_v41 = vsel %vm4489_vm4, %v10366_v22, 0.0 }
 0x39e   : > { %v4535_v60 = vunpack.c.l.bf16 %v4527_v0  ;;  %4580 = vadd.xlane.f32.xlu1 %v4579_v41  ;;  %v4570_v30 = vsel %vm4489_vm4, %v10370_v46, 0.0 }
 0x3a0   : > { %v4548_v44 = vmul.f32 1.442695, %v4535_v60 }
 0x3a1   : > { %v4510_v43 = vpop.xlane.xlu2 %4509 }
 0x3a2   : > { %v4520_v18 = vsub.f32 %v4487_v36, %v4510_v43  ;;  %9158 = vpow2.f32 %v4548_v44 }
 0x3a3   : > { %9160 = vpow2.f32 %v4546_v38 }
 0x3a4   : > { %v4528_v42 = vpack.c.bf16 %v4520_v18, %v4520_v18 }
 0x3a6   : > { %v4536_v52 = vunpack.c.l.bf16 %v4528_v42  ;;  %4571 = vadd.xlane.f32.xlu1 %v4570_v30 }
 0x3a8   : > { %v4550_v48 = vmul.f32 1.442695, %v4536_v52  ;;  %v9159_v47 = vpop.eup %9158 }
 0x3a9   : > { %v4513_v40 = vpop.xlane.xlu2 %4512  ;;  %v9161_v32 = vpop.eup %9160  ;;  %v4559_v28 = vpack.c.bf16 %v9159_v47, %v9159_v47 }
 0x3aa   : > { %9162 = vpow2.f32 %v4550_v48  ;;  %v4521_v36 = vsub.f32 %v10352_v39, %v4513_v40  ;;  %v4120_v39 = vperm.slane %v10321_v9, %v9963_v25  ;;  %v4558_v26 = vpack.c.bf16 %v9161_v32, %v9161_v32 }
 0x3ab   : > { %v10389_v49 = vunpack.c.l.bf16 %v4559_v28 }
 0x3ac   : > { %v4529_v20 = vpack.c.bf16 %v4521_v36, %v4521_v36  ;;  %v4163_v31 = vrot.slane %v4120_v39, 4  ;;  %v10399_v35 = vunpack.c.l.bf16 %v4558_v26 }
 0x3ad   : > { %v4585_v43 = vsel %vm4489_vm4, %v10389_v49, 0.0 }
 0x3ae   : > { %v4537_v29 = vunpack.c.l.bf16 %v4529_v20 }
 0x3b0   : > { %v9163_v45 = vpop.eup %9162  ;;  %v4552_v53 = vmul.f32 1.442695, %v4537_v29 }
 0x3b1   : > { %v9132_v55 = vpop.permute.xlu2 %9131  ;;  %v4560_v1 = vpack.c.bf16 %v9163_v45, %v9163_v45 }
 0x3b2   : > { %v9134_v11 = vunpack.i.h.bf16 %v9132_v55  ;;  %v9133_v59 = vunpack.i.l.bf16 %v9132_v55  ;;  %9164 = vpow2.f32 %v4552_v53 }
 0x3b3   : > { %v10387_v54 = vunpack.c.l.bf16 %v4560_v1 }
 0x3b4   : > { %v4101_v34 = vrot.slane %v9134_v11, 4  ;;  %v4104_v8 = vsel %vm3593_vm0, %v9134_v11, %v4103_v5  ;;  %v4125_v9 = vrot.slane %v9133_v59, 4  ;;  %v4128_v58 = vsel %vm3593_vm0, %v9133_v59, %v4127_v15 }
 0x3b5   : > { %v4112_v16 = vperm.slane %v4104_v8, %v9963_v25  ;;  %v4136_v23 = vperm.slane %v4128_v58, %v9963_v25  ;;  %v4588_v27 = vsel %vm4489_vm4, %v10387_v54, 0.0 }
 0x3b6   : > { %v4102_v63 = vsel %vm3593_vm0, %v4101_v34, %v9139_v2  ;;  %v4126_v61 = vsel %vm3593_vm0, %v4125_v9, %v9138_v13  ;;  %4589 = vadd.xlane.f32.xlu1 %v4588_v27 }
 0x3b7   : > { %v4108_v17 = vperm.slane %v4102_v63, %v9963_v25  ;;  %v4149_v0 = vrot.slane %v4112_v16, 4  ;;  %v4152_v33 = vsel %vm3593_vm0, %v4112_v16, %v4151_v7  ;;  %v4132_v41 = vperm.slane %v4126_v61, %v9963_v25 }
 0x3b8   : > { %v4160_v37 = vperm.slane %v4152_v33, %v10016_v10  ;;  %v4173_v60 = vrot.slane %v4136_v23, 4  ;;  %v4176_v12 = vsel %vm3593_vm0, %v4136_v23, %v4175_v56  ;;  %v9165_v44 = vpop.eup %9164  ;;  %v4582_v7 = vsel %vm4489_vm4, %v10399_v35, 0.0 }
 0x3b9   : > { %v4137_v18 = vrot.slane %v4108_v17, 4  ;;  %v4140_v42 = vsel %vm3593_vm0, %v4108_v17, %v4139_v6  ;;  %v4150_v51 = vsel %vm3593_vm0, %v4149_v0, %v4100_v50  ;;  %v4161_v38 = vrot.slane %v4132_v41, 4 }
 0x3ba   : > { %v4148_v30 = vperm.slane %v4140_v42, %v10016_v10  ;;  %v4156_v52 = vperm.slane %v4150_v51, %v10016_v10  ;;  %v4199_v19 = vrot.slane %v4160_v37, 4  ;;  %v4164_v48 = vsel %vm3593_vm0, %v4132_v41, %v4163_v31 }
 0x3bb   : > { %v4138_v14 = vsel %vm3593_vm0, %v4137_v18, %v4096_v3  ;;  %v4162_v40 = vsel %vm3593_vm0, %v4161_v38, %v4120_v39  ;;  %v4172_v57 = vperm.slane %v4164_v48, %v10016_v10  ;;  %v4174_v36 = vsel %vm3593_vm0, %v4173_v60, %v4124_v4 }
 0x3bc   : > { %v4144_v47 = vperm.slane %v4138_v14, %v10016_v10  ;;  %v4191_v24 = vrot.slane %v4148_v30, 4  ;;  %v4195_v50 = vrot.slane %v4156_v52, 4  ;;  %v4168_v20 = vperm.slane %v4162_v40, %v10016_v10 }
 0x3bd   : > { %v4180_v2 = vperm.slane %v4174_v36, %v10016_v10  ;;  %v4184_v13 = vperm.slane %v4176_v12, %v10016_v10  ;;  %v4189_v29 = vrot.slane %v4172_v57, 4  ;;  %v4561_v32 = vpack.c.bf16 %v9165_v44, %v9165_v44 }
 0x3be   : > { %v4187_v28 = vrot.slane %v4144_v47, 4  ;;  %v4185_v3 = vrot.slane %v4168_v20, 4  ;;  %v4192_v45 = vsel %vm3593_vm0, %v4172_v57, %v4191_v24  ;;  %4586 = vadd.xlane.f32.xlu1 %v4585_v43 }
 0x3bf   : > { %v4190_v53 = vsel %vm3593_vm0, %v4189_v29, %v4148_v30  ;;  %v4193_v39 = vrot.slane %v4180_v2, 4  ;;  %v4196_v4 = vsel %vm3593_vm0, %v4180_v2, %v4195_v50  ;;  %v4197_v5 = vrot.slane %v4184_v13, 4 }
 0x3c0   : > { %v4200_v55 = vsel %vm3593_vm0, %v4184_v13, %v4199_v19  ;;  %v4201_v1 = vrot.slane %v4190_v53, 4  ;;  %v4213_v15 = vrot.slane %v4192_v45, 4  ;;  %v4239_v11 = vrot.slane %v4196_v4, 4 }
 0x3c1   : > { %v4194_v59 = vsel %vm3593_vm0, %v4193_v39, %v4156_v52  ;;  %v4198_v26 = vsel %vm3593_vm0, %v4197_v5, %v4160_v37  ;;  %v4237_v6 = vrot.slane %v4200_v55, 4  ;;  %v10429_v34 = vunpack.c.l.bf16 %v4561_v32 }
 0x3c2   : > { %v4225_v8 = vrot.slane %v4198_v26, 4  ;;  %v4227_v9 = vrot.slane %v4194_v59, 4  ;;  %v4240_v58 = vsel %vm3593_vm0, %v4200_v55, %v4239_v11  ;;  %v4186_v56 = vsel %vm3593_vm0, %v4185_v3, %v4144_v47 }
 0x3c3   : > { %v4591_v16 = vsel %vm4489_vm4, %v10429_v34, 0.0  ;;  %v4188_v23 = vsel %vm3593_vm0, %v4168_v20, %v4187_v28  ;;  %v4202_v27 = vsel %vm3593_vm0, %v4201_v1, %v4186_v56  ;;  %v4203_v31 = vrot.slane %v4186_v56, 4 }
 0x3c4   : > { %4592 = vadd.xlane.f32.xlu0 %v4591_v16  ;;  %v4208_v63 = vperm.slane %v4202_v27, %v9963_v25  ;;  %v4214_v61 = vsel %vm3593_vm0, %v4213_v15, %v4188_v23  ;;  %v4215_v17 = vrot.slane %v4188_v23, 4  ;;  %v4226_v0 = vsel %vm3593_vm0, %v4225_v8, %v4194_v59 }
 0x3c5   : > { %v4220_v33 = vperm.slane %v4214_v61, %v9963_v25  ;;  %v4232_v41 = vperm.slane %v4226_v0, %v9963_v25  ;;  %v4238_v37 = vsel %vm3593_vm0, %v4237_v6, %v4196_v4  ;;  %v4204_v60 = vsel %vm3593_vm0, %v4190_v53, %v4203_v31 }
 0x3c6   : > { %4583 = vadd.xlane.f32.xlu1 %v4582_v7  ;;  %v4244_v12 = vperm.slane %v4238_v37, %v9963_v25  ;;  %v4251_v43 = vrot.slane %v4208_v63, 4  ;;  %v4212_v44 = vperm.slane %v4204_v60, %v9963_v25  ;;  %v4216_v18 = vsel %vm3593_vm0, %v4192_v45, %v4215_v17 }
 0x3c7   : > { %v4249_v42 = vrot.slane %v4220_v33, 4  ;;  %v4275_v51 = vrot.slane %v4232_v41, 4  ;;  %v4224_v38 = vperm.slane %v4216_v18, %v9963_v25  ;;  %v4228_v30 = vsel %vm3593_vm0, %v4198_v26, %v4227_v9 }
 0x3c8   : > { %v4273_v52 = vrot.slane %v4244_v12, 4  ;;  %v4252_v19 = vsel %vm3593_vm0, %v4220_v33, %v4251_v43  ;;  %v4236_v48 = vperm.slane %v4228_v30, %v9963_v25  ;;  %v4248_v14 = vperm.slane %v4240_v58, %v9963_v25 }
 0x3c9   : > { %v4250_v40 = vsel %vm3593_vm0, %v4249_v42, %v4208_v63  ;;  %v4260_v57 = vperm.slane %v4252_v19, %v10016_v10  ;;  %v4276_v36 = vsel %vm3593_vm0, %v4244_v12, %v4275_v51  ;;  %v4261_v47 = vrot.slane %v4224_v38, 4 }
 0x3ca   : > { %v4256_v24 = vperm.slane %v4250_v40, %v10016_v10  ;;  %v4274_v50 = vsel %vm3593_vm0, %v4273_v52, %v4232_v41  ;;  %v4284_v20 = vperm.slane %v4276_v36, %v10016_v10  ;;  %v4285_v2 = vrot.slane %v4248_v14, 4 }
 0x3cb   : > { %v4280_v13 = vperm.slane %v4274_v50, %v10016_v10  ;;  %v4303_v29 = vrot.slane %v4260_v57, 4  ;;  %v4262_v32 = vsel %vm3593_vm0, %v4261_v47, %v4212_v44  ;;  %v4263_v28 = vrot.slane %v4212_v44, 4 }
 0x3cc   : > { %v4301_v3 = vrot.slane %v4284_v20, 4  ;;  %v4299_v45 = vrot.slane %v4256_v24, 4  ;;  %v4268_v7 = vperm.slane %v4262_v32, %v10016_v10  ;;  %v4286_v53 = vsel %vm3593_vm0, %v4285_v2, %v4236_v48 }
 0x3cd   : > { %v4297_v39 = vrot.slane %v4280_v13, 4  ;;  %v4304_v4 = vsel %vm3593_vm0, %v4284_v20, %v4303_v29  ;;  %v4292_v5 = vperm.slane %v4286_v53, %v10016_v10  ;;  %v4264_v55 = vsel %vm3593_vm0, %v4224_v38, %v4263_v28 }
 0x3ce   : > { %v4302_v1 = vsel %vm3593_vm0, %v4301_v3, %v4260_v57  ;;  %v4300_v15 = vsel %vm3593_vm0, %v4280_v13, %v4299_v45  ;;  %v4316_v11 = vpack.c.bf16 %v4304_v4, %v4304_v4  ;;  %v4272_v59 = vperm.slane %v4264_v55, %v10016_v10 }
 0x3cf   : > { %v4298_v26 = vsel %vm3593_vm0, %v4297_v39, %v4256_v24  ;;  %v4315_v6 = vpack.c.bf16 %v4302_v1, %v4302_v1  ;;  %v4314_v8 = vpack.c.bf16 %v4300_v15, %v4300_v15  ;;  %v4305_v9 = vrot.slane %v4292_v5, 4 }
 0x3d0   : > { %v4313_v58 = vpack.c.bf16 %v4298_v26, %v4298_v26  ;;  %v4705_v56 = vsel %vm4646_vm5, %v4316_v11, 0  ;;  %v4287_v16 = vrot.slane %v4236_v48, 4  ;;  %v4307_v23 = vrot.slane %v4268_v7, 4 }
 0x3d1   : > { %v4686_v27 = vsel %vm4646_vm5, %v4315_v6, 0  ;;  %v4667_v31 = vsel %vm4646_vm5, %v4314_v8, 0  ;;  %4714 = vmatpush.bf16.msra.mxu3 %v4705_v56  ;;  %v4306_v63 = vsel %vm3593_vm0, %v4305_v9, %v4268_v7  ;;  %v4311_v61 = vrot.slane %v4272_v59, 4 }
 0x3d2   : > { %v4648_v17 = vsel %vm4646_vm5, %v4313_v58, 0  ;;  %4695 = vmatpush.bf16.msra.mxu2 %v4686_v27  ;;  %4676 = vmatpush.bf16.msra.mxu1 %v4667_v31  ;;  %v4317_v0 = vpack.c.bf16 %v4306_v63, %v4306_v63  ;;  %v4288_v33 = vsel %vm3593_vm0, %v4248_v14, %v4287_v16  ;;  %v4308_v41 = vsel %vm3593_vm0, %v4292_v5, %v4307_v23 }
 0x3d3   : > { %4657 = vmatpush.bf16.msra.mxu0 %v4648_v17  ;;  %v4296_v37 = vperm.slane %v4288_v33, %v10016_v10  ;;  %v4318_v60 = vpack.c.bf16 %v4308_v41, %v4308_v41 }
 0x3d4   : > { %v4724_v12 = vsel %vm4646_vm5, %v4317_v0, 0 }
 0x3d5   : > { %v4309_v43 = vrot.slane %v4296_v37, 4  ;;  %v4743_v44 = vsel %vm4646_vm5, %v4318_v60, 0  ;;  %v4312_v18 = vsel %vm3593_vm0, %v4296_v37, %v4311_v61 }
 0x3d6   : > { %4752 = vmatpush.bf16.msrb.mxu1 %v4743_v44  ;;  %v4320_v42 = vpack.c.bf16 %v4312_v18, %v4312_v18 }
 0x3d7   : > { %4733 = vmatpush.bf16.msrb.mxu0 %v4724_v12  ;;  %v4310_v51 = vsel %vm3593_vm0, %v4309_v43, %v4272_v59 }
 0x3d8   : > { %v4319_v38 = vpack.c.bf16 %v4310_v51, %v4310_v51  ;;  %v4781_v30 = vsel %vm4646_vm5, %v4320_v42, 0 }
 0x3d9   : > { %4790 = vmatpush.bf16.msrb.mxu3 %v4781_v30 }
 0x3da   : > { %v4762_v52 = vsel %vm4646_vm5, %v4319_v38, 0 }
 0x3db   : > { %4771 = vmatpush.bf16.msrb.mxu2 %v4762_v52 }
 0x401   : > { %v4575_v19 = vpop.xlane.xlu2 %4574 }
 0x402   : > { %9166 = vrcp.f32 %v4575_v19 }
 0x408   : > { %v9167_v48 = vpop.eup %9166 }
 0x409   : > { %v4578_v14 = vpop.xlane.xlu1 %4577  ;;  %v4603_v40 = vpack.c.bf16 %v9167_v48, %v9167_v48 }
 0x40a   : > { %9168 = vrcp.f32 %v4578_v14 }
 0x40b   : > { %v4611_v57 = vunpack.c.l.bf16 %v4603_v40 }
 0x40d   : > { %v4619_v36 = vmul.f32 %v4611_v57, %v10358_v62 }
 0x40f   : > { %v4627_v24 = vpack.c.bf16 %v4619_v36, %v4619_v36 }
 0x410   : > { %v9169_v47 = vpop.eup %9168 }
 0x411   : > { %v4604_v50 = vpack.c.bf16 %v9169_v47, %v9169_v47  ;;  %v4581_v20 = vpop.xlane.xlu1 %4580  ;;  %4636 = vst.msk [vmem:[%s10485_s25 + $0x4] sm:$0xf] %vm4634_vm6, %v4627_v24  ;;  %7935 = vmatmul.msk.bf16.vlgmr.msra.gmra.mxu1 %vm4489_vm4, %v4627_v24 }
 0x412   : > { %9170 = vrcp.f32 %v4581_v20 }
 0x413   : > { %v4612_v2 = vunpack.c.l.bf16 %v4604_v50 }
 0x415   : > { %v4620_v13 = vmul.f32 %v4612_v2, %v10362_v21 }
 0x417   : > { %v4628_v29 = vpack.c.bf16 %v4620_v13, %v4620_v13 }
 0x418   : > { %v9171_v62 = vpop.eup %9170 }
 0x419   : > { %4637 = vst.msk [vmem:[%s10485_s25 + $0x8] sm:$0xf] %vm4634_vm6, %v4628_v29  ;;  %v4605_v32 = vpack.c.bf16 %v9171_v62, %v9171_v62  ;;  %v4572_v28 = vpop.xlane.xlu1 %4571  ;;  %7936 = vmatmul.msk.bf16.vlgmr.msra.gmra.mxu2 %vm4489_vm4, %v4628_v29 }
 0x41a   : > { %9172 = vrcp.f32 %v4572_v28 }
 0x41b   : > { %v4613_v3 = vunpack.c.l.bf16 %v4605_v32 }
 0x41d   : > { %v4621_v45 = vmul.f32 %v4613_v3, %v10366_v22 }
 0x41f   : > { %v4629_v7 = vpack.c.bf16 %v4621_v45, %v4621_v45 }
 0x420   : > { %v9173_v53 = vpop.eup %9172 }
 0x421   : > { %4638 = vst.msk [vmem:[%s10485_s25 + $0xc] sm:$0xf] %vm4634_vm6, %v4629_v7  ;;  %v4602_v39 = vpack.c.bf16 %v9173_v53, %v9173_v53  ;;  %7937 = vmatmul.msk.bf16.vlgmr.msra.gmra.mxu3 %vm4489_vm4, %v4629_v7 }
 0x423   : > { %v4610_v21 = vunpack.c.l.bf16 %v4602_v39 }
 0x425   : > { %v4618_v4 = vmul.f32 %v4610_v21, %v10370_v46 }
 0x427   : > { %v4626_v5 = vpack.c.bf16 %v4618_v4, %v4618_v4 }
 0x429   : > { %4635 = vst.msk [vmem:[%s10485_s25] sm:$0xf] %vm4634_vm6, %v4626_v5  ;;  %v4590_v55 = vpop.xlane.xlu1 %4589  ;;  %7934 = vmatmul.msk.bf16.vlgmr.msra.gmra.mxu0 %vm4489_vm4, %v4626_v5 }
 0x42a   : > { %9174 = vrcp.f32 %v4590_v55 }
 0x430   : > { %v9175_v1 = vpop.eup %9174 }
 0x431   : > { %v4608_v22 = vpack.c.bf16 %v9175_v1, %v9175_v1  ;;  %v4587_v15 = vpop.xlane.xlu1 %4586 }
 0x432   : > { %9176 = vrcp.f32 %v4587_v15 }
 0x433   : > { %v4616_v11 = vunpack.c.l.bf16 %v4608_v22 }
 0x435   : > { %v4624_v59 = vmul.f32 %v4616_v11, %v10387_v54 }
 0x437   : > { %v4632_v26 = vpack.c.bf16 %v4624_v59, %v4624_v59  ;;  %v4593_v6 = vpop.xlane.xlu0 %4592  ;;  %v8184_v59 = vld [vmem:[#allocation14 + $0x1e0] sm:$0xf] }
 0x438   : > { %v9177_v8 = vpop.eup %9176  ;;  %9178 = vrcp.f32 %v4593_v6  ;;  %v8440_v6 = vld [vmem:[#allocation14 + $0x3e0] sm:$0xf] }
 0x439   : > { %4641 = vst.msk [vmem:[%s10485_s25 + $0x18] sm:$0xf] %vm4634_vm6, %v4632_v26  ;;  %v4607_v46 = vpack.c.bf16 %v9177_v8, %v9177_v8  ;;  %v4584_v9 = vpop.xlane.xlu1 %4583  ;;  %7940 = vmatmul.msk.bf16.vlgmr.msrb.gmra.mxu2 %vm4489_vm4, %v4632_v26  ;;  %v8911_v26 = vld [vmem:[#allocation14 + $0x1ec] sm:$0xf0] }
 0x43a   : > { %9180 = vrcp.f32 %v4584_v9  ;;  %v8975_v9 = vld [vmem:[#allocation14 + $0x3ec] sm:$0xf0] }
 0x43b   : > { %v4615_v58 = vunpack.c.l.bf16 %v4607_v46  ;;  %v8185_v46 = vor.u32 %v8911_v26, %v8184_v59  ;;  %v10577_v59 = vld [vmem:[#allocation14 + $0x34c] sm:$0xf0] }
 0x43d   : > { %v4623_v56 = vmul.f32 %v4615_v58, %v10389_v49  ;;  %v8168_v58 = vld [vmem:[#allocation14 + $0x1c0] sm:$0xf]  ;;  %5825 = vmatpush.bf16.msra.mxu1 %v8185_v46 }
 0x43e   : > { %v9179_v16 = vpop.eup %9178 }
 0x43f   : > { %v4631_v23 = vpack.c.bf16 %v4623_v56, %v4623_v56  ;;  %v4609_v54 = vpack.c.bf16 %v9179_v16, %v9179_v16  ;;  %v8907_v56 = vld [vmem:[#allocation14 + $0x1cc] sm:$0xf0] }
 0x440   : > { %v9181_v27 = vpop.eup %9180 }
 0x441   : > { %4640 = vst.msk [vmem:[%s10485_s25 + $0x14] sm:$0xf] %vm4634_vm6, %v4631_v23  ;;  %v4617_v31 = vunpack.c.l.bf16 %v4609_v54  ;;  %v4606_v63 = vpack.c.bf16 %v9181_v27, %v9181_v27  ;;  %7939 = vmatmul.msk.bf16.vlgmr.msrb.gmra.mxu1 %vm4489_vm4, %v4631_v23 }
 0x443   : > { %v4625_v61 = vmul.f32 %v4617_v31, %v10429_v34  ;;  %v4614_v17 = vunpack.c.l.bf16 %v4606_v63  ;;  %v8441_v31 = vor.u32 %v8975_v9, %v8440_v6  ;;  %v8424_v63 = vld [vmem:[#allocation14 + $0x3c0] sm:$0xf] }
 0x445   : > { %v4633_v0 = vpack.c.bf16 %v4625_v61, %v4625_v61  ;;  %v4622_v33 = vmul.f32 %v4614_v17, %v10399_v35  ;;  %v8971_v61 = vld [vmem:[#allocation14 + $0x3cc] sm:$0xf0]  ;;  %5851 = vmatpush.bf16.msra.mxu3 %v8441_v31 }
 0x447   : > { %4642 = vst.msk [vmem:[%s10485_s25 + $0x1c] sm:$0xf] %vm4634_vm6, %v4633_v0  ;;  %v4630_v49 = vpack.c.bf16 %v4622_v33, %v4622_v33  ;;  %7941 = vmatmul.msk.bf16.vlgmr.msrb.gmra.mxu3 %vm4489_vm4, %v4633_v0 }
 0x449   : > { %4639 = vst.msk [vmem:[%s10485_s25 + $0x10] sm:$0xf] %vm4634_vm6, %v4630_v49  ;;  %7938 = vmatmul.msk.bf16.vlgmr.msrb.gmra.mxu0 %vm4489_vm4, %v4630_v49  ;;  %v8169_v49 = vor.u32 %v8907_v56, %v8168_v58 }
 0x44b   : > { %5826 = vmatpush.bf16.msra.mxu1 %v8169_v49 }
 0x48e   : > { %v4678_v41 = vpop.f32.mrf.mxu1 }
 0x48f   : > { %v4810_v30 = vrot.slane %v4678_v41, 4 }
 0x496   : > { %v4680_v37 = vpop.f32.mrf.mxu1 }
 0x497   : > { %v8903_v37 = vld [vmem:[#allocation14 + $0x1ac] sm:$0xf0] }
 0x49c   : > { %v4697_v60 = vpop.f32.mrf.mxu2 }
 0x49d   : > { %v4796_v38 = vrot.slane %v4697_v60, 4 }
 0x4a4   : > { %v4699_v12 = vpop.f32.mrf.mxu2  ;;  %v4716_v43 = vpop.f32.mrf.mxu3 }
 0x4a5   : > { %v4808_v42 = vrot.slane %v4716_v43, 4  ;;  %v4811_v14 = vsel %vm3593_vm0, %v4716_v43, %v4810_v30 }
 0x4a6   : > { %v4659_v44 = vpop.f32.mrf.mxu0  ;;  %v4819_v24 = vperm.slane %v4811_v14, %v9963_v25 }
 0x4a7   : > { %v4798_v51 = vrot.slane %v4659_v44, 4  ;;  %v4809_v35 = vsel %vm3593_vm0, %v4808_v42, %v4678_v41  ;;  %v4797_v19 = vsel %vm3593_vm0, %v4796_v38, %v4659_v44  ;;  %v8152_v41 = vld [vmem:[#allocation14 + $0x1a0] sm:$0xf]  ;;  %v8425_v44 = vor.u32 %v8971_v61, %v8424_v63 }
 0x4a8   : > { %v4815_v52 = vperm.slane %v4809_v35, %v9963_v25  ;;  %v4803_v40 = vperm.slane %v4797_v19, %v9963_v25  ;;  %v4856_v29 = vrot.slane %v4819_v24, 4  ;;  %v8899_v35 = vld [vmem:[#allocation14 + $0x18c] sm:$0xf0]  ;;  %v8392_v38 = vld [vmem:[#allocation14 + $0x380] sm:$0xf]  ;;  %v8153_v14 = vor.u32 %v8903_v37, %v8152_v41 }
 0x4a9   : > { %v4799_v48 = vsel %vm3593_vm0, %v4697_v60, %v4798_v51  ;;  %v8136_v51 = vld [vmem:[#allocation14 + $0x180] sm:$0xf]  ;;  %5852 = vmatpush.bf16.msra.mxu3 %v8425_v44 }
 0x4aa   : > { %v4807_v57 = vperm.slane %v4799_v48, %v9963_v25  ;;  %v4844_v36 = vrot.slane %v4815_v52, 4  ;;  %v4846_v20 = vrot.slane %v4803_v40, 4  ;;  %5827 = vmatpush.bf16.msra.mxu1 %v8153_v14 }
 0x4ac   : > { %v4718_v34 = vpop.f32.mrf.mxu3  ;;  %v4858_v2 = vrot.slane %v4807_v57, 4  ;;  %v4845_v13 = vsel %vm3593_vm0, %v4844_v36, %v4803_v40  ;;  %v4847_v62 = vsel %vm3593_vm0, %v4815_v52, %v4846_v20  ;;  %v4857_v28 = vsel %vm3593_vm0, %v4856_v29, %v4807_v57  ;;  %v8963_v40 = vld [vmem:[#allocation14 + $0x38c] sm:$0xf0]  ;;  %v10558_v57 = vld [vmem:[#allocation14 + $0x160] sm:$0xf] }
 0x4ad   : > { %v10529_v32 = vperm.slane %v4845_v13, %v10016_v10  ;;  %v10534_v53 = vperm.slane %v4847_v62, %v10016_v10  ;;  %v10537_v39 = vperm.slane %v4857_v28, %v10016_v10  ;;  %v8408_v34 = vld [vmem:[#allocation14 + $0x3a0] sm:$0xf]  ;;  %v8393_v20 = vor.u32 %v8963_v40, %v8392_v38  ;;  %v10563_v13 = vld [vmem:[#allocation14 + $0x36c] sm:$0xf0] }
 0x4ae   : > { %v4661_v18 = vpop.f32.mrf.mxu0  ;;  %v4859_v3 = vsel %vm3593_vm0, %v4819_v24, %v4858_v2  ;;  %v8137_v24 = vor.u32 %v8899_v35, %v8136_v51  ;;  %v10561_v2 = vld [vmem:[#allocation14 + $0x360] sm:$0xf] }
 0x4af   : > { %v10540_v21 = vperm.slane %v4859_v3, %v10016_v10  ;;  %v4894_v55 = vrot.slane %v10529_v32, 4  ;;  %v4898_v16 = vrot.slane %v10534_v53, 4  ;;  %v4902_v23 = vrot.slane %v10537_v39, 4  ;;  %v8967_v18 = vld [vmem:[#allocation14 + $0x3ac] sm:$0xf0] }
 0x4b0   : > { %v8377_v46 = vor.u32 %v10563_v13, %v10561_v2  ;;  %5828 = vmatpush.bf16.msra.mxu1 %v8137_v24 }
 0x4b1   : > { %v4906_v17 = vrot.slane %v10540_v21, 4 }
 0x4bc   : > { %v4773_v47 = vpop.f32.mrf.mxu2 }
 0x4bd   : > { %v4820_v7 = vrot.slane %v4773_v47, 4 }
 0x4be   : > { %v4754_v50 = vpop.f32.mrf.mxu1 }
 0x4bf   : > { %v4834_v1 = vrot.slane %v4754_v50, 4 }
 0x4c4   : > { %v4775_v45 = vpop.f32.mrf.mxu2 }
 0x4c5   : > { %v10568_v45 = vld [vmem:[#allocation14 + $0x140] sm:$0xf] }
 0x4c6   : > { %v4735_v4 = vpop.f32.mrf.mxu0  ;;  %v4756_v5 = vpop.f32.mrf.mxu1 }
 0x4c7   : > { %v4821_v22 = vsel %vm3593_vm0, %v4820_v7, %v4735_v4  ;;  %v4822_v15 = vrot.slane %v4735_v4, 4  ;;  %v10570_v7 = vld [vmem:[#allocation14 + $0x14c] sm:$0xf0] }
 0x4c8   : > { %v10545_v11 = vperm.slane %v4821_v22, %v9963_v25  ;;  %v8105_v9 = vor.u32 %v10570_v7, %v10568_v45 }
 0x4c9   : > { %v4823_v8 = vsel %vm3593_vm0, %v4773_v47, %v4822_v15  ;;  %v8409_v47 = vor.u32 %v8967_v18, %v8408_v34  ;;  %v10575_v15 = vld [vmem:[#allocation14 + $0x340] sm:$0xf] }
 0x4ca   : > { %v4792_v54 = vpop.f32.mrf.mxu3  ;;  %v4831_v27 = vperm.slane %v4823_v8, %v9963_v25  ;;  %v4870_v12 = vrot.slane %v10545_v11, 4  ;;  %v8361_v61 = vor.u32 %v10577_v59, %v10575_v15 }
 0x4cb   : > { %v4832_v0 = vrot.slane %v4792_v54, 4  ;;  %v4835_v33 = vsel %vm3593_vm0, %v4792_v54, %v4834_v1  ;;  %5853 = vmatpush.bf16.msra.mxu3 %v8409_v47 }
 0x4cc   : > { %v4843_v60 = vperm.slane %v4835_v33, %v9963_v25  ;;  %v4882_v43 = vrot.slane %v4831_v27, 4 }
 0x4cd   : > { %v4833_v42 = vsel %vm3593_vm0, %v4832_v0, %v4754_v50  ;;  %v8895_v50 = vld [vmem:[#allocation14 + $0x16c] sm:$0xf0] }
 0x4ce   : > { %v4839_v30 = vperm.slane %v4833_v42, %v9963_v25  ;;  %v4880_v52 = vrot.slane %v4843_v60, 4  ;;  %v4883_v19 = vsel %vm3593_vm0, %v4843_v60, %v4882_v43  ;;  %v4737_v48 = vpop.f32.mrf.mxu0  ;;  %v8121_v3 = vor.u32 %v8895_v50, %v10558_v57 }
 0x4cf   : > { %v4891_v36 = vperm.slane %v4883_v19, %v10016_v10  ;;  %5854 = vmatpush.bf16.msra.mxu3 %v8393_v20 }
 0x4d0   : > { %v4868_v29 = vrot.slane %v4839_v30, 4  ;;  %v4871_v62 = vsel %vm3593_vm0, %v4839_v30, %v4870_v12  ;;  %v4881_v28 = vsel %vm3593_vm0, %v4880_v52, %v4831_v27  ;;  %5829 = vmatpush.bf16.msra.mxu1 %v8121_v3 }
 0x4d1   : > { %v4879_v4 = vperm.slane %v4871_v62, %v10016_v10  ;;  %v4887_v5 = vperm.slane %v4881_v28, %v10016_v10  ;;  %v4904_v1 = vrot.slane %v4891_v36, 4  ;;  %v4907_v22 = vsel %vm3593_vm0, %v4891_v36, %v4906_v17 }
 0x4d2   : > { %v4869_v26 = vsel %vm3593_vm0, %v4868_v29, %v10545_v11  ;;  %v4944_v6 = vrot.slane %v4907_v22, 4  ;;  %v4794_v8 = vpop.f32.mrf.mxu3 }
 0x4d3   : > { %v4875_v58 = vperm.slane %v4869_v26, %v10016_v10  ;;  %v4896_v56 = vrot.slane %v4879_v4, 4  ;;  %v4899_v54 = vsel %vm3593_vm0, %v4879_v4, %v4898_v16  ;;  %v4900_v27 = vrot.slane %v4887_v5, 4  ;;  %5855 = vmatpush.bf16.msra.mxu3 %v8377_v46  ;;  %v8056_v4 = vld [vmem:[#allocation14 + $0xe0] sm:$0xf] }
 0x4d4   : > { %v4903_v31 = vsel %vm3593_vm0, %v4887_v5, %v4902_v23  ;;  %v4920_v11 = vrot.slane %v4899_v54, 4  ;;  %v4905_v63 = vsel %vm3593_vm0, %v4904_v1, %v10540_v21  ;;  %5830 = vmatpush.bf16.msra.mxu1 %v8105_v9  ;;  %v8879_v5 = vld [vmem:[#allocation14 + $0xec] sm:$0xf0]  ;;  %v8312_v1 = vld [vmem:[#allocation14 + $0x2e0] sm:$0xf] }
 0x4d5   : > { %v4892_v17 = vrot.slane %v4875_v58, 4  ;;  %v4895_v0 = vsel %vm3593_vm0, %v4875_v58, %v4894_v55  ;;  %v4897_v16 = vsel %vm3593_vm0, %v4896_v56, %v10534_v53  ;;  %v4946_v33 = vrot.slane %v4903_v31, 4  ;;  %v8088_v8 = vld [vmem:[#allocation14 + $0x120] sm:$0xf] }
 0x4d6   : > { %v4908_v49 = vrot.slane %v4897_v16, 4  ;;  %v4921_v23 = vsel %vm3593_vm0, %v4920_v11, %v4895_v0  ;;  %v4922_v41 = vrot.slane %v4895_v0, 4  ;;  %v4901_v21 = vsel %vm3593_vm0, %v4900_v27, %v10537_v39  ;;  %v8344_v27 = vld [vmem:[#allocation14 + $0x320] sm:$0xf]  ;;  %v8951_v11 = vld [vmem:[#allocation14 + $0x32c] sm:$0xf0] }
 0x4d7   : > { %v4893_v37 = vsel %vm3593_vm0, %v4892_v17, %v10529_v32  ;;  %v4927_v60 = vperm.slane %v4921_v23, %v9963_v25  ;;  %v4932_v12 = vrot.slane %v4905_v63, 4  ;;  %v4934_v43 = vrot.slane %v4901_v21, 4  ;;  %5856 = vmatpush.bf16.msra.mxu3 %v8361_v61  ;;  %v8875_v61 = vld [vmem:[#allocation14 + $0xcc] sm:$0xf0] }
 0x4d8   : > { %v4909_v55 = vsel %vm3593_vm0, %v4908_v49, %v4893_v37  ;;  %v4910_v44 = vrot.slane %v4893_v37, 4  ;;  %v4923_v53 = vsel %vm3593_vm0, %v4899_v54, %v4922_v41  ;;  %v4945_v34 = vsel %vm3593_vm0, %v4944_v6, %v4903_v31  ;;  %v8943_v6 = vld [vmem:[#allocation14 + $0x2ec] sm:$0xf0]  ;;  %v8296_v49 = vld [vmem:[#allocation14 + $0x2c0] sm:$0xf] }
 0x4d9   : > { %v4931_v18 = vperm.slane %v4923_v53, %v9963_v25  ;;  %v4915_v39 = vperm.slane %v4909_v55, %v9963_v25  ;;  %v4933_v42 = vsel %vm3593_vm0, %v4932_v12, %v4901_v21  ;;  %v4935_v32 = vsel %vm3593_vm0, %v4905_v63, %v4934_v43  ;;  %v8887_v54 = vld [vmem:[#allocation14 + $0x12c] sm:$0xf0]  ;;  %v8040_v63 = vld [vmem:[#allocation14 + $0xc0] sm:$0xf] }
 0x4da   : > { %v4911_v51 = vsel %vm3593_vm0, %v4897_v16, %v4910_v44  ;;  %v4939_v35 = vperm.slane %v4933_v42, %v9963_v25  ;;  %v4943_v38 = vperm.slane %v4935_v32, %v9963_v25  ;;  %v4947_v30 = vsel %vm3593_vm0, %v4907_v22, %v4946_v33  ;;  %v8939_v23 = vld [vmem:[#allocation14 + $0x2cc] sm:$0xf0]  ;;  %v8328_v43 = vld [vmem:[#allocation14 + $0x300] sm:$0xf] }
 0x4db   : > { %v4919_v52 = vperm.slane %v4911_v51, %v9963_v25  ;;  %v4951_v19 = vperm.slane %v4945_v34, %v9963_v25  ;;  %v4955_v48 = vperm.slane %v4947_v30, %v9963_v25  ;;  %v4956_v14 = vrot.slane %v4927_v60, 4  ;;  %v8883_v12 = vld [vmem:[#allocation14 + $0x10c] sm:$0xf0]  ;;  %v8973_v51 = vld [vmem:[#allocation14 + $0x3e4] sm:$0xf] }
 0x4dc   : > { %v4968_v40 = vrot.slane %v4931_v18, 4  ;;  %v4958_v57 = vrot.slane %v4915_v39, 4  ;;  %v4982_v36 = vrot.slane %v4939_v35, 4  ;;  %v4994_v47 = vrot.slane %v4943_v38, 4  ;;  %v8947_v34 = vld [vmem:[#allocation14 + $0x30c] sm:$0xf0] }
 0x4dd   : > { %v4957_v24 = vsel %vm3593_vm0, %v4956_v14, %v4915_v39  ;;  %v4980_v20 = vrot.slane %v4951_v19, 4  ;;  %v4992_v50 = vrot.slane %v4955_v48, 4  ;;  %v4970_v2 = vrot.slane %v4919_v52, 4  ;;  %v8186_v39 = vld [vmem:[#allocation14 + $0x1f0] sm:$0xf0] }
 0x4de   : > { %v10621_v13 = vperm.slane %v4957_v24, %v10016_v10  ;;  %v4969_v29 = vsel %vm3593_vm0, %v4968_v40, %v4919_v52  ;;  %v4959_v62 = vsel %vm3593_vm0, %v4927_v60, %v4958_v57  ;;  %v4983_v25 = vsel %vm3593_vm0, %v4951_v19, %v4982_v36  ;;  %v8072_v60 = vld [vmem:[#allocation14 + $0x100] sm:$0xf]  ;;  %v8871_v19 = vld [vmem:[#allocation14 + $0xac] sm:$0xf0]  ;;  %v8170_v24 = vld [vmem:[#allocation14 + $0x1d0] sm:$0xf0] }
 0x4df   : > { %v10627_v28 = vperm.slane %v4969_v29, %v10016_v10  ;;  %v4981_v3 = vsel %vm3593_vm0, %v4980_v20, %v4939_v35  ;;  %v4993_v45 = vsel %vm3593_vm0, %v4992_v50, %v4943_v38  ;;  %v10632_v7 = vperm.slane %v4959_v62, %v10016_v10  ;;  %v8442_v35 = vld [vmem:[#allocation14 + $0x3f0] sm:$0xf0]  ;;  %v8024_v52 = vld [vmem:[#allocation14 + $0xa0] sm:$0xf]  ;;  %v8935_v57 = vld [vmem:[#allocation14 + $0x2ac] sm:$0xf0] }
 0x4e0   : > { %v10635_v22 = vperm.slane %v4981_v3, %v10016_v10  ;;  %v10638_v15 = vperm.slane %v4993_v45, %v10016_v10  ;;  %v5006_v59 = vrot.slane %v10621_v13, 4  ;;  %v4971_v26 = vsel %vm3593_vm0, %v4931_v18, %v4970_v2  ;;  %v8909_v18 = vld [vmem:[#allocation14 + $0x1e4] sm:$0xf]  ;;  %v8280_v40 = vld [vmem:[#allocation14 + $0x2a0] sm:$0xf] }
 0x4e1   : > { %v5014_v46 = vrot.slane %v10627_v28, 4  ;;  %v10644_v9 = vperm.slane %v4971_v26, %v10016_v10  ;;  %v10647_v58 = vperm.slane %v4983_v25, %v10016_v10  ;;  %v4995_v56 = vsel %vm3593_vm0, %v4955_v48, %v4994_v47  ;;  %v8905_v47 = vld [vmem:[#allocation14 + $0x1c4] sm:$0xf]  ;;  %v8426_v29 = vld [vmem:[#allocation14 + $0x3d0] sm:$0xf0] }
 0x4e2   : > { %v5007_v31 = vsel %vm3593_vm0, %v10635_v22, %v5006_v59  ;;  %v10655_v0 = vperm.slane %v4995_v56, %v10016_v10  ;;  %v5010_v16 = vrot.slane %v10632_v7, 4  ;;  %v8057_v21 = vor.u32 %v8879_v5, %v8056_v4  ;;  %v8969_v20 = vld [vmem:[#allocation14 + $0x3c4] sm:$0xf]  ;;  %v8008_v62 = vld [vmem:[#allocation14 + $0x80] sm:$0xf] }
 0x4e3   : > { %v5015_v17 = vsel %vm3593_vm0, %v10638_v15, %v5014_v46  ;;  %v5018_v33 = vrot.slane %v10644_v9, 4  ;;  %v8313_v37 = vor.u32 %v8943_v6, %v8312_v1  ;;  %v8089_v10 = vor.u32 %v8887_v54, %v8088_v8  ;;  %v8867_v5 = vld [vmem:[#allocation14 + $0x8c] sm:$0xf0]  ;;  %v8264_v59 = vld [vmem:[#allocation14 + $0x280] sm:$0xf] }
 0x4e4   : > { %v9140_v41 = vpack.i.bf16 %v5007_v31, %v5015_v17  ;;  %v5011_v55 = vsel %vm3593_vm0, %v10647_v58, %v5010_v16  ;;  %v8345_v53 = vor.u32 %v8951_v11, %v8344_v27  ;;  %5812 = vmatpush.bf16.msra.mxu0 %v8057_v21  ;;  %v8041_v32 = vor.u32 %v8875_v61, %v8040_v63  ;;  %v8931_v26 = vld [vmem:[#allocation14 + $0x28c] sm:$0xf0]  ;;  %v8901_v8 = vld [vmem:[#allocation14 + $0x1a4] sm:$0xf]  ;;  %v8154_v46 = vld [vmem:[#allocation14 + $0x1b0] sm:$0xf0] }
 0x4e5   : > { %v5019_v44 = vsel %vm3593_vm0, %v10655_v0, %v5018_v33  ;;  %5838 = vmatpush.bf16.msra.mxu2 %v8313_v37  ;;  %5831 = vmatpush.bf16.msra.mxu1 %v8089_v10  ;;  %v8297_v38 = vor.u32 %v8939_v23, %v8296_v49  ;;  %v8073_v30 = vor.u32 %v8883_v12, %v8072_v60  ;;  %v5016_v50 = vrot.slane %v10655_v0, 4  ;;  %v8410_v54 = vld [vmem:[#allocation14 + $0x3b0] sm:$0xf0]  ;;  %v7992_v27 = vld [vmem:[#allocation14 + $0x60] sm:$0xf] }
 0x4e6   : > { %9141 = vrot.lane.b32.xlu1 %v9140_v41, %s9572_s23  ;;  %v9145_v42 = vpack.i.bf16 %v5011_v55, %v5019_v44  ;;  %5857 = vmatpush.bf16.msra.mxu3 %v8345_v53  ;;  %v8329_v48 = vor.u32 %v8947_v34, %v8328_v43  ;;  %v8189_v14 = vor.u32 %v8909_v18, %v8186_v39  ;;  %v5004_v25 = vrot.slane %v10635_v22, 4  ;;  %v8965_v22 = vld [vmem:[#allocation14 + $0x3a4] sm:$0xf]  ;;  %v8863_v31 = vld [vmem:[#allocation14 + $0x6c] sm:$0xf0] }
 0x4e7   : > { %v8445_v36 = vor.u32 %v8973_v51, %v8442_v35  ;;  %v8025_v2 = vor.u32 %v8871_v19, %v8024_v52  ;;  %v5012_v3 = vrot.slane %v10638_v15, 4  ;;  %v5008_v45 = vrot.slane %v10647_v58, 4  ;;  %v8927_v0 = vld [vmem:[#allocation14 + $0x26c] sm:$0xf0]  ;;  %v8897_v33 = vld [vmem:[#allocation14 + $0x184] sm:$0xf] }
 0x4e8   : > { %9146 = vrot.lane.b32.xlu2 %v9145_v42, %s9572_s23  ;;  %5813 = vmatpush.bf16.msra.mxu0 %v8041_v32  ;;  %v8281_v4 = vor.u32 %v8935_v57, %v8280_v40  ;;  %v8173_v1 = vor.u32 %v8905_v47, %v8170_v24  ;;  %v8429_v6 = vor.u32 %v8969_v20, %v8426_v29  ;;  %v8138_v49 = vld [vmem:[#allocation14 + $0x190] sm:$0xf0]  ;;  %v8859_v37 = vld [vmem:[#allocation14 + $0x4c] sm:$0xf0]  ;;  %v8893_v55 = vld [vmem:[#allocation14 + $0x164] sm:$0xf] }
 0x4e9   : > { %5839 = vmatpush.bf16.msra.mxu2 %v8297_v38  ;;  %5832 = vmatpush.bf16.msra.mxu1 %v8073_v30  ;;  %v8009_v56 = vor.u32 %v8867_v5, %v8008_v62  ;;  %v10671_v15 = vsel %vm3593_vm0, %v5016_v50, %v10644_v9  ;;  %v8265_v58 = vor.u32 %v8931_v26, %v8264_v59  ;;  %v8248_v9 = vld [vmem:[#allocation14 + $0x260] sm:$0xf]  ;;  %v8394_v41 = vld [vmem:[#allocation14 + $0x390] sm:$0xf0]  ;;  %v8923_v12 = vld [vmem:[#allocation14 + $0x24c] sm:$0xf0] }
 0x4ea   : > { %5858 = vmatpush.bf16.msra.mxu3 %v8329_v48  ;;  %v10675_v11 = vsel %vm3593_vm0, %v5008_v45, %v10632_v7  ;;  %v10679_v63 = vsel %vm3593_vm0, %v5012_v3, %v10627_v28  ;;  %v10683_v61 = vsel %vm3593_vm0, %v5004_v25, %v10621_v13  ;;  %v8157_v17 = vor.u32 %v8901_v8, %v8154_v46  ;;  %v8961_v7 = vld [vmem:[#allocation14 + $0x384] sm:$0xf]  ;;  %v7976_v28 = vld [vmem:[#allocation14 + $0x40] sm:$0xf]  ;;  %v8122_v44 = vld [vmem:[#allocation14 + $0x170] sm:$0xf0] }
 0x4eb   : > { %v8413_v16 = vor.u32 %v8965_v22, %v8410_v54  ;;  %v7993_v23 = vor.u32 %v8863_v31, %v7992_v27  ;;  %v8249_v21 = vor.u32 %v8927_v0, %v8248_v9  ;;  %v8141_v60 = vor.u32 %v8897_v33, %v8138_v49  ;;  %v8232_v13 = vld [vmem:[#allocation14 + $0x240] sm:$0xf]  ;;  %v8957_v53 = vld [vmem:[#allocation14 + $0x364] sm:$0xf]  ;;  %v8378_v34 = vld [vmem:[#allocation14 + $0x370] sm:$0xf0] }
 0x4ec   : > { %5814 = vmatpush.bf16.msra.mxu0 %v8025_v2  ;;  %v8397_v43 = vor.u32 %v8961_v7, %v8394_v41  ;;  %v7977_v10 = vor.u32 %v8859_v37, %v7976_v28  ;;  %v8233_v18 = vor.u32 %v8923_v12, %v8232_v13  ;;  %v7960_v39 = vld [vmem:[#allocation14 + $0x20] sm:$0xf]  ;;  %v8855_v42 = vld [vmem:[#allocation14 + $0x2c] sm:$0xf0]  ;;  %v8125_v32 = vor.u32 %v8893_v55, %v8122_v44  ;;  %v8889_v30 = vld [vmem:[#allocation14 + $0x144] sm:$0xf] }
 0x4ed   : > { %5877 = vmatpush.bf16.msrb.mxu1 %v8189_v14  ;;  %5840 = vmatpush.bf16.msra.mxu2 %v8281_v4  ;;  %v8216_v51 = vld [vmem:[#allocation14 + $0x220] sm:$0xf]  ;;  %v8919_v35 = vld [vmem:[#allocation14 + $0x22c] sm:$0xf0]  ;;  %v8381_v38 = vor.u32 %v8957_v53, %v8378_v34  ;;  %v8106_v52 = vld [vmem:[#allocation14 + $0x150] sm:$0xf0]  ;;  %v7961_v19 = vor.u32 %v8855_v42, %v7960_v39 }
 0x4ee   : > { %5903 = vmatpush.bf16.msrb.mxu3 %v8445_v36  ;;  %v8953_v48 = vld [vmem:[#allocation14 + $0x344] sm:$0xf]  ;;  %v8362_v14 = vld [vmem:[#allocation14 + $0x350] sm:$0xf0]  ;;  %v8217_v40 = vor.u32 %v8919_v35, %v8216_v51  ;;  %v7944_v57 = vld [vmem:[#allocation14] sm:$0xf]  ;;  %v8109_v24 = vor.u32 %v8889_v30, %v8106_v52 }
 0x4ef   : > { %v8851_v36 = vld [vmem:[#allocation14 + $0xc] sm:$0xf0]  ;;  %v8200_v47 = vld [vmem:[#allocation14 + $0x200] sm:$0xf]  ;;  %v8877_v50 = vld [vmem:[#allocation14 + $0xe4] sm:$0xf]  ;;  %v8365_v29 = vor.u32 %v8953_v48, %v8362_v14 }
 0x4f0   : > { %5815 = vmatpush.bf16.msra.mxu0 %v8009_v56  ;;  %v8915_v20 = vld [vmem:[#allocation14 + $0x20c] sm:$0xf0]  ;;  %v8058_v2 = vld [vmem:[#allocation14 + $0xf0] sm:$0xf0]  ;;  %v8941_v62 = vld [vmem:[#allocation14 + $0x2e4] sm:$0xf]  ;;  %v7945_v3 = vor.u32 %v8851_v36, %v7944_v57 }
 0x4f1   : > { %5878 = vmatpush.bf16.msrb.mxu1 %v8173_v1  ;;  %5841 = vmatpush.bf16.msra.mxu2 %v8265_v58  ;;  %v8314_v25 = vld [vmem:[#allocation14 + $0x2f0] sm:$0xf0]  ;;  %v8201_v45 = vor.u32 %v8915_v20, %v8200_v47  ;;  %v8061_v4 = vor.u32 %v8877_v50, %v8058_v2  ;;  %v8885_v1 = vld [vmem:[#allocation14 + $0x124] sm:$0xf] }
 0x4f2   : > { %5904 = vmatpush.bf16.msrb.mxu3 %v8429_v6  ;;  %v8317_v5 = vor.u32 %v8941_v62, %v8314_v25  ;;  %v8090_v59 = vld [vmem:[#allocation14 + $0x130] sm:$0xf0]  ;;  %v8949_v26 = vld [vmem:[#allocation14 + $0x324] sm:$0xf]  ;;  %v8192_v62 = vld [vmem:[#allocation14 + $0x1e8] sm:$0xf] }
 0x4f3   : > { %v8093_v6 = vor.u32 %v8885_v1, %v8090_v59  ;;  %v8346_v8 = vld [vmem:[#allocation14 + $0x330] sm:$0xf0]  ;;  %v8873_v46 = vld [vmem:[#allocation14 + $0xc4] sm:$0xf] }
 0x4f4   : > { %5816 = vmatpush.bf16.msra.mxu0 %v7993_v23  ;;  %v8042_v56 = vld [vmem:[#allocation14 + $0xd0] sm:$0xf0]  ;;  %v8349_v22 = vor.u32 %v8949_v26, %v8346_v8  ;;  %v8937_v58 = vld [vmem:[#allocation14 + $0x2c4] sm:$0xf] }
 0x4f5   : > { %5879 = vmatpush.bf16.msrb.mxu1 %v8157_v17  ;;  %5842 = vmatpush.bf16.msra.mxu2 %v8249_v21  ;;  %v8045_v54 = vor.u32 %v8873_v46, %v8042_v56  ;;  %v8298_v27 = vld [vmem:[#allocation14 + $0x2d0] sm:$0xf0]  ;;  %v8881_v31 = vld [vmem:[#allocation14 + $0x104] sm:$0xf]  ;;  %v8176_v46 = vld [vmem:[#allocation14 + $0x1c8] sm:$0xf] }
 0x4f6   : > { %5905 = vmatpush.bf16.msrb.mxu3 %v8413_v16  ;;  %v8301_v17 = vor.u32 %v8937_v58, %v8298_v27  ;;  %v8074_v9 = vld [vmem:[#allocation14 + $0x110] sm:$0xf0]  ;;  %v8945_v0 = vld [vmem:[#allocation14 + $0x304] sm:$0xf]  ;;  %v8432_v58 = vld [vmem:[#allocation14 + $0x3c8] sm:$0xf] }
 0x4f7   : > { %v8330_v16 = vld [vmem:[#allocation14 + $0x310] sm:$0xf0]  ;;  %v8077_v33 = vor.u32 %v8881_v31, %v8074_v9  ;;  %v8869_v23 = vld [vmem:[#allocation14 + $0xa4] sm:$0xf]  ;;  %v8972_v27 = vld [vmem:[#allocation14 + $0x3d4] sm:$0xf0] }
 0x4f8   : > { %5817 = vmatpush.bf16.msra.mxu0 %v7977_v10  ;;  %v8333_v49 = vor.u32 %v8945_v0, %v8330_v16  ;;  %v8026_v7 = vld [vmem:[#allocation14 + $0xb0] sm:$0xf0]  ;;  %v8933_v21 = vld [vmem:[#allocation14 + $0x2a4] sm:$0xf]  ;;  %v8433_v31 = vor.u32 %v8972_v27, %v8432_v58  ;;  %v8416_v9 = vld [vmem:[#allocation14 + $0x3a8] sm:$0xf] }
 0x4f9   : > { %5880 = vmatpush.bf16.msrb.mxu1 %v8141_v60  ;;  %5843 = vmatpush.bf16.msra.mxu2 %v8233_v18  ;;  %v8029_v41 = vor.u32 %v8869_v23, %v8026_v7  ;;  %v8282_v28 = vld [vmem:[#allocation14 + $0x2b0] sm:$0xf0]  ;;  %v8865_v60 = vld [vmem:[#allocation14 + $0x84] sm:$0xf]  ;;  %v8968_v0 = vld [vmem:[#allocation14 + $0x3b4] sm:$0xf0] }
 0x4fa   : > { %5906 = vmatpush.bf16.msrb.mxu3 %v8397_v43  ;;  %v8285_v37 = vor.u32 %v8933_v21, %v8282_v28  ;;  %v8010_v13 = vld [vmem:[#allocation14 + $0x90] sm:$0xf0]  ;;  %v8929_v12 = vld [vmem:[#allocation14 + $0x284] sm:$0xf]  ;;  %v8900_v23 = vld [vmem:[#allocation14 + $0x194] sm:$0xf0] }
 0x4fb   : > { %v8013_v43 = vor.u32 %v8865_v60, %v8010_v13  ;;  %v8266_v55 = vld [vmem:[#allocation14 + $0x290] sm:$0xf0]  ;;  %v8861_v10 = vld [vmem:[#allocation14 + $0x64] sm:$0xf]  ;;  %v8400_v7 = vld [vmem:[#allocation14 + $0x388] sm:$0xf] }
 0x4fc   : > { %5818 = vmatpush.bf16.msra.mxu0 %v7961_v19  ;;  %v8269_v44 = vor.u32 %v8929_v12, %v8266_v55  ;;  %v7994_v53 = vld [vmem:[#allocation14 + $0x70] sm:$0xf0]  ;;  %v8925_v34 = vld [vmem:[#allocation14 + $0x264] sm:$0xf]  ;;  %v8896_v60 = vld [vmem:[#allocation14 + $0x174] sm:$0xf0] }
 0x4fd   : > { %5881 = vmatpush.bf16.msrb.mxu1 %v8125_v32  ;;  %5844 = vmatpush.bf16.msra.mxu2 %v8217_v40  ;;  %v8250_v18 = vld [vmem:[#allocation14 + $0x270] sm:$0xf0]  ;;  %v7997_v39 = vor.u32 %v8861_v10, %v7994_v53  ;;  %v8857_v32 = vld [vmem:[#allocation14 + $0x44] sm:$0xf]  ;;  %v8384_v13 = vld [vmem:[#allocation14 + $0x368] sm:$0xf] }
 0x4fe   : > { %5907 = vmatpush.bf16.msrb.mxu3 %v8381_v38  ;;  %v8253_v42 = vor.u32 %v8925_v34, %v8250_v18  ;;  %v7978_v51 = vld [vmem:[#allocation14 + $0x50] sm:$0xf0]  ;;  %v8921_v35 = vld [vmem:[#allocation14 + $0x244] sm:$0xf]  ;;  %v8960_v12 = vld [vmem:[#allocation14 + $0x374] sm:$0xf0] }
 0x4ff   : > { %v8234_v38 = vld [vmem:[#allocation14 + $0x250] sm:$0xf0]  ;;  %v7981_v30 = vor.u32 %v8857_v32, %v7978_v51  ;;  %v8853_v19 = vld [vmem:[#allocation14 + $0x24] sm:$0xf]  ;;  %v8385_v55 = vor.u32 %v8960_v12, %v8384_v13  ;;  %v8892_v10 = vld [vmem:[#allocation14 + $0x154] sm:$0xf0] }
 0x500   : > { %5819 = vmatpush.bf16.msra.mxu0 %v7945_v3  ;;  %v8237_v52 = vor.u32 %v8921_v35, %v8234_v38  ;;  %v7962_v48 = vld [vmem:[#allocation14 + $0x30] sm:$0xf0]  ;;  %v8917_v14 = vld [vmem:[#allocation14 + $0x224] sm:$0xf]  ;;  %v8912_v3 = vld [vmem:[#allocation14 + $0x1f4] sm:$0xf0] }
 0x501   : > { %5882 = vmatpush.bf16.msrb.mxu1 %v8109_v24  ;;  %5845 = vmatpush.bf16.msra.mxu2 %v8201_v45  ;;  %v7965_v40 = vor.u32 %v8853_v19, %v7962_v48  ;;  %v8218_v57 = vld [vmem:[#allocation14 + $0x230] sm:$0xf0]  ;;  %v8849_v47 = vld [vmem:[#allocation14 + $0x4] sm:$0xf]  ;;  %v8448_v45 = vld [vmem:[#allocation14 + $0x3e8] sm:$0xf] }
 0x502   : > { %5908 = vmatpush.bf16.msrb.mxu3 %v8365_v29  ;;  %v8221_v36 = vor.u32 %v8917_v14, %v8218_v57  ;;  %v7946_v24 = vld [vmem:[#allocation14 + $0x10] sm:$0xf0]  ;;  %v8913_v20 = vld [vmem:[#allocation14 + $0x204] sm:$0xf]  ;;  %v8368_v53 = vld [vmem:[#allocation14 + $0x348] sm:$0xf] }
 0x503   : > { %v8202_v50 = vld [vmem:[#allocation14 + $0x210] sm:$0xf0]  ;;  %v7949_v2 = vor.u32 %v8849_v47, %v7946_v24  ;;  %v8956_v34 = vld [vmem:[#allocation14 + $0x354] sm:$0xf0]  ;;  %v8064_v18 = vld [vmem:[#allocation14 + $0xe8] sm:$0xf] }
 0x504   : > { %5864 = vmatpush.bf16.msrb.mxu0 %v8061_v4  ;;  %v8205_v29 = vor.u32 %v8913_v20, %v8202_v50  ;;  %v8976_v4 = vld [vmem:[#allocation14 + $0x3f4] sm:$0xf0]  ;;  %v8320_v32 = vld [vmem:[#allocation14 + $0x2e8] sm:$0xf]  ;;  %v8902_v12 = vld [vmem:[#allocation14 + $0x1ac] sm:$0xf] }
 0x505   : > { %5890 = vmatpush.bf16.msrb.mxu2 %v8317_v5  ;;  %5883 = vmatpush.bf16.msrb.mxu1 %v8093_v6  ;;  %v8193_v6 = vor.u32 %v8912_v3, %v8192_v62  ;;  %v8449_v8 = vor.u32 %v8976_v4, %v8448_v45  ;;  %v8944_v51 = vld [vmem:[#allocation14 + $0x2f4] sm:$0xf0]  ;;  %v8096_v19 = vld [vmem:[#allocation14 + $0x128] sm:$0xf] }
 0x506   : > { %5909 = vmatpush.bf16.msrb.mxu3 %v8349_v22  ;;  %v8888_v48 = vld [vmem:[#allocation14 + $0x134] sm:$0xf0]  ;;  %v8352_v14 = vld [vmem:[#allocation14 + $0x328] sm:$0xf]  ;;  %v8321_v24 = vor.u32 %v8944_v51, %v8320_v32 }
 0x507   : > { %v8048_v20 = vld [vmem:[#allocation14 + $0xc8] sm:$0xf]  ;;  %v8097_v3 = vor.u32 %v8888_v48, %v8096_v19  ;;  %v8872_v58 = vld [vmem:[#allocation14 + $0xb4] sm:$0xf0] }
 0x508   : > { %5865 = vmatpush.bf16.msrb.mxu0 %v8045_v54  ;;  %v8908_v54 = vld [vmem:[#allocation14 + $0x1d4] sm:$0xf0]  ;;  %v8304_v62 = vld [vmem:[#allocation14 + $0x2c8] sm:$0xf] }
 0x509   : > { %5891 = vmatpush.bf16.msrb.mxu2 %v8301_v17  ;;  %5884 = vmatpush.bf16.msrb.mxu1 %v8077_v33  ;;  %v8160_v17 = vld [vmem:[#allocation14 + $0x1a8] sm:$0xf]  ;;  %v8417_v33 = vor.u32 %v8968_v0, %v8416_v9  ;;  %v8906_v0 = vld [vmem:[#allocation14 + $0x1cc] sm:$0xf] }
 0x50a   : > { %5910 = vmatpush.bf16.msrb.mxu3 %v8333_v49  ;;  %v8144_v49 = vld [vmem:[#allocation14 + $0x188] sm:$0xf] }
 0x50b   : > { %v8145_v21 = vor.u32 %v8900_v23, %v8144_v49  ;;  %v8080_v4 = vld [vmem:[#allocation14 + $0x108] sm:$0xf]  ;;  %v8970_v23 = vld [vmem:[#allocation14 + $0x3cc] sm:$0xf] }
 0x50c   : > { %5866 = vmatpush.bf16.msrb.mxu0 %v8029_v41  ;;  %v8964_v41 = vld [vmem:[#allocation14 + $0x394] sm:$0xf0]  ;;  %v8288_v27 = vld [vmem:[#allocation14 + $0x2a8] sm:$0xf] }
 0x50d   : > { %5892 = vmatpush.bf16.msrb.mxu2 %v8285_v37  ;;  %v8401_v28 = vor.u32 %v8964_v41, %v8400_v7  ;;  %v8128_v37 = vld [vmem:[#allocation14 + $0x168] sm:$0xf]  ;;  %v8434_v7 = vld [vmem:[#allocation14 + $0x3d8] sm:$0xf0] }
 0x50e   : > { %v8016_v41 = vld [vmem:[#allocation14 + $0x88] sm:$0xf]  ;;  %v8437_v13 = vor.u32 %v8970_v23, %v8434_v7  ;;  %v8886_v23 = vld [vmem:[#allocation14 + $0x12c] sm:$0xf]  ;;  %v8098_v7 = vld [vmem:[#allocation14 + $0x138] sm:$0xf0] }
 0x510   : > { %5867 = vmatpush.bf16.msrb.mxu0 %v8013_v43  ;;  %v8129_v43 = vor.u32 %v8896_v60, %v8128_v37  ;;  %v8932_v37 = vld [vmem:[#allocation14 + $0x294] sm:$0xf0] }
 0x511   : > { %5893 = vmatpush.bf16.msrb.mxu2 %v8269_v44  ;;  %v8112_v44 = vld [vmem:[#allocation14 + $0x148] sm:$0xf] }
 0x514   : > { %5868 = vmatpush.bf16.msrb.mxu0 %v7997_v39 }
 0x515   : > { %5894 = vmatpush.bf16.msrb.mxu2 %v8253_v42  ;;  %v8880_v42 = vld [vmem:[#allocation14 + $0xf4] sm:$0xf0] }
 0x516   : > { %v8065_v47 = vor.u32 %v8880_v42, %v8064_v18  ;;  %v8864_v18 = vld [vmem:[#allocation14 + $0x74] sm:$0xf0] }
 0x517   : > { %v8928_v42 = vld [vmem:[#allocation14 + $0x274] sm:$0xf0] }
 0x518   : > { %5869 = vmatpush.bf16.msrb.mxu0 %v7981_v30  ;;  %v8113_v30 = vor.u32 %v8892_v10, %v8112_v44  ;;  %v8162_v44 = vld [vmem:[#allocation14 + $0x1b8] sm:$0xf0]  ;;  %v8966_v10 = vld [vmem:[#allocation14 + $0x3ac] sm:$0xf] }
 0x519   : > { %5895 = vmatpush.bf16.msrb.mxu2 %v8237_v52  ;;  %v8369_v52 = vor.u32 %v8956_v34, %v8368_v53  ;;  %v8418_v53 = vld [vmem:[#allocation14 + $0x3b8] sm:$0xf0]  ;;  %v8000_v34 = vld [vmem:[#allocation14 + $0x68] sm:$0xf]  ;;  %v8165_v32 = vor.u32 %v8902_v12, %v8162_v44  ;;  %v8874_v12 = vld [vmem:[#allocation14 + $0xcc] sm:$0xf] }
 0x51a   : > { %v8421_v51 = vor.u32 %v8966_v10, %v8418_v53  ;;  %v8001_v19 = vor.u32 %v8864_v18, %v8000_v34  ;;  %v8938_v10 = vld [vmem:[#allocation14 + $0x2cc] sm:$0xf]  ;;  %v8306_v53 = vld [vmem:[#allocation14 + $0x2d8] sm:$0xf0] }
 0x51b   : > { %v8882_v34 = vld [vmem:[#allocation14 + $0x10c] sm:$0xf]  ;;  %v8082_v18 = vld [vmem:[#allocation14 + $0x118] sm:$0xf0] }
 0x51c   : > { %5870 = vmatpush.bf16.msrb.mxu0 %v7965_v40  ;;  %v8952_v40 = vld [vmem:[#allocation14 + $0x334] sm:$0xf0] }
 0x51d   : > { %5896 = vmatpush.bf16.msrb.mxu2 %v8221_v36  ;;  %v8353_v45 = vor.u32 %v8952_v40, %v8352_v14  ;;  %v7984_v14 = vld [vmem:[#allocation14 + $0x48] sm:$0xf]  ;;  %v8860_v40 = vld [vmem:[#allocation14 + $0x54] sm:$0xf0] }
 0x520   : > { %5871 = vmatpush.bf16.msrb.mxu0 %v7949_v2 }
 0x521   : > { %5897 = vmatpush.bf16.msrb.mxu2 %v8205_v29  ;;  %v8876_v29 = vld [vmem:[#allocation14 + $0xd4] sm:$0xf0] }
 0x542   : > { %v9147_v25 = vpop.permute.xlu2 %9146 }
 0x543   : > { %v9149_v5 = vunpack.i.h.bf16 %v9147_v25  ;;  %v9148_v1 = vunpack.i.l.bf16 %v9147_v25  ;;  %v8940_v25 = vld [vmem:[#allocation14 + $0x2d4] sm:$0xf0] }
 0x545   : > { %v5037_v59 = vsel %vm4323_vm1, %v10675_v11, %v9149_v5  ;;  %v5039_v26 = vsel %vm4323_vm1, %v10671_v15, %v9148_v1  ;;  %v8177_v11 = vor.u32 %v8908_v54, %v8176_v46  ;;  %v8904_v15 = vld [vmem:[#allocation14 + $0x1b4] sm:$0xf0]  ;;  %v8910_v1 = vld [vmem:[#allocation14 + $0x1ec] sm:$0xf]  ;;  %v8450_v46 = vld [vmem:[#allocation14 + $0x3f8] sm:$0xf0] }
 0x546   : > { %v10689_v56 = vpack.c.bf16 %v5037_v59, %v5037_v59  ;;  %v10691_v22 = vpack.c.bf16 %v5039_v26, %v5039_v26  ;;  %v8161_v16 = vor.u32 %v8904_v15, %v8160_v17  ;;  %v8884_v5 = vld [vmem:[#allocation14 + $0x114] sm:$0xf0]  ;;  %v8194_v59 = vld [vmem:[#allocation14 + $0x1f8] sm:$0xf0]  ;;  %v8049_v26 = vor.u32 %v8876_v29, %v8048_v20  ;;  %v8032_v54 = vld [vmem:[#allocation14 + $0xa8] sm:$0xf] }
 0x547   : > { %v8197_v15 = vor.u32 %v8910_v1, %v8194_v59  ;;  %v8894_v20 = vld [vmem:[#allocation14 + $0x16c] sm:$0xf]  ;;  %v8130_v29 = vld [vmem:[#allocation14 + $0x178] sm:$0xf0] }
 0x548   : > { %5833 = vmatmul.bf16.vlgmr.msra.gmra.mxu1 %v10689_v56  ;;  %5859 = vmatmul.bf16.vlgmr.msra.gmra.mxu3 %v10691_v22  ;;  %v8133_v1 = vor.u32 %v8894_v20, %v8130_v29 }
 0x549   : > { %5929 = vmatpush.bf16.msra.mxu1 %v8193_v6  ;;  %5955 = vmatpush.bf16.msra.mxu3 %v8449_v8  ;;  %v8305_v6 = vor.u32 %v8940_v25, %v8304_v62  ;;  %v8974_v8 = vld [vmem:[#allocation14 + $0x3ec] sm:$0xf]  ;;  %v8386_v25 = vld [vmem:[#allocation14 + $0x378] sm:$0xf0] }
 0x54a   : > { %v8453_v9 = vor.u32 %v8974_v8, %v8450_v46  ;;  %v8958_v62 = vld [vmem:[#allocation14 + $0x36c] sm:$0xf]  ;;  %v8370_v46 = vld [vmem:[#allocation14 + $0x358] sm:$0xf0] }
 0x54b   : > { %v8389_v59 = vor.u32 %v8958_v62, %v8386_v25  ;;  %v8954_v8 = vld [vmem:[#allocation14 + $0x34c] sm:$0xf]  ;;  %v8002_v25 = vld [vmem:[#allocation14 + $0x78] sm:$0xf0] }
 0x54c   : > { %v8862_v62 = vld [vmem:[#allocation14 + $0x6c] sm:$0xf] }
 0x54d   : > { %5930 = vmatpush.bf16.msra.mxu1 %v8177_v11  ;;  %5956 = vmatpush.bf16.msra.mxu3 %v8433_v31  ;;  %v8936_v11 = vld [vmem:[#allocation14 + $0x2b4] sm:$0xf0]  ;;  %v8081_v31 = vor.u32 %v8884_v5, %v8080_v4  ;;  %v7968_v4 = vld [vmem:[#allocation14 + $0x28] sm:$0xf] }
 0x54e   : > { %v8289_v49 = vor.u32 %v8936_v11, %v8288_v27  ;;  %v8856_v5 = vld [vmem:[#allocation14 + $0x34] sm:$0xf0]  ;;  %v7952_v27 = vld [vmem:[#allocation14 + $0x8] sm:$0xf] }
 0x54f   : > { %v8852_v11 = vld [vmem:[#allocation14 + $0x14] sm:$0xf0] }
 0x551   : > { %5931 = vmatpush.bf16.msra.mxu1 %v8161_v16  ;;  %5957 = vmatpush.bf16.msra.mxu3 %v8417_v33  ;;  %v8178_v16 = vld [vmem:[#allocation14 + $0x1d8] sm:$0xf0]  ;;  %v8033_v33 = vor.u32 %v8872_v58, %v8032_v54  ;;  %v7969_v54 = vor.u32 %v8856_v5, %v7968_v4  ;;  %v8005_v4 = vor.u32 %v8862_v62, %v8002_v25 }
 0x552   : > { %v8181_v60 = vor.u32 %v8906_v0, %v8178_v16  ;;  %v8373_v16 = vor.u32 %v8954_v8, %v8370_v46  ;;  %v8854_v8 = vld [vmem:[#allocation14 + $0x2c] sm:$0xf]  ;;  %v7970_v46 = vld [vmem:[#allocation14 + $0x38] sm:$0xf0] }
 0x555   : > { %5932 = vmatpush.bf16.msra.mxu1 %v8145_v21  ;;  %5958 = vmatpush.bf16.msra.mxu3 %v8401_v28  ;;  %v8868_v21 = vld [vmem:[#allocation14 + $0x94] sm:$0xf0]  ;;  %v8272_v28 = vld [vmem:[#allocation14 + $0x288] sm:$0xf] }
 0x558   : > { %5885 = vmatmul.bf16.vlgmr.msrb.gmra.mxu1 %v10689_v56  ;;  %5911 = vmatmul.bf16.vlgmr.msrb.gmra.mxu3 %v10691_v22  ;;  %v9142_v39 = vpop.permute.xlu1 %9141 }
 0x559   : > { %5933 = vmatpush.bf16.msra.mxu1 %v8129_v43  ;;  %5959 = vmatpush.bf16.msra.mxu3 %v8385_v55  ;;  %v9144_v35 = vunpack.i.h.bf16 %v9142_v39  ;;  %v9143_v38 = vunpack.i.l.bf16 %v9142_v39  ;;  %v8017_v43 = vor.u32 %v8868_v21, %v8016_v41  ;;  %v8273_v55 = vor.u32 %v8932_v37, %v8272_v28  ;;  %v8256_v39 = vld [vmem:[#allocation14 + $0x268] sm:$0xf]  ;;  %v8950_v41 = vld [vmem:[#allocation14 + $0x32c] sm:$0xf]  ;;  %v8354_v21 = vld [vmem:[#allocation14 + $0x338] sm:$0xf0] }
 0x55a   : > { %v8257_v48 = vor.u32 %v8928_v42, %v8256_v39  ;;  %v7953_v28 = vor.u32 %v8852_v11, %v7952_v27  ;;  %v8357_v44 = vor.u32 %v8950_v41, %v8354_v21  ;;  %v8946_v39 = vld [vmem:[#allocation14 + $0x30c] sm:$0xf]  ;;  %v8338_v42 = vld [vmem:[#allocation14 + $0x318] sm:$0xf0] }
 0x55b   : > { %v5036_v57 = vsel %vm4323_vm1, %v10683_v61, %v9144_v35  ;;  %v5038_v36 = vsel %vm4323_vm1, %v10679_v63, %v9143_v38  ;;  %v8336_v61 = vld [vmem:[#allocation14 + $0x308] sm:$0xf]  ;;  %v8948_v63 = vld [vmem:[#allocation14 + $0x314] sm:$0xf0]  ;;  %v8898_v35 = vld [vmem:[#allocation14 + $0x18c] sm:$0xf] }
 0x55c   : > { %v10701_v50 = vpack.c.bf16 %v5036_v57, %v5036_v57  ;;  %v10703_v2 = vpack.c.bf16 %v5038_v36, %v5038_v36  ;;  %v8337_v17 = vor.u32 %v8948_v63, %v8336_v61  ;;  %v8146_v38 = vld [vmem:[#allocation14 + $0x198] sm:$0xf0]  ;;  %v8240_v57 = vld [vmem:[#allocation14 + $0x248] sm:$0xf]  ;;  %v8924_v36 = vld [vmem:[#allocation14 + $0x254] sm:$0xf0] }
 0x55d   : > { %5934 = vmatpush.bf16.msra.mxu1 %v8113_v30  ;;  %5960 = vmatpush.bf16.msra.mxu3 %v8369_v52  ;;  %v8962_v30 = vld [vmem:[#allocation14 + $0x38c] sm:$0xf]  ;;  %v8402_v52 = vld [vmem:[#allocation14 + $0x398] sm:$0xf0]  ;;  %v8224_v61 = vld [vmem:[#allocation14 + $0x228] sm:$0xf] }
 0x55e   : > { %5820 = vmatmul.bf16.vlgmr.msra.gmra.mxu0 %v10701_v50  ;;  %5846 = vmatmul.bf16.vlgmr.msra.gmra.mxu2 %v10703_v2  ;;  %v8920_v63 = vld [vmem:[#allocation14 + $0x234] sm:$0xf0]  ;;  %v8850_v27 = vld [vmem:[#allocation14 + $0xc] sm:$0xf]  ;;  %v7954_v11 = vld [vmem:[#allocation14 + $0x18] sm:$0xf0] }
 0x55f   : > { %5916 = vmatpush.bf16.msra.mxu0 %v8065_v47  ;;  %5942 = vmatpush.bf16.msra.mxu2 %v8321_v24  ;;  %v8149_v47 = vor.u32 %v8898_v35, %v8146_v38  ;;  %v8405_v24 = vor.u32 %v8962_v30, %v8402_v52  ;;  %v8225_v58 = vor.u32 %v8920_v63, %v8224_v61  ;;  %v8870_v35 = vld [vmem:[#allocation14 + $0xac] sm:$0xf]  ;;  %v8034_v52 = vld [vmem:[#allocation14 + $0xb8] sm:$0xf0] }
 0x560   : > { %v8085_v38 = vor.u32 %v8882_v34, %v8082_v18  ;;  %v8341_v30 = vor.u32 %v8946_v39, %v8338_v42  ;;  %v8858_v61 = vld [vmem:[#allocation14 + $0x4c] sm:$0xf]  ;;  %v7986_v63 = vld [vmem:[#allocation14 + $0x58] sm:$0xf0]  ;;  %v9187_v34 = vld [vmem:[%s9813_s0 + $0x8] sm:$0xff] }
 0x561   : > { %5935 = vmatpush.bf16.msra.mxu1 %v8097_v3  ;;  %5961 = vmatpush.bf16.msra.mxu3 %v8353_v45  ;;  %v7985_v3 = vor.u32 %v8860_v40, %v7984_v14  ;;  %v8241_v45 = vor.u32 %v8924_v36, %v8240_v57  ;;  %v8037_v14 = vor.u32 %v8870_v35, %v8034_v52  ;;  %v8866_v57 = vld [vmem:[#allocation14 + $0x8c] sm:$0xf]  ;;  %v8018_v36 = vld [vmem:[#allocation14 + $0x98] sm:$0xf0] }
 0x562   : > { %v8021_v20 = vor.u32 %v8866_v57, %v8018_v36  ;;  %v9186_v21 = vld [vmem:[%s9813_s0] sm:$0xff] }
 0x563   : > { %5917 = vmatpush.bf16.msra.mxu0 %v8049_v26  ;;  %5943 = vmatpush.bf16.msra.mxu2 %v8305_v6  ;;  %v8890_v26 = vld [vmem:[#allocation14 + $0x14c] sm:$0xf]  ;;  %v8114_v6 = vld [vmem:[#allocation14 + $0x158] sm:$0xf0] }
 0x564   : > { %v8117_v0 = vor.u32 %v8890_v26, %v8114_v6  ;;  %v7989_v26 = vor.u32 %v8858_v61, %v7986_v63 }
 0x565   : > { %5936 = vmatpush.bf16.msra.mxu1 %v8081_v31  ;;  %5962 = vmatpush.bf16.msra.mxu3 %v8337_v17  ;;  %v8208_v31 = vld [vmem:[#allocation14 + $0x208] sm:$0xf]  ;;  %v8916_v17 = vld [vmem:[#allocation14 + $0x214] sm:$0xf0] }
 0x566   : > { %v8209_v37 = vor.u32 %v8916_v17, %v8208_v31  ;;  %v8914_v31 = vld [vmem:[#allocation14 + $0x20c] sm:$0xf]  ;;  %v8210_v17 = vld [vmem:[#allocation14 + $0x218] sm:$0xf0] }
 0x567   : > { %5918 = vmatpush.bf16.msra.mxu0 %v8033_v33  ;;  %5944 = vmatpush.bf16.msra.mxu2 %v8289_v49  ;;  %v8942_v33 = vld [vmem:[#allocation14 + $0x2ec] sm:$0xf]  ;;  %v8322_v49 = vld [vmem:[#allocation14 + $0x2f8] sm:$0xf0] }
 0x568   : > { %5937 = vmatmul.bf16.vlgmr.msra.gmra.mxu1 %v10689_v56  ;;  %5963 = vmatmul.bf16.vlgmr.msra.gmra.mxu3 %v10691_v22 }
 0x569   : > { %5981 = vmatpush.bf16.msrb.mxu1 %v8197_v15  ;;  %6007 = vmatpush.bf16.msrb.mxu3 %v8453_v9  ;;  %v8878_v15 = vld [vmem:[#allocation14 + $0xec] sm:$0xf]  ;;  %v8066_v9 = vld [vmem:[#allocation14 + $0xf8] sm:$0xf0] }
 0x56b   : > { %5919 = vmatpush.bf16.msra.mxu0 %v8017_v43  ;;  %5945 = vmatpush.bf16.msra.mxu2 %v8273_v55  ;;  %v8050_v43 = vld [vmem:[#allocation14 + $0xd8] sm:$0xf0]  ;;  %v8101_v55 = vor.u32 %v8886_v23, %v8098_v7 }
 0x56d   : > { %5982 = vmatpush.bf16.msrb.mxu1 %v8181_v60  ;;  %6008 = vmatpush.bf16.msrb.mxu3 %v8437_v13  ;;  %v8069_v60 = vor.u32 %v8878_v15, %v8066_v9  ;;  %v8325_v13 = vor.u32 %v8942_v33, %v8322_v49  ;;  %v7957_v15 = vor.u32 %v8850_v27, %v7954_v11 }
 0x56e   : > { %5872 = vmatmul.bf16.vlgmr.msrb.gmra.mxu0 %v10701_v50  ;;  %5898 = vmatmul.bf16.vlgmr.msrb.gmra.mxu2 %v10703_v2  ;;  %v8213_v9 = vor.u32 %v8914_v31, %v8210_v17 }
 0x56f   : > { %5920 = vmatpush.bf16.msra.mxu0 %v8001_v19  ;;  %5946 = vmatpush.bf16.msra.mxu2 %v8257_v48  ;;  %v8934_v19 = vld [vmem:[#allocation14 + $0x2ac] sm:$0xf]  ;;  %v8290_v48 = vld [vmem:[#allocation14 + $0x2b8] sm:$0xf0] }
 0x570   : > { %v8293_v40 = vor.u32 %v8934_v19, %v8290_v48 }
 0x571   : > { %5983 = vmatpush.bf16.msrb.mxu1 %v8165_v32  ;;  %6009 = vmatpush.bf16.msrb.mxu3 %v8421_v51  ;;  %v8053_v32 = vor.u32 %v8874_v12, %v8050_v43  ;;  %v8309_v51 = vor.u32 %v8938_v10, %v8306_v53 }
 0x573   : > { %5921 = vmatpush.bf16.msra.mxu0 %v7985_v3  ;;  %5947 = vmatpush.bf16.msra.mxu2 %v8241_v45  ;;  %v8926_v3 = vld [vmem:[#allocation14 + $0x26c] sm:$0xf]  ;;  %v8258_v45 = vld [vmem:[#allocation14 + $0x278] sm:$0xf0] }
 0x574   : > { %v8261_v5 = vor.u32 %v8926_v3, %v8258_v45  ;;  %v9189_v45 = vld [vmem:[%s9813_s0 + $0x18] sm:$0xff] }
 0x575   : > { %5984 = vmatpush.bf16.msrb.mxu1 %v8149_v47  ;;  %6010 = vmatpush.bf16.msrb.mxu3 %v8405_v24  ;;  %v8930_v47 = vld [vmem:[#allocation14 + $0x28c] sm:$0xf]  ;;  %v8274_v24 = vld [vmem:[#allocation14 + $0x298] sm:$0xf0] }
 0x576   : > { %v8277_v29 = vor.u32 %v8930_v47, %v8274_v24 }
 0x577   : > { %5922 = vmatpush.bf16.msra.mxu0 %v7969_v54  ;;  %5948 = vmatpush.bf16.msra.mxu2 %v8225_v58  ;;  %v8226_v54 = vld [vmem:[#allocation14 + $0x238] sm:$0xf0] }
 0x579   : > { %5985 = vmatpush.bf16.msrb.mxu1 %v8133_v1  ;;  %6011 = vmatpush.bf16.msrb.mxu3 %v8389_v59  ;;  %v8922_v1 = vld [vmem:[#allocation14 + $0x24c] sm:$0xf]  ;;  %v8242_v59 = vld [vmem:[#allocation14 + $0x258] sm:$0xf0] }
 0x57a   : > { %v8245_v6 = vor.u32 %v8922_v1, %v8242_v59 }
 0x57b   : > { %5923 = vmatpush.bf16.msra.mxu0 %v7953_v28  ;;  %5949 = vmatpush.bf16.msra.mxu2 %v8209_v37 }
 0x57d   : > { %5986 = vmatpush.bf16.msrb.mxu1 %v8117_v0  ;;  %6012 = vmatpush.bf16.msrb.mxu3 %v8373_v16 }
 0x57e   : > { %5924 = vmatmul.bf16.vlgmr.msra.gmra.mxu0 %v10701_v50  ;;  %5950 = vmatmul.bf16.vlgmr.msra.gmra.mxu2 %v10703_v2 }
 0x57f   : > { %5968 = vmatpush.bf16.msrb.mxu0 %v8069_v60  ;;  %5994 = vmatpush.bf16.msrb.mxu2 %v8325_v13 }
 0x581   : > { %5987 = vmatpush.bf16.msrb.mxu1 %v8101_v55  ;;  %6013 = vmatpush.bf16.msrb.mxu3 %v8357_v44 }
 0x583   : > { %5969 = vmatpush.bf16.msrb.mxu0 %v8053_v32  ;;  %5995 = vmatpush.bf16.msrb.mxu2 %v8309_v51 }
 0x585   : > { %5988 = vmatpush.bf16.msrb.mxu1 %v8085_v38  ;;  %6014 = vmatpush.bf16.msrb.mxu3 %v8341_v30 }
 0x587   : > { %5970 = vmatpush.bf16.msrb.mxu0 %v8037_v14  ;;  %5996 = vmatpush.bf16.msrb.mxu2 %v8293_v40 }
 0x588   : > { %5989 = vmatmul.bf16.vlgmr.msrb.gmra.mxu1 %v10689_v56  ;;  %6015 = vmatmul.bf16.vlgmr.msrb.gmra.mxu3 %v10691_v22  ;;  %v8918_v56 = vld [vmem:[#allocation14 + $0x22c] sm:$0xf]  ;;  %v7973_v22 = vor.u32 %v8854_v8, %v7970_v46 }
 0x589   : > { %v8229_v58 = vor.u32 %v8918_v56, %v8226_v54  ;;  %v9576_v54 = vmov 512.0  }
 0x58a   : > { %9182 = vrcp.f32 %v9576_v54 }
 0x58b   : > { %5971 = vmatpush.bf16.msrb.mxu0 %v8021_v20  ;;  %5997 = vmatpush.bf16.msrb.mxu2 %v8277_v29  ;;  %v9188_v20 = vld [vmem:[%s9813_s0 + $0x10] sm:$0xff]  ;;  %s9446_s0 = scalar_lea.hbm %s9445_s24, 32 }
 0x58c   : > { %p9447_p1 = scmp.ne.s32.totalorder %s9445_s24, %s9446_s0  ;;  %p9452_p10 = scmp.lt.s32.totalorder %s9450_s9, %s9446_s0 }
 0x58e   : > { %p9448_p2 = pnand %p9447_p1, %p9727_p7  ;;  %p9453_p13 = por %p9452_p10, %p9451_p8 }
 0x58f   : > { %5972 = vmatpush.bf16.msrb.mxu0 %v8005_v4  ;;  %5998 = vmatpush.bf16.msrb.mxu2 %v8261_v5 }
 0x590   : > { %p9449_p4 = pneg %p9448_p2 }
 0x592   : > { %p9454_p0 = pnand %p9453_p13, %p9449_p4 }
 0x593   : > { %5973 = vmatpush.bf16.msrb.mxu0 %v7989_v26  ;;  %5999 = vmatpush.bf16.msrb.mxu2 %v8245_v6 }
 0x597   : > { %5974 = vmatpush.bf16.msrb.mxu0 %v7973_v22  ;;  %6000 = vmatpush.bf16.msrb.mxu2 %v8229_v58  ;;  %v9183_v22 = vpop.eup %9182 }
 0x598   : > { %v6026_v58 = vmul.f32 512.0, %v9183_v22  ;;  %vm6030_vm7 = vweird.f32 %v9183_v22 }
 0x59a   : > { %v6027_v27 = vsub.f32 1.0, %v6026_v58 }
 0x59b   : > { %5975 = vmatpush.bf16.msrb.mxu0 %v7957_v15  ;;  %6001 = vmatpush.bf16.msrb.mxu2 %v8213_v9 }
 0x59c   : > { %v6028_v11 = vmul.f32 %v9183_v22, %v6027_v27 }
 0x59e   : > { %5976 = vmatmul.bf16.vlgmr.msrb.gmra.mxu0 %v10701_v50  ;;  %6002 = vmatmul.bf16.vlgmr.msrb.gmra.mxu2 %v10703_v2  ;;  %v6029_v31 = vadd.f32 %v9183_v22, %v6028_v11 }
 0x5a0   : > { %v6031_v17 = vsel %vm6030_vm7, %v9183_v22, %v6029_v31 }
 0x5c5   : > { %v5834_v0 = vpop.f32.mrf.mxu1 }
 0x5cb   : > { %v5860_v16 = vpop.f32.mrf.mxu3 }
 0x5cd   : > { %v5836_v33 = vpop.f32.mrf.mxu1 }
 0x5d3   : > { %v5862_v49 = vpop.f32.mrf.mxu3 }
 0x5d5   : > { %v5886_v23 = vpop.f32.mrf.mxu1 }
 0x5db   : > { %v5821_v7 = vpop.f32.mrf.mxu0  ;;  %v5912_v41 = vpop.f32.mrf.mxu3 }
 0x5dc   : > { %v5822_v28 = vadd.f32 %v9186_v21, %v5821_v7 }
 0x5dd   : > { %v5888_v37 = vpop.f32.mrf.mxu1 }
 0x5de   : > { %v5835_v60 = vadd.f32 %v5834_v0, %v5822_v28 }
 0x5e1   : > { %v5847_v13 = vpop.f32.mrf.mxu2 }
 0x5e2   : > { %v5848_v12 = vadd.f32 %v5847_v13, %v5835_v60 }
 0x5e3   : > { %v5823_v43 = vpop.f32.mrf.mxu0  ;;  %v5914_v55 = vpop.f32.mrf.mxu3 }
 0x5e4   : > { %v5861_v44 = vadd.f32 %v5860_v16, %v5848_v12 }
 0x5e5   : > { %v5938_v50 = vpop.f32.mrf.mxu1 }
 0x5e9   : > { %v5849_v10 = vpop.f32.mrf.mxu2 }
 0x5eb   : > { %v5964_v2 = vpop.f32.mrf.mxu3  ;;  %v5873_v53 = vpop.f32.mrf.mxu0 }
 0x5ec   : > { %v5874_v18 = vadd.f32 %v9187_v34, %v5873_v53 }
 0x5ed   : > { %v5940_v39 = vpop.f32.mrf.mxu1 }
 0x5ee   : > { %v5887_v42 = vadd.f32 %v5886_v23, %v5874_v18 }
 0x5f1   : > { %v5899_v32 = vpop.f32.mrf.mxu2 }
 0x5f2   : > { %v5900_v51 = vadd.f32 %v5899_v32, %v5887_v42 }
 0x5f3   : > { %v5966_v35 = vpop.f32.mrf.mxu3  ;;  %v5875_v38 = vpop.f32.mrf.mxu0 }
 0x5f4   : > { %v5913_v30 = vadd.f32 %v5912_v41, %v5900_v51 }
 0x5f6   : > { %v6020_v1 = vadd.f32 %v5913_v30, %v5861_v44 }
 0x5f9   : > { %v5901_v52 = vpop.f32.mrf.mxu2 }
 0x5fb   : > { %v5925_v19 = vpop.f32.mrf.mxu0 }
 0x5fc   : > { %v5926_v29 = vadd.f32 %v9188_v20, %v5925_v19 }
 0x5fe   : > { %v5939_v62 = vadd.f32 %v5938_v50, %v5926_v29 }
 0x601   : > { %v5951_v48 = vpop.f32.mrf.mxu2 }
 0x602   : > { %v5952_v3 = vadd.f32 %v5951_v48, %v5939_v62 }
 0x603   : > { %v5927_v40 = vpop.f32.mrf.mxu0 }
 0x604   : > { %v5965_v5 = vadd.f32 %v5964_v2, %v5952_v3 }
 0x605   : > { %v5990_v14 = vpop.f32.mrf.mxu1 }
 0x606   : > { %v6021_v8 = vadd.f32 %v6020_v1, %v5965_v5 }
 0x609   : > { %v5953_v36 = vpop.f32.mrf.mxu2 }
 0x60b   : > { %v6016_v57 = vpop.f32.mrf.mxu3 }
 0x60d   : > { %v5992_v47 = vpop.f32.mrf.mxu1 }
 0x613   : > { %v6018_v24 = vpop.f32.mrf.mxu3 }
 0x61b   : > { %v5977_v25 = vpop.f32.mrf.mxu0 }
 0x61c   : > { %v5978_v4 = vadd.f32 %v9189_v45, %v5977_v25 }
 0x61e   : > { %v5991_v61 = vadd.f32 %v5990_v14, %v5978_v4 }
 0x621   : > { %v6003_v63 = vpop.f32.mrf.mxu2 }
 0x622   : > { %v6004_v59 = vadd.f32 %v6003_v63, %v5991_v61 }
 0x623   : > { %v5979_v26 = vpop.f32.mrf.mxu0 }
 0x624   : > { %v6017_v6 = vadd.f32 %v6016_v57, %v6004_v59 }
 0x626   : > { %v6022_v46 = vadd.f32 %v6021_v8, %v6017_v6 }
 0x628   : > { %6023 = vadd.xlane.f32.xlu0 %v6022_v46 }
 0x629   : > { %v6005_v56 = vpop.f32.mrf.mxu2 }
 0x69b   : > { %v6024_v15 = vpop.xlane.xlu0 %6023 }
 0x69c   : > { %v6032_v9 = vmul.f32 %v6031_v17, %v6024_v15 }
 0x69e   : > { %v6033_v0 = vsub.f32 %v5861_v44, %v6032_v9  ;;  %v6034_v16 = vsub.f32 %v5913_v30, %v6032_v9  ;;  %v6035_v33 = vsub.f32 %v5965_v5, %v6032_v9  ;;  %v6036_v49 = vsub.f32 %v6017_v6, %v6032_v9 }
 0x6a0   : > { %v6037_v23 = vmul.f32 %v6033_v0, %v6033_v0  ;;  %v6038_v7 = vmul.f32 %v6034_v16, %v6034_v16  ;;  %v6039_v41 = vmul.f32 %v6035_v33, %v6035_v33  ;;  %v6040_v28 = vmul.f32 %v6036_v49, %v6036_v49 }
 0x6a2   : > { %v6041_v21 = vadd.f32 %v6038_v7, %v6037_v23 }
 0x6a4   : > { %v6042_v37 = vadd.f32 %v6041_v21, %v6039_v41 }
 0x6a6   : > { %v6043_v60 = vadd.f32 %v6042_v37, %v6040_v28 }
 0x6a8   : > { %6044 = vadd.xlane.f32.xlu0 %v6043_v60 }
 0x6a9   : > { %9457 = shalt.err (!%p9454_p0)
}
 0x6aa   : > { %s9577_s11 = smov 4   ;;  %s10840_s16 = sld [smem:[#allocation36_spill]] }
 0x6ab   : > { %9004 = dma.vmem_to_hbm [thread:$0]  (%p9727_p7), %s6131_s12, 512, %s6133_s15, %s6100_s14, %s9572_s23, %s9572_s23, %s9577_s11  }
 0x6ac   : > { %s10841_s19 = sld [smem:[#allocation37_spill]]  ;;  %s613_s24 = scalar_lea.vmem [#allocation16], %s9809_s4 }
 0x6ad   : > { %s10842_s12 = sld [smem:[#allocation38_spill]]  ;;  %s6115_s0 = sshll.u32 %s613_s24, 4  ;;  %s6116_s0 = int_to_ptr.vmem [resolvable:$true] %s6115_s0 }
 0x6ae   : > { %s6095_s20 = scalar_lea.sflag [#allocation4], %s9806_s8 }
 0x6b0   : > { %v6062_v2 = vld [vmem:[%s10840_s16] sm:$0xf] }
 0x6b1   : > { %v6064_v39 = vperm.slane %v6062_v2, 0  ;;  %v6065_v42 = vperm.slane %v6062_v2, 1  ;;  %v6066_v32 = vperm.slane %v6062_v2, 2  ;;  %v6067_v51 = vperm.slane %v6062_v2, 3 }
 0x6b2   : > { %v6076_v34 = vld [vmem:[%s10841_s19] sm:$0xf] }
 0x6b3   : > { %v6078_v35 = vperm.slane %v6076_v34, 0  ;;  %v6079_v38 = vperm.slane %v6076_v34, 1  ;;  %v6080_v30 = vperm.slane %v6076_v34, 2  ;;  %v6081_v57 = vperm.slane %v6076_v34, 3  ;;  %s6113_s14 = scalar_lea.hbm %s10842_s12, %s8977_s28  ;;  %s9478_s4 = scalar_lea.hbm %s10842_s12, 64 }
 0x6b4   : > { %s6117_s30 = sshll.u32 %s6113_s14, 4  ;;  %s6118_s30 = int_to_ptr.hbm [resolvable:$true] %s6117_s30 }
 0x6b5   : > { %s9472_s28 = sshra.s32 %s6118_s30, 4  ;;  %s9473_s28 = int_to_ptr.hbm [resolvable:$true] %s9472_s28 }
 0x6b6   : > { %s9474_s27 = scalar_lea.hbm %s9473_s28, 32  ;;  %p9479_p12 = scmp.lt.s32.totalorder %s9473_s28, %s10842_s12 }
 0x6b7   : > { %p9475_p3 = scmp.ne.s32.totalorder %s9473_s28, %s9474_s27  ;;  %p9480_p1 = scmp.lt.s32.totalorder %s9478_s4, %s9474_s27 }
 0x6b9   : > { %p9476_p5 = pnand %p9475_p3, %p9727_p7  ;;  %p9481_p2 = por %p9480_p1, %p9479_p12 }
 0x6bb   : > { %p9477_p9 = pneg %p9476_p5 }
 0x6bd   : > { %p9482_p4 = pnand %p9481_p2, %p9477_p9 }
 0x71b   : > { %v6045_v13 = vpop.xlane.xlu0 %6044 }
 0x71c   : > { %v6046_v12 = vmul.f32 %v6045_v13, %v6031_v17 }
 0x71e   : > { %v6047_v43 = vadd.f32 1e-05, %v6046_v12 }
 0x720   : > { %9184 = vrsqrt.f32 %v6047_v43  ;;  %vm6054_vm9 = vweird.f32 %v6047_v43 }
 0x726   : > { %v9185_v55 = vpop.eup %9184 }
 0x727   : > { %v6049_v44 = vmul.f32 %v9185_v55, %v6047_v43  ;;  %vm6055_vm8 = vweird.f32 %v9185_v55 }
 0x728   : > { %vm6056_vm10 = vmor %vm6054_vm9, %vm6055_vm8 }
 0x729   : > { %v6050_v50 = vmul.f32 %v9185_v55, %v6049_v44 }
 0x72b   : > { %v6051_v10 = vmul.f32 0.5, %v6050_v50 }
 0x72d   : > { %v6052_v53 = vsub.f32 1.5, %v6051_v10 }
 0x72f   : > { %v6053_v18 = vmul.f32 %v9185_v55, %v6052_v53 }
 0x731   : > { %v6057_v52 = vsel %vm6056_vm10, %v9185_v55, %v6053_v18 }
 0x732   : > { %v6058_v19 = vmul.f32 %v6057_v52, %v6033_v0  ;;  %v6059_v48 = vmul.f32 %v6057_v52, %v6034_v16  ;;  %v6060_v14 = vmul.f32 %v6057_v52, %v6035_v33  ;;  %v6061_v40 = vmul.f32 %v6057_v52, %v6036_v49 }
 0x734   : > { %v6072_v36 = vmul.f32 %v6064_v39, %v6058_v19  ;;  %v6073_v47 = vmul.f32 %v6065_v42, %v6059_v48  ;;  %v6074_v24 = vmul.f32 %v6066_v32, %v6060_v14  ;;  %v6075_v20 = vmul.f32 %v6067_v51, %v6061_v40 }
 0x736   : > { %v6086_v29 = vadd.f32 %v6078_v35, %v6072_v36  ;;  %v6087_v62 = vadd.f32 %v6079_v38, %v6073_v47  ;;  %v6088_v25 = vadd.f32 %v6080_v30, %v6074_v24  ;;  %v6089_v3 = vadd.f32 %v6081_v57, %v6075_v20 }
 0x738   : > { %6090 = vst [vmem:[%s613_s24] sm:$0xff] %v6086_v29 }
 0x739   : > { %6091 = vst [vmem:[%s613_s24 + $0x8] sm:$0xff] %v6087_v62 }
 0x73a   : > { %6092 = vst [vmem:[%s613_s24 + $0x10] sm:$0xff] %v6088_v25 }
 0x73b   : > { %6093 = vst [vmem:[%s613_s24 + $0x18] sm:$0xff] %v6089_v3 }
 0x73c   : > { %9485 = shalt.err (!%p9482_p4)
}
 0x73d   : > { %9003 = dma.vmem_to_hbm [thread:$0]  (%p9727_p7), %s6116_s0, 512, %s6118_s30, %s6095_s20  }
 0x73e PF: > { %s10843_s8 = sld [smem:[#allocation27_spill]]  ;;  %p9034_p8 = pnand %p6367_p11, %p9683_p6 }
 0x740   : > { %p9035_p10 = pneg %p9034_p8 }
 0x744   : > { %s6147_s25 = sand.u32 1, %s10843_s8  }
 0x745   : > { %s6148_s16 = scalar_lea.sflag [#allocation4], %s6147_s25 }
 0x746   : > { %9535 = dma.done.wait (%p9035_p10), %s6148_s16, 512  }
 0x747   : > { %9537 = vsyncadd (%p9035_p10), %s6148_s16, 4294966784  ;;  %s6158_s26 = scalar_lea.sflag [#allocation18], %s6147_s25 }
 0x748   : > { %9539 = dma.done.wait (%p9035_p10), %s6158_s26, 512  }
 0x749   : > { %9541 = vsyncadd (%p9035_p10), %s6158_s26, 4294966784  ;;  %s39_s22 = sadd.s32 1, %s9564_s22   ;;  %s10845_s29 = sld [smem:[#allocation28_spill]] }
 0x74a   : > { %p36_p13 = scmp.ge.s32.totalorder %s39_s22, 4   ;;  %s10846_s19 = sld [smem:[#allocation31_spill]] }
 0x74b   : > { %s10847_s23 = sld [smem:[#allocation30_spill]]  ;;  %s10848_s17 = smov %s9548_s18 }
 0x74c   : > { %s10850_s20 = smov %s9560_s21 }
 0x74d   :  { %38 = sbr.rel (!%p36_p13) target bundleno = 23 (0x17), region = 175 }
 0x74f   : > { %s10849_s18 = smov %s10845_s29 }
 0x751   : > { %s10851_s21 = smov %s10847_s23 }
 0x752   :  { %6164 = vsyncpa [#allocation3], 1 }
 0x753   :  { %6166 = vsyncpa [#allocation3 + $0x1], 1 }
 0x754   :  { %6167 = vsyncpa [#allocation6], 1 }
 0x755   :  { %6169 = vsyncpa [#allocation6 + $0x1], 1 }
 0x756   :  { %6170 = vsyncpa [#allocation9], 1 }
 0x757   :  { %6172 = vsyncpa [#allocation9 + $0x1], 1 }
 0x758   :  { %6173 = vsyncpa [#allocation12], 1 }
 0x759   :  { %6174 = vsyncpa [#allocation15], 1 }
 0x75a   :  { %6175 = vsyncpa [#allocation4], 1 }
 0x75b   :  { %6177 = vsyncpa [#allocation4 + $0x1], 1 }
 0x75c   :  { %6178 = vsyncpa [#allocation18], 1 }
 0x75d   :  { %6180 = vsyncpa [#allocation18 + $0x1], 1 }

</bundles_post_ra>
